<compile_context>
chip_gen: v7x
topology: tpu7x:2x2x1
jax: 0.10.0
libtpu: 0.0.40
codegen_flags: <defaults>
</compile_context>

<pallas_src>
import functools

import jax
import jax.numpy as jnp
from jax.experimental import pallas as pl
from jax.experimental.pallas import tpu as pltpu

BN_EPS = 1e-5
LANE = 128
BLOCK_M = 512                      # rows per matmul tile (multiple of 8)
VMEM_LIMIT = 32 * 1024 * 1024      # explicit scoped-VMEM budget (v5e/v6e/v7x safe)


def _round_up(x, m):
    return (x + m - 1) // m * m


def _pick_block_m(m, cap=BLOCK_M):
    """Largest row tile <= cap that divides M (multiple of 8); else full M."""
    if m <= cap:
        return m
    bm = cap
    while bm >= 8:
        if m % bm == 0:
            return bm
        bm -= 8
    return m


# ---------------------------------------------------------------------------
# Pallas kernels
# ---------------------------------------------------------------------------
def _conv_bn_single_kernel(x_ref, w_ref, g_ref, beta_ref, o_ref):
    """Whole-M fused conv + BatchNorm (train-mode batch stats), single block.

    Conv bias omitted (cancels exactly under BN mean subtraction).
    LeakyReLU(True) == negative_slope 1.0 == identity, omitted.
    """
    y = jnp.dot(x_ref[...], w_ref[...], preferred_element_type=jnp.float32)
    mean = jnp.mean(y, axis=0, keepdims=True)
    var = jnp.maximum(jnp.mean(y * y, axis=0, keepdims=True) - mean * mean, 0.0)
    rstd = jax.lax.rsqrt(var + BN_EPS)
    o_ref[...] = (y - mean) * (g_ref[...] * rstd) + beta_ref[...]


def _conv_bn_tiled_kernel(x_ref, w_ref, g_ref, beta_ref, o_ref,
                          sum_ref, sq_ref, *, total_rows):
    """Two-phase tiled conv + BatchNorm.

    grid = (2, M // block_m), both axes "arbitrary" (scratch accumulates
    across the M axis, so it cannot be split across cores).
      phase 0: per-tile matmul, accumulate per-channel sum / sum-of-squares.
      phase 1: recompute the matmul tile and normalize with final batch stats.
    """
    phase = pl.program_id(0)
    tile = pl.program_id(1)

    y = jnp.dot(x_ref[...], w_ref[...], preferred_element_type=jnp.float32)

    @pl.when(jnp.logical_and(phase == 0, tile == 0))
    def _init():
        sum_ref[...] = jnp.zeros_like(sum_ref)
        sq_ref[...] = jnp.zeros_like(sq_ref)

    @pl.when(phase == 0)
    def _accumulate():
        sum_ref[...] += jnp.sum(y, axis=0, keepdims=True)
        sq_ref[...] += jnp.sum(y * y, axis=0, keepdims=True)
        # Keep the output block deterministic (lane-dense full-tile store);
        # phase 1 overwrites every block with the normalized values.
        o_ref[...] = y

    @pl.when(phase == 1)
    def _normalize():
        inv_m = 1.0 / float(total_rows)
        mean = sum_ref[...] * inv_m
        var = jnp.maximum(sq_ref[...] * inv_m - mean * mean, 0.0)
        rstd = jax.lax.rsqrt(var + BN_EPS)
        o_ref[...] = (y - mean) * (g_ref[...] * rstd) + beta_ref[...]


def _conv_bias_sigmoid_kernel(x_ref, w_ref, b_ref, o_ref):
    y = jnp.dot(x_ref[...], w_ref[...], preferred_element_type=jnp.float32)
    y = y + b_ref[...]
    o_ref[...] = pl.reciprocal(1.0 + jnp.exp(-y), approx=True)


# ---------------------------------------------------------------------------
# pallas_call wrappers
# ---------------------------------------------------------------------------
def _vmem_spec():
    return pl.BlockSpec(memory_space=pltpu.MemorySpace.VMEM)


def conv_bn(patches, w, gamma, beta):
    m, k = patches.shape
    cpad = w.shape[1]
    bm = _pick_block_m(m)
    m_tiles = m // bm
    out_shape = jax.ShapeDtypeStruct((m, cpad), jnp.float32)

    if m_tiles == 1:
        # Whole M fits one tile: single fused block, no recompute.
        return pl.pallas_call(
            _conv_bn_single_kernel,
            out_shape=out_shape,
            in_specs=[_vmem_spec() for _ in range(4)],
            out_specs=_vmem_spec(),
            compiler_params=pltpu.CompilerParams(vmem_limit_bytes=VMEM_LIMIT),
        )(patches, w, gamma, beta)

    kernel = functools.partial(_conv_bn_tiled_kernel, total_rows=m)
    return pl.pallas_call(
        kernel,
        out_shape=out_shape,
        grid_spec=pltpu.PrefetchScalarGridSpec(
            num_scalar_prefetch=0,
            grid=(2, m_tiles),
            in_specs=[
                pl.BlockSpec((bm, k), lambda p, i: (i, 0)),      # patches tile
                pl.BlockSpec((k, cpad), lambda p, i: (0, 0)),    # weights (resident)
                pl.BlockSpec((1, cpad), lambda p, i: (0, 0)),    # gamma
                pl.BlockSpec((1, cpad), lambda p, i: (0, 0)),    # beta
            ],
            out_specs=pl.BlockSpec((bm, cpad), lambda p, i: (i, 0)),
            scratch_shapes=[pltpu.VMEM((1, cpad), jnp.float32),  # sum
                            pltpu.VMEM((1, cpad), jnp.float32)], # sum of squares
        ),
        compiler_params=pltpu.CompilerParams(
            dimension_semantics=("arbitrary", "arbitrary"),
            vmem_limit_bytes=VMEM_LIMIT),
    )(patches, w, gamma, beta)


def conv_bias_sigmoid(patches, w, b):
    m, _ = patches.shape
    cpad = w.shape[1]
    return pl.pallas_call(
        _conv_bias_sigmoid_kernel,
        out_shape=jax.ShapeDtypeStruct((m, cpad), jnp.float32),
        in_specs=[_vmem_spec() for _ in range(3)],
        out_specs=_vmem_spec(),
        compiler_params=pltpu.CompilerParams(vmem_limit_bytes=VMEM_LIMIT),
    )(patches, w, b)


# ---------------------------------------------------------------------------
# Glue: im2col (layout only), parameter setup
# ---------------------------------------------------------------------------
def im2col(x_nhwc, ksize, stride, pad):
    """Unfold NHWC input into (N*Hout*Wout, ksize*ksize*Cin) rows.

    Row inner ordering is (kh, kw, cin), matching reorder_weight below.
    """
    n, h, w, c = x_nhwc.shape
    xp = jnp.pad(x_nhwc, ((0, 0), (pad, pad), (pad, pad), (0, 0)))
    hout = (h + 2 * pad - ksize) // stride + 1
    wout = (w + 2 * pad - ksize) // stride + 1
    cols = []
    for i in range(ksize):
        for j in range(ksize):
            cols.append(xp[:, i:i + stride * hout:stride,
                           j:j + stride * wout:stride, :])
    cols = jnp.stack(cols, axis=3)          # (N, Hout, Wout, kh*kw, Cin)
    return cols.reshape(n * hout * wout, ksize * ksize * c), (n, hout, wout)


def reorder_weight(w_oihw):
    """(Cout, Cin, kh, kw) -> (kh*kw*Cin, Cout), matching im2col row ordering."""
    cout, cin, kh, kw = w_oihw.shape
    return jnp.transpose(w_oihw, (2, 3, 1, 0)).reshape(kh * kw * cin, cout)


def init_params(key, ndf):
    """Deterministic synthetic parameters with PyTorch-default shapes.

    Returns (kernel_params, raw_params): kernel_params hold the reordered,
    lane-padded (Cout -> 128) tensors fed to the Pallas kernels; raw_params
    hold the original OIHW / bias tensors for the pure-JAX reference.
    """
    layer_dims = [(3, ndf), (ndf, 2 * ndf), (2 * ndf, 4 * ndf),
                  (4 * ndf, 8 * ndf), (8 * ndf, 1)]
    kernel_params, raw_params = [], []
    for cin, cout in layer_dims:
        key, kw_, kb_ = jax.random.split(key, 3)
        w = 0.05 * jax.random.normal(kw_, (cout, cin, 4, 4), jnp.float32)
        b = 0.01 * jax.random.normal(kb_, (cout,), jnp.float32)
        cpad = _round_up(cout, LANE)
        kernel_params.append(dict(
            w=jnp.pad(reorder_weight(w), ((0, 0), (0, cpad - cout))),  # (K, Cpad)
            b=jnp.pad(b, (0, cpad - cout)).reshape(1, cpad),
            gamma=jnp.pad(jnp.ones((cout,), jnp.float32),
                          (0, cpad - cout)).reshape(1, cpad),
            beta=jnp.zeros((1, cpad), jnp.float32),
        ))
        raw_params.append(dict(w=w, b=b))
    return kernel_params, raw_params


# ---------------------------------------------------------------------------
# Full forward pass of D
# ---------------------------------------------------------------------------
@functools.partial(jax.jit, static_argnums=(2,))
def d_forward(x_nchw, params, couts):
    x = jnp.transpose(x_nchw, (0, 2, 3, 1)).astype(jnp.float32)  # NCHW -> NHWC

    # 4 x [Conv(4,2,1) (bias dropped: cancels under BN) + BatchNorm
    #      + LeakyReLU(True) == identity]
    for p, cout in zip(params[:4], couts[:4]):
        patches, (n, hout, wout) = im2col(x, ksize=4, stride=2, pad=1)
        y = conv_bn(patches, p["w"], p["gamma"], p["beta"])      # (M, Cpad)
        x = y[:, :cout].reshape(n, hout, wout, cout)

    # Conv(4,1,0) + bias + Sigmoid
    p = params[4]
    patches, (n, hout, wout) = im2col(x, ksize=4, stride=1, pad=0)
    y = conv_bias_sigmoid(patches, p["w"], p["b"])               # (N, Cpad)
    out = y[:, :couts[4]].reshape(n, hout, wout, couts[4])
    return jnp.transpose(out, (0, 3, 1, 2))                      # NHWC -> NCHW


def d_forward_reference(x_nchw, raw_params):
    """Pure-JAX (XLA) reference matching the PyTorch module literally."""
    x = x_nchw
    n_layers = len(raw_params)
    for i, rp in enumerate(raw_params):
        last = i == n_layers - 1
        stride, pad = (1, 0) if last else (2, 1)
        y = jax.lax.conv_general_dilated(
            x, rp["w"], window_strides=(stride, stride),
            padding=((pad, pad), (pad, pad)),
            dimension_numbers=("NCHW", "OIHW", "NCHW"))
        y = y + rp["b"].reshape(1, -1, 1, 1)
        if not last:
            mean = jnp.mean(y, axis=(0, 2, 3), keepdims=True)
            var = jnp.mean((y - mean) ** 2, axis=(0, 2, 3), keepdims=True)
            y = (y - mean) / jnp.sqrt(var + BN_EPS)  # BatchNorm2d train, gamma=1, beta=0
            y = jnp.where(y >= 0, y, 1.0 * y)        # LeakyReLU(True): slope = 1.0
        else:
            y = jax.nn.sigmoid(y)
        x = y
    return x


if __name__ == "__main__":
    key = jax.random.PRNGKey(0)
    k_x, k_p = jax.random.split(key)

    ndf = 8
    batch = 2
    # 64x64 spatial is the smallest DCGAN-conventional size for which the
    # final 4x4/stride-1 valid conv exists (64 -> 32 -> 16 -> 8 -> 4 -> 1).
    x = jax.random.normal(k_x, (batch, 3, 64, 64), jnp.float32)
    params, raw_params = init_params(k_p, ndf)
    couts = (ndf, 2 * ndf, 4 * ndf, 8 * ndf, 1)

    out = jax.block_until_ready(d_forward(x, tuple(params), couts))
    assert out.shape == (batch, 1, 1, 1), out.shape
    assert bool(jnp.all(jnp.isfinite(out)))

    # Tolerance check vs. a pure-JAX reference (loose: approx reciprocal in
    # the sigmoid and f32 accumulation-order differences).
    ref = jax.block_until_ready(jax.jit(d_forward_reference)(x, raw_params))
    max_err = float(jnp.max(jnp.abs(out - ref)))
    assert max_err < 2e-2, f"max |pallas - reference| = {max_err}"

    print("KERNEL_OK")
</pallas_src>

<mosaic_0001>
module attributes {stable_mosaic.version = 11 : i64} {
  func.func @_conv_bn_tiled_kernel(%arg0: i32, %arg1: i32, %arg2: memref<512x48xf32, #tpu.memory_space<vmem>>, %arg3: memref<48x128xf32, #tpu.memory_space<vmem>>, %arg4: memref<1x128xf32, #tpu.memory_space<vmem>>, %arg5: memref<1x128xf32, #tpu.memory_space<vmem>>, %arg6: memref<512x128xf32, #tpu.memory_space<vmem>>, %arg7: memref<1x128xf32, #tpu.memory_space<vmem>>, %arg8: memref<1x128xf32, #tpu.memory_space<vmem>>) attributes {dimension_semantics = [#tpu.dimension_semantics<arbitrary>, #tpu.dimension_semantics<arbitrary>], iteration_bounds = array<i64: 2, 4>, scalar_prefetch = 0 : i64, scratch_operands = 2 : i64, tpu.core_type = #tpu.core_type<tc>, window_params = [{transform_indices = @transform_0, window_bounds = array<i64: 512, 48>}, {pipeline_mode = #tpu.pipeline_mode<synchronous>, transform_indices = @transform_1, window_bounds = array<i64: 48, 128>}, {pipeline_mode = #tpu.pipeline_mode<synchronous>, transform_indices = @transform_2, window_bounds = array<i64: 1, 128>}, {pipeline_mode = #tpu.pipeline_mode<synchronous>, transform_indices = @transform_3, window_bounds = array<i64: 1, 128>}, {transform_indices = @transform_4, window_bounds = array<i64: 512, 128>}]} {
    %c0 = arith.constant 0 : index
    %c0_0 = arith.constant 0 : index
    %0 = vector.load %arg2[%c0, %c0_0] : memref<512x48xf32, #tpu.memory_space<vmem>>, vector<512x48xf32>
    %c0_1 = arith.constant 0 : index
    %c0_2 = arith.constant 0 : index
    %1 = vector.load %arg3[%c0_1, %c0_2] : memref<48x128xf32, #tpu.memory_space<vmem>>, vector<48x128xf32>
    %cst = arith.constant dense<0.000000e+00> : vector<512x128xf32>
    %2 = tpu.matmul %0, %1, %cst {dimension_numbers = #tpu.dot_dimension_numbers<[1], [0], [0], [1], [0, 0, 1, 1], [], []>} : vector<512x48xf32>, vector<48x128xf32>, vector<512x128xf32> -> vector<512x128xf32>
    %c0_i32 = arith.constant 0 : i32
    %3 = arith.cmpi eq, %arg0, %c0_i32 : i32
    %c0_i32_3 = arith.constant 0 : i32
    %4 = arith.cmpi eq, %arg1, %c0_i32_3 : i32
    %5 = arith.andi %3, %4 : i1
    %6 = arith.extui %5 : i1 to i32
    %c0_i32_4 = arith.constant 0 : i32
    %7 = arith.cmpi ne, %6, %c0_i32_4 : i32
    scf.if %7 {
      %cst_8 = arith.constant 0.000000e+00 : f32
      %14 = vector.broadcast %cst_8 : f32 to vector<1x128xf32>
      %c0_9 = arith.constant 0 : index
      %c0_10 = arith.constant 0 : index
      %15 = vector.load %arg7[%c0_9, %c0_10] : memref<1x128xf32, #tpu.memory_space<vmem>>, vector<1x128xf32>
      tpu.vector_store %arg7[%c0_9, %c0_10], %14 {strides = array<i32>} : memref<1x128xf32, #tpu.memory_space<vmem>>, vector<1x128xf32>,
      %cst_11 = arith.constant 0.000000e+00 : f32
      %16 = vector.broadcast %cst_11 : f32 to vector<1x128xf32>
      %c0_12 = arith.constant 0 : index
      %c0_13 = arith.constant 0 : index
      %17 = vector.load %arg8[%c0_12, %c0_13] : memref<1x128xf32, #tpu.memory_space<vmem>>, vector<1x128xf32>
      tpu.vector_store %arg8[%c0_12, %c0_13], %16 {strides = array<i32>} : memref<1x128xf32, #tpu.memory_space<vmem>>, vector<1x128xf32>,
    } else {
    }
    %c0_i32_5 = arith.constant 0 : i32
    %8 = arith.cmpi eq, %arg0, %c0_i32_5 : i32
    %9 = arith.extui %8 : i1 to i32
    %c0_i32_6 = arith.constant 0 : i32
    %10 = arith.cmpi ne, %9, %c0_i32_6 : i32
    scf.if %10 {
      %c0_8 = arith.constant 0 : index
      %c0_9 = arith.constant 0 : index
      %14 = vector.load %arg7[%c0_8, %c0_9] : memref<1x128xf32, #tpu.memory_space<vmem>>, vector<1x128xf32>
      %cst_10 = arith.constant dense<0.000000e+00> : vector<128xf32>
      %15 = vector.multi_reduction <add>, %2, %cst_10 [0] : vector<512x128xf32> to vector<128xf32>
      %16 = vector.shape_cast %15 : vector<128xf32> to vector<1x128xf32>
      %17 = arith.addf %14, %16 : vector<1x128xf32>
      %c0_11 = arith.constant 0 : index
      %c0_12 = arith.constant 0 : index
      %18 = vector.load %arg7[%c0_11, %c0_12] : memref<1x128xf32, #tpu.memory_space<vmem>>, vector<1x128xf32>
      tpu.vector_store %arg7[%c0_11, %c0_12], %17 {strides = array<i32>} : memref<1x128xf32, #tpu.memory_space<vmem>>, vector<1x128xf32>,
      %c0_13 = arith.constant 0 : index
      %c0_14 = arith.constant 0 : index
      %19 = vector.load %arg8[%c0_13, %c0_14] : memref<1x128xf32, #tpu.memory_space<vmem>>, vector<1x128xf32>
      %20 = arith.mulf %2, %2 : vector<512x128xf32>
      %cst_15 = arith.constant dense<0.000000e+00> : vector<128xf32>
      %21 = vector.multi_reduction <add>, %20, %cst_15 [0] : vector<512x128xf32> to vector<128xf32>
      %22 = vector.shape_cast %21 : vector<128xf32> to vector<1x128xf32>
      %23 = arith.addf %19, %22 : vector<1x128xf32>
      %c0_16 = arith.constant 0 : index
      %c0_17 = arith.constant 0 : index
      %24 = vector.load %arg8[%c0_16, %c0_17] : memref<1x128xf32, #tpu.memory_space<vmem>>, vector<1x128xf32>
      tpu.vector_store %arg8[%c0_16, %c0_17], %23 {strides = array<i32>} : memref<1x128xf32, #tpu.memory_space<vmem>>, vector<1x128xf32>,
      %c0_18 = arith.constant 0 : index
      %c0_19 = arith.constant 0 : index
      %25 = vector.load %arg6[%c0_18, %c0_19] : memref<512x128xf32, #tpu.memory_space<vmem>>, vector<512x128xf32>
      tpu.vector_store %arg6[%c0_18, %c0_19], %2 {strides = array<i32>} : memref<512x128xf32, #tpu.memory_space<vmem>>, vector<512x128xf32>,
    } else {
    }
    %c1_i32 = arith.constant 1 : i32
    %11 = arith.cmpi eq, %arg0, %c1_i32 : i32
    %12 = arith.extui %11 : i1 to i32
    %c0_i32_7 = arith.constant 0 : i32
    %13 = arith.cmpi ne, %12, %c0_i32_7 : i32
    scf.if %13 {
      %c0_8 = arith.constant 0 : index
      %c0_9 = arith.constant 0 : index
      %14 = vector.load %arg7[%c0_8, %c0_9] : memref<1x128xf32, #tpu.memory_space<vmem>>, vector<1x128xf32>
      %cst_10 = arith.constant 4.8828125E-4 : f32
      %15 = vector.broadcast %cst_10 : f32 to vector<1x128xf32>
      %16 = arith.mulf %14, %15 : vector<1x128xf32>
      %c0_11 = arith.constant 0 : index
      %c0_12 = arith.constant 0 : index
      %17 = vector.load %arg8[%c0_11, %c0_12] : memref<1x128xf32, #tpu.memory_space<vmem>>, vector<1x128xf32>
      %cst_13 = arith.constant 4.8828125E-4 : f32
      %18 = vector.broadcast %cst_13 : f32 to vector<1x128xf32>
      %19 = arith.mulf %17, %18 : vector<1x128xf32>
      %20 = arith.mulf %16, %16 : vector<1x128xf32>
      %21 = arith.subf %19, %20 : vector<1x128xf32>
      %cst_14 = arith.constant 0.000000e+00 : f32
      %22 = vector.broadcast %cst_14 : f32 to vector<1x128xf32>
      %23 = arith.maximumf %21, %22 : vector<1x128xf32>
      %cst_15 = arith.constant 9.99999974E-6 : f32
      %24 = vector.broadcast %cst_15 : f32 to vector<1x128xf32>
      %25 = arith.addf %23, %24 : vector<1x128xf32>
      %26 = math.rsqrt %25 : vector<1x128xf32>
      %27 = vector.broadcast %16 : vector<1x128xf32> to vector<512x128xf32>
      %28 = arith.subf %2, %27 : vector<512x128xf32>
      %c0_16 = arith.constant 0 : index
      %c0_17 = arith.constant 0 : index
      %29 = vector.load %arg4[%c0_16, %c0_17] : memref<1x128xf32, #tpu.memory_space<vmem>>, vector<1x128xf32>
      %30 = arith.mulf %29, %26 : vector<1x128xf32>
      %31 = vector.broadcast %30 : vector<1x128xf32> to vector<512x128xf32>
      %32 = arith.mulf %28, %31 : vector<512x128xf32>
      %c0_18 = arith.constant 0 : index
      %c0_19 = arith.constant 0 : index
      %33 = vector.load %arg5[%c0_18, %c0_19] : memref<1x128xf32, #tpu.memory_space<vmem>>, vector<1x128xf32>
      %34 = vector.broadcast %33 : vector<1x128xf32> to vector<512x128xf32>
      %35 = arith.addf %32, %34 : vector<512x128xf32>
      %c0_20 = arith.constant 0 : index
      %c0_21 = arith.constant 0 : index
      %36 = vector.load %arg6[%c0_20, %c0_21] : memref<512x128xf32, #tpu.memory_space<vmem>>, vector<512x128xf32>
      tpu.vector_store %arg6[%c0_20, %c0_21], %35 {strides = array<i32>} : memref<512x128xf32, #tpu.memory_space<vmem>>, vector<512x128xf32>,
    } else {
    }
    return
  }
  func.func @transform_0(%arg0: i32, %arg1: i32) -> (i32, i32) {
    %c0_i32 = arith.constant 0 : i32
    %c0_i32_0 = arith.constant 0 : i32
    return %arg1, %c0_i32 : i32, i32
  }
  func.func @transform_1(%arg0: i32, %arg1: i32) -> (i32, i32) {
    %c0_i32 = arith.constant 0 : i32
    %c0_i32_0 = arith.constant 0 : i32
    %c0_i32_1 = arith.constant 0 : i32
    return %c0_i32, %c0_i32_0 : i32, i32
  }
  func.func @transform_2(%arg0: i32, %arg1: i32) -> (i32, i32) {
    %c0_i32 = arith.constant 0 : i32
    %c0_i32_0 = arith.constant 0 : i32
    %c0_i32_1 = arith.constant 0 : i32
    return %c0_i32, %c0_i32_0 : i32, i32
  }
  func.func @transform_3(%arg0: i32, %arg1: i32) -> (i32, i32) {
    %c0_i32 = arith.constant 0 : i32
    %c0_i32_0 = arith.constant 0 : i32
    %c0_i32_1 = arith.constant 0 : i32
    return %c0_i32, %c0_i32_0 : i32, i32
  }
  func.func @transform_4(%arg0: i32, %arg1: i32) -> (i32, i32) {
    %c0_i32 = arith.constant 0 : i32
    %c0_i32_0 = arith.constant 0 : i32
    return %arg1, %c0_i32 : i32, i32
  }
}

module attributes {stable_mosaic.version = 11 : i64} {
  func.func @_conv_bn_single_kernel(%arg0: memref<512x128xf32, #tpu.memory_space<vmem>>, %arg1: memref<128x128xf32, #tpu.memory_space<vmem>>, %arg2: memref<1x128xf32, #tpu.memory_space<vmem>>, %arg3: memref<1x128xf32, #tpu.memory_space<vmem>>, %arg4: memref<512x128xf32, #tpu.memory_space<vmem>>) attributes {dimension_semantics = [], scalar_prefetch = 0 : i64, scratch_operands = 0 : i64, tpu.core_type = #tpu.core_type<tc>} {
    %c0 = arith.constant 0 : index
    %c0_0 = arith.constant 0 : index
    %0 = vector.load %arg0[%c0, %c0_0] : memref<512x128xf32, #tpu.memory_space<vmem>>, vector<512x128xf32>
    %c0_1 = arith.constant 0 : index
    %c0_2 = arith.constant 0 : index
    %1 = vector.load %arg1[%c0_1, %c0_2] : memref<128x128xf32, #tpu.memory_space<vmem>>, vector<128x128xf32>
    %cst = arith.constant dense<0.000000e+00> : vector<512x128xf32>
    %2 = tpu.matmul %0, %1, %cst {dimension_numbers = #tpu.dot_dimension_numbers<[1], [0], [0], [1], [0, 0, 1, 1], [], []>} : vector<512x128xf32>, vector<128x128xf32>, vector<512x128xf32> -> vector<512x128xf32>
    %cst_3 = arith.constant dense<0.000000e+00> : vector<128xf32>
    %3 = vector.multi_reduction <add>, %2, %cst_3 [0] : vector<512x128xf32> to vector<128xf32>
    %4 = vector.shape_cast %3 : vector<128xf32> to vector<1x128xf32>
    %cst_4 = arith.constant 5.120000e+02 : f32
    %5 = vector.broadcast %cst_4 : f32 to vector<1x128xf32>
    %6 = arith.divf %4, %5 : vector<1x128xf32>
    %7 = arith.mulf %2, %2 : vector<512x128xf32>
    %cst_5 = arith.constant dense<0.000000e+00> : vector<128xf32>
    %8 = vector.multi_reduction <add>, %7, %cst_5 [0] : vector<512x128xf32> to vector<128xf32>
    %9 = vector.shape_cast %8 : vector<128xf32> to vector<1x128xf32>
    %cst_6 = arith.constant 5.120000e+02 : f32
    %10 = vector.broadcast %cst_6 : f32 to vector<1x128xf32>
    %11 = arith.divf %9, %10 : vector<1x128xf32>
    %12 = arith.mulf %6, %6 : vector<1x128xf32>
    %13 = arith.subf %11, %12 : vector<1x128xf32>
    %cst_7 = arith.constant 0.000000e+00 : f32
    %14 = vector.broadcast %cst_7 : f32 to vector<1x128xf32>
    %15 = arith.maximumf %13, %14 : vector<1x128xf32>
    %cst_8 = arith.constant 9.99999974E-6 : f32
    %16 = vector.broadcast %cst_8 : f32 to vector<1x128xf32>
    %17 = arith.addf %15, %16 : vector<1x128xf32>
    %18 = math.rsqrt %17 : vector<1x128xf32>
    %19 = vector.broadcast %6 : vector<1x128xf32> to vector<512x128xf32>
    %20 = arith.subf %2, %19 : vector<512x128xf32>
    %c0_9 = arith.constant 0 : index
    %c0_10 = arith.constant 0 : index
    %21 = vector.load %arg2[%c0_9, %c0_10] : memref<1x128xf32, #tpu.memory_space<vmem>>, vector<1x128xf32>
    %22 = arith.mulf %21, %18 : vector<1x128xf32>
    %23 = vector.broadcast %22 : vector<1x128xf32> to vector<512x128xf32>
    %24 = arith.mulf %20, %23 : vector<512x128xf32>
    %c0_11 = arith.constant 0 : index
    %c0_12 = arith.constant 0 : index
    %25 = vector.load %arg3[%c0_11, %c0_12] : memref<1x128xf32, #tpu.memory_space<vmem>>, vector<1x128xf32>
    %26 = vector.broadcast %25 : vector<1x128xf32> to vector<512x128xf32>
    %27 = arith.addf %24, %26 : vector<512x128xf32>
    %c0_13 = arith.constant 0 : index
    %c0_14 = arith.constant 0 : index
    %28 = vector.load %arg4[%c0_13, %c0_14] : memref<512x128xf32, #tpu.memory_space<vmem>>, vector<512x128xf32>
    tpu.vector_store %arg4[%c0_13, %c0_14], %27 {strides = array<i32>} : memref<512x128xf32, #tpu.memory_space<vmem>>, vector<512x128xf32>,
    return
  }
}

module attributes {stable_mosaic.version = 11 : i64} {
  func.func @_conv_bn_single_kernel(%arg0: memref<128x256xf32, #tpu.memory_space<vmem>>, %arg1: memref<256x128xf32, #tpu.memory_space<vmem>>, %arg2: memref<1x128xf32, #tpu.memory_space<vmem>>, %arg3: memref<1x128xf32, #tpu.memory_space<vmem>>, %arg4: memref<128x128xf32, #tpu.memory_space<vmem>>) attributes {dimension_semantics = [], scalar_prefetch = 0 : i64, scratch_operands = 0 : i64, tpu.core_type = #tpu.core_type<tc>} {
    %c0 = arith.constant 0 : index
    %c0_0 = arith.constant 0 : index
    %0 = vector.load %arg0[%c0, %c0_0] : memref<128x256xf32, #tpu.memory_space<vmem>>, vector<128x256xf32>
    %c0_1 = arith.constant 0 : index
    %c0_2 = arith.constant 0 : index
    %1 = vector.load %arg1[%c0_1, %c0_2] : memref<256x128xf32, #tpu.memory_space<vmem>>, vector<256x128xf32>
    %cst = arith.constant dense<0.000000e+00> : vector<128x128xf32>
    %2 = tpu.matmul %0, %1, %cst {dimension_numbers = #tpu.dot_dimension_numbers<[1], [0], [0], [1], [0, 0, 1, 1], [], []>} : vector<128x256xf32>, vector<256x128xf32>, vector<128x128xf32> -> vector<128x128xf32>
    %cst_3 = arith.constant dense<0.000000e+00> : vector<128xf32>
    %3 = vector.multi_reduction <add>, %2, %cst_3 [0] : vector<128x128xf32> to vector<128xf32>
    %4 = vector.shape_cast %3 : vector<128xf32> to vector<1x128xf32>
    %cst_4 = arith.constant 1.280000e+02 : f32
    %5 = vector.broadcast %cst_4 : f32 to vector<1x128xf32>
    %6 = arith.divf %4, %5 : vector<1x128xf32>
    %7 = arith.mulf %2, %2 : vector<128x128xf32>
    %cst_5 = arith.constant dense<0.000000e+00> : vector<128xf32>
    %8 = vector.multi_reduction <add>, %7, %cst_5 [0] : vector<128x128xf32> to vector<128xf32>
    %9 = vector.shape_cast %8 : vector<128xf32> to vector<1x128xf32>
    %cst_6 = arith.constant 1.280000e+02 : f32
    %10 = vector.broadcast %cst_6 : f32 to vector<1x128xf32>
    %11 = arith.divf %9, %10 : vector<1x128xf32>
    %12 = arith.mulf %6, %6 : vector<1x128xf32>
    %13 = arith.subf %11, %12 : vector<1x128xf32>
    %cst_7 = arith.constant 0.000000e+00 : f32
    %14 = vector.broadcast %cst_7 : f32 to vector<1x128xf32>
    %15 = arith.maximumf %13, %14 : vector<1x128xf32>
    %cst_8 = arith.constant 9.99999974E-6 : f32
    %16 = vector.broadcast %cst_8 : f32 to vector<1x128xf32>
    %17 = arith.addf %15, %16 : vector<1x128xf32>
    %18 = math.rsqrt %17 : vector<1x128xf32>
    %19 = vector.broadcast %6 : vector<1x128xf32> to vector<128x128xf32>
    %20 = arith.subf %2, %19 : vector<128x128xf32>
    %c0_9 = arith.constant 0 : index
    %c0_10 = arith.constant 0 : index
    %21 = vector.load %arg2[%c0_9, %c0_10] : memref<1x128xf32, #tpu.memory_space<vmem>>, vector<1x128xf32>
    %22 = arith.mulf %21, %18 : vector<1x128xf32>
    %23 = vector.broadcast %22 : vector<1x128xf32> to vector<128x128xf32>
    %24 = arith.mulf %20, %23 : vector<128x128xf32>
    %c0_11 = arith.constant 0 : index
    %c0_12 = arith.constant 0 : index
    %25 = vector.load %arg3[%c0_11, %c0_12] : memref<1x128xf32, #tpu.memory_space<vmem>>, vector<1x128xf32>
    %26 = vector.broadcast %25 : vector<1x128xf32> to vector<128x128xf32>
    %27 = arith.addf %24, %26 : vector<128x128xf32>
    %c0_13 = arith.constant 0 : index
    %c0_14 = arith.constant 0 : index
    %28 = vector.load %arg4[%c0_13, %c0_14] : memref<128x128xf32, #tpu.memory_space<vmem>>, vector<128x128xf32>
    tpu.vector_store %arg4[%c0_13, %c0_14], %27 {strides = array<i32>} : memref<128x128xf32, #tpu.memory_space<vmem>>, vector<128x128xf32>,
    return
  }
}

module attributes {stable_mosaic.version = 11 : i64} {
  func.func @_conv_bn_single_kernel(%arg0: memref<32x512xf32, #tpu.memory_space<vmem>>, %arg1: memref<512x128xf32, #tpu.memory_space<vmem>>, %arg2: memref<1x128xf32, #tpu.memory_space<vmem>>, %arg3: memref<1x128xf32, #tpu.memory_space<vmem>>, %arg4: memref<32x128xf32, #tpu.memory_space<vmem>>) attributes {dimension_semantics = [], scalar_prefetch = 0 : i64, scratch_operands = 0 : i64, tpu.core_type = #tpu.core_type<tc>} {
    %c0 = arith.constant 0 : index
    %c0_0 = arith.constant 0 : index
    %0 = vector.load %arg0[%c0, %c0_0] : memref<32x512xf32, #tpu.memory_space<vmem>>, vector<32x512xf32>
    %c0_1 = arith.constant 0 : index
    %c0_2 = arith.constant 0 : index
    %1 = vector.load %arg1[%c0_1, %c0_2] : memref<512x128xf32, #tpu.memory_space<vmem>>, vector<512x128xf32>
    %cst = arith.constant dense<0.000000e+00> : vector<32x128xf32>
    %2 = tpu.matmul %0, %1, %cst {dimension_numbers = #tpu.dot_dimension_numbers<[1], [0], [0], [1], [0, 0, 1, 1], [], []>} : vector<32x512xf32>, vector<512x128xf32>, vector<32x128xf32> -> vector<32x128xf32>
    %cst_3 = arith.constant dense<0.000000e+00> : vector<128xf32>
    %3 = vector.multi_reduction <add>, %2, %cst_3 [0] : vector<32x128xf32> to vector<128xf32>
    %4 = vector.shape_cast %3 : vector<128xf32> to vector<1x128xf32>
    %cst_4 = arith.constant 3.200000e+01 : f32
    %5 = vector.broadcast %cst_4 : f32 to vector<1x128xf32>
    %6 = arith.divf %4, %5 : vector<1x128xf32>
    %7 = arith.mulf %2, %2 : vector<32x128xf32>
    %cst_5 = arith.constant dense<0.000000e+00> : vector<128xf32>
    %8 = vector.multi_reduction <add>, %7, %cst_5 [0] : vector<32x128xf32> to vector<128xf32>
    %9 = vector.shape_cast %8 : vector<128xf32> to vector<1x128xf32>
    %cst_6 = arith.constant 3.200000e+01 : f32
    %10 = vector.broadcast %cst_6 : f32 to vector<1x128xf32>
    %11 = arith.divf %9, %10 : vector<1x128xf32>
    %12 = arith.mulf %6, %6 : vector<1x128xf32>
    %13 = arith.subf %11, %12 : vector<1x128xf32>
    %cst_7 = arith.constant 0.000000e+00 : f32
    %14 = vector.broadcast %cst_7 : f32 to vector<1x128xf32>
    %15 = arith.maximumf %13, %14 : vector<1x128xf32>
    %cst_8 = arith.constant 9.99999974E-6 : f32
    %16 = vector.broadcast %cst_8 : f32 to vector<1x128xf32>
    %17 = arith.addf %15, %16 : vector<1x128xf32>
    %18 = math.rsqrt %17 : vector<1x128xf32>
    %19 = vector.broadcast %6 : vector<1x128xf32> to vector<32x128xf32>
    %20 = arith.subf %2, %19 : vector<32x128xf32>
    %c0_9 = arith.constant 0 : index
    %c0_10 = arith.constant 0 : index
    %21 = vector.load %arg2[%c0_9, %c0_10] : memref<1x128xf32, #tpu.memory_space<vmem>>, vector<1x128xf32>
    %22 = arith.mulf %21, %18 : vector<1x128xf32>
    %23 = vector.broadcast %22 : vector<1x128xf32> to vector<32x128xf32>
    %24 = arith.mulf %20, %23 : vector<32x128xf32>
    %c0_11 = arith.constant 0 : index
    %c0_12 = arith.constant 0 : index
    %25 = vector.load %arg3[%c0_11, %c0_12] : memref<1x128xf32, #tpu.memory_space<vmem>>, vector<1x128xf32>
    %26 = vector.broadcast %25 : vector<1x128xf32> to vector<32x128xf32>
    %27 = arith.addf %24, %26 : vector<32x128xf32>
    %c0_13 = arith.constant 0 : index
    %c0_14 = arith.constant 0 : index
    %28 = vector.load %arg4[%c0_13, %c0_14] : memref<32x128xf32, #tpu.memory_space<vmem>>, vector<32x128xf32>
    tpu.vector_store %arg4[%c0_13, %c0_14], %27 {strides = array<i32>} : memref<32x128xf32, #tpu.memory_space<vmem>>, vector<32x128xf32>,
    return
  }
}

module attributes {stable_mosaic.version = 11 : i64} {
  func.func @_conv_bias_sigmoid_kernel(%arg0: memref<2x1024xf32, #tpu.memory_space<vmem>>, %arg1: memref<1024x128xf32, #tpu.memory_space<vmem>>, %arg2: memref<1x128xf32, #tpu.memory_space<vmem>>, %arg3: memref<2x128xf32, #tpu.memory_space<vmem>>) attributes {dimension_semantics = [], scalar_prefetch = 0 : i64, scratch_operands = 0 : i64, tpu.core_type = #tpu.core_type<tc>} {
    %c0 = arith.constant 0 : index
    %c0_0 = arith.constant 0 : index
    %0 = vector.load %arg0[%c0, %c0_0] : memref<2x1024xf32, #tpu.memory_space<vmem>>, vector<2x1024xf32>
    %c0_1 = arith.constant 0 : index
    %c0_2 = arith.constant 0 : index
    %1 = vector.load %arg1[%c0_1, %c0_2] : memref<1024x128xf32, #tpu.memory_space<vmem>>, vector<1024x128xf32>
    %cst = arith.constant dense<0.000000e+00> : vector<2x128xf32>
    %2 = tpu.matmul %0, %1, %cst {dimension_numbers = #tpu.dot_dimension_numbers<[1], [0], [0], [1], [0, 0, 1, 1], [], []>} : vector<2x1024xf32>, vector<1024x128xf32>, vector<2x128xf32> -> vector<2x128xf32>
    %c0_3 = arith.constant 0 : index
    %c0_4 = arith.constant 0 : index
    %3 = vector.load %arg2[%c0_3, %c0_4] : memref<1x128xf32, #tpu.memory_space<vmem>>, vector<1x128xf32>
    %4 = vector.broadcast %3 : vector<1x128xf32> to vector<2x128xf32>
    %5 = arith.addf %2, %4 : vector<2x128xf32>
    %cst_5 = arith.constant 0.000000e+00 : f32
    %6 = vector.broadcast %cst_5 : f32 to vector<2x128xf32>
    %7 = arith.subf %6, %5 : vector<2x128xf32>
    %8 = math.exp %7 : vector<2x128xf32>
    %cst_6 = arith.constant 1.000000e+00 : f32
    %9 = vector.broadcast %cst_6 : f32 to vector<2x128xf32>
    %10 = arith.addf %9, %8 : vector<2x128xf32>
    %11 = tpu.reciprocal %10 {approx = true} : vector<2x128xf32> -> vector<2x128xf32>
    %c0_7 = arith.constant 0 : index
    %c0_8 = arith.constant 0 : index
    %12 = vector.load %arg3[%c0_7, %c0_8] : memref<2x128xf32, #tpu.memory_space<vmem>>, vector<2x128xf32>
    tpu.vector_store %arg3[%c0_7, %c0_8], %11 {strides = array<i32>} : memref<2x128xf32, #tpu.memory_space<vmem>>, vector<2x128xf32>,
    return
  }
}

</mosaic_0001>

<bundles_post_ra>
// kernel: d_forward.5
= control target key start
LH: loop header
LB: loop body
LE: loop exit
PB: predicated region body
PF: predicated region fallthrough
CT: control target
= control target key end

     0   :  { %s1885_s15 = smov 0   ;;  %s1887_s16 = smov 0   ;;  %s3083_s0 = inlined_call_operand.vmem [shape: f32[2048,48], index: 0, kind: input, shape index: {}]   ;;  %s3084_s1 = inlined_call_operand.vmem [shape: f32[48,128], index: 1, kind: input, shape index: {}]   ;;  %s3085_s2 = inlined_call_operand.vmem [shape: f32[1,128], index: 2, kind: input, shape index: {}]   ;;  %s3086_s3 = inlined_call_operand.vmem [shape: f32[1,128], index: 3, kind: input, shape index: {}]   ;;  %s3087_s4 = inlined_call_operand.vmem [shape: f32[2048,128], index: 4, kind: output, shape index: {}]  }
   0x1   :  { %s1889_s17 = smov 0   ;;  %s1891_s18 = smov 0  }
   0x2   :  { %s1893_s19 = smov 0  }
   0x3 LB: > { %s23_s20 = sadd.s32 1, %s1849_s17  ;;  %s26_s21 = sadd.s32 1, %s1853_s18  ;;  %s1857_s19 = sphi %s1893_s19, %s14_s19   ;;  %s1853_s18 = sphi %s1891_s18, %s3297_s18   ;;  %s1849_s17 = sphi %s1889_s17, %s3296_s17   ;;  %s1845_s16 = sphi %s1887_s16, %s3295_s16   ;;  %s1841_s15 = sphi %s1885_s15, %s3294_s15  }
   0x4   : > { %p24_p0 = scmp.ge.s32.totalorder %s23_s20, 4  ;;  %p1506_p1 = scmp.ge.s32.totalorder %s1857_s19, 1 }
   0x5   : > { %p175_p2 = scmp.lt.s32.totalorder %s1857_s19, 9 }
   0x6   : > { %s3299_s20 = smov (%p24_p0, %s23_s20), 0  ;;  %s3301_s21 = smov (!%p24_p0, %s26_s21), %s1853_s18 }
   0x7   : > { %p176_p3 = pnand %p1506_p1, %p175_p2  ;;  %p28_p4 = scmp.ge.s32.totalorder %s3301_s21, 2 }
   0x9   : > { %s3303_s21 = smov (%p28_p4, %s3301_s21), 0  ;;  %179 = sbr.rel (%p176_p3) target bundleno = 570 (0x23a), region = 36 }
  0x10   : > { %v277_v0 = vld [vmem:[%s3084_s1] sm:$0xff]  ;;  %v278_v1 = vld [vmem:[%s3084_s1 + $0x8] sm:$0xff]  ;;  %v279_v2 = vld [vmem:[%s3084_s1 + $0x10] sm:$0xff]  ;;  %s1507_s28 = sshll.u32 %s1841_s15, 6  ;;  %vm283_vm0 = vcmask 392192   ;;  %p861_p6 = scmp.eq.s32.totalorder %s1845_s16, 0 }
  0x11   : > { %v1758_v3 = vpack.c.bf16 %v278_v1, %v277_v0  ;;  %v280_v4 = vld [vmem:[%s3084_s1 + $0x18] sm:$0xff]  ;;  %p202_p5 = scmp.lt.s32.totalorder %s1507_s28, 255  ;;  %v281_v6 = vld [vmem:[%s3084_s1 + $0x20] sm:$0xff]  ;;  %v282_v7 = vld [vmem:[%s3084_s1 + $0x28] sm:$0xff]  ;;  %p862_p7 = scmp.eq.s32.totalorder %s1841_s15, 0 }
  0x12   : > { %v1762_v5 = vpack.c.bf16 %v280_v4, %v279_v2  ;;  %v1766_v8 = vpack.c.bf16 %v282_v7, %v281_v6 }
  0x13   : > { %1759 = vmatprep.subr.bf16.mxu0 %v1758_v3  ;;  %1770 = vmatprep.subr.bf16.mxu1 %v1758_v3  ;;  %s3305_s28 = smov (!%p202_p5, %s1507_s28), 255  ;;  %p2078_p8 = pnand %p862_p7, %p861_p6 }
  0x14   : > { %1761 = vmatpush3.bf16.msra.mxu0 %v1758_v3  ;;  %1773 = vmatpush3.bf16.msra.mxu1 %v1758_v3  ;;  %s1508_s9 = sshll.u32 %s3305_s28, 3 }
  0x15   : > { %1763 = vmatprep.subr.bf16.mxu0 %v1762_v5  ;;  %1771 = vmatprep.subr.bf16.mxu1 %v1762_v5  ;;  %s1941_s12 = scalar_lea.vmem %s3083_s0, %s1508_s9  ;;  %s1946_s22 = scalar_lea.vmem %s3087_s4, %s1508_s9 }
  0x16   : > { %v213_v9 = vld [vmem:[%s1941_s12] sm:$0xff]  ;;  %v214_v11 = vld [vmem:[%s1941_s12 + $0x8] sm:$0xff]  ;;  %v215_v13 = vld [vmem:[%s1941_s12 + $0x10] sm:$0xff] }
  0x17   : > { %v245_v10 = vld [vmem:[%s1941_s12 + $0x100] sm:$0xff]  ;;  %1662 = vmatprep.mubr.msk.f32.mxu0 %vm283_vm0, %v213_v9  ;;  %v246_v12 = vld [vmem:[%s1941_s12 + $0x108] sm:$0xff]  ;;  %v247_v14 = vld [vmem:[%s1941_s12 + $0x110] sm:$0xff] }
  0x18   : > { %1765 = vmatpush3.bf16.msra.mxu0 %v1762_v5  ;;  %1774 = vmatpush3.bf16.msra.mxu1 %v1762_v5  ;;  %v216_v15 = vld [vmem:[%s1941_s12 + $0x18] sm:$0xff]  ;;  %v217_v17 = vld [vmem:[%s1941_s12 + $0x20] sm:$0xff]  ;;  %v218_v19 = vld [vmem:[%s1941_s12 + $0x28] sm:$0xff] }
  0x19   : > { %1767 = vmatprep.subr.bf16.mxu0 %v1766_v8  ;;  %1772 = vmatprep.subr.bf16.mxu1 %v1766_v8  ;;  %v248_v16 = vld [vmem:[%s1941_s12 + $0x118] sm:$0xff]  ;;  %v249_v18 = vld [vmem:[%s1941_s12 + $0x120] sm:$0xff]  ;;  %v250_v20 = vld [vmem:[%s1941_s12 + $0x128] sm:$0xff] }
  0x1a   : > { %1710 = vmatprep.mubr.msk.f32.mxu1 %vm283_vm0, %v245_v10  ;;  %v219_v21 = vld [vmem:[%s1941_s12 + $0x30] sm:$0xff]  ;;  %v220_v23 = vld [vmem:[%s1941_s12 + $0x38] sm:$0xff]  ;;  %v221_v25 = vld [vmem:[%s1941_s12 + $0x40] sm:$0xff] }
  0x1b   : > { %v251_v22 = vld [vmem:[%s1941_s12 + $0x130] sm:$0xff]  ;;  %v252_v24 = vld [vmem:[%s1941_s12 + $0x138] sm:$0xff]  ;;  %v253_v26 = vld [vmem:[%s1941_s12 + $0x140] sm:$0xff] }
  0x1c   : > { %1769 = vmatpush3.bf16.msra.mxu0 %v1766_v8  ;;  %1775 = vmatpush3.bf16.msra.mxu1 %v1766_v8  ;;  %v222_v27 = vld [vmem:[%s1941_s12 + $0x48] sm:$0xff]  ;;  %v223_v29 = vld [vmem:[%s1941_s12 + $0x50] sm:$0xff]  ;;  %v224_v31 = vld [vmem:[%s1941_s12 + $0x58] sm:$0xff] }
  0x1d   : > { %v254_v28 = vld [vmem:[%s1941_s12 + $0x148] sm:$0xff]  ;;  %v255_v30 = vld [vmem:[%s1941_s12 + $0x150] sm:$0xff]  ;;  %v256_v32 = vld [vmem:[%s1941_s12 + $0x158] sm:$0xff] }
  0x1e   : > { %v225_v33 = vld [vmem:[%s1941_s12 + $0x60] sm:$0xff]  ;;  %v226_v35 = vld [vmem:[%s1941_s12 + $0x68] sm:$0xff]  ;;  %v227_v37 = vld [vmem:[%s1941_s12 + $0x70] sm:$0xff] }
  0x1f   : > { %1663 = vmatmul.mubr.msk.f32.vlgmr.msra.gmra.mrb[0].mxu0 %vm283_vm0, %v214_v11  ;;  %1711 = vmatmul.mubr.msk.f32.vlgmr.msra.gmra.mrb[0].mxu1 %vm283_vm0, %v246_v12  ;;  %v257_v34 = vld [vmem:[%s1941_s12 + $0x160] sm:$0xff]  ;;  %v258_v36 = vld [vmem:[%s1941_s12 + $0x168] sm:$0xff]  ;;  %v259_v38 = vld [vmem:[%s1941_s12 + $0x170] sm:$0xff] }
  0x20   : > { %1665 = vmatprep.mubr.msk.f32.mxu0 %vm283_vm0, %v215_v13  ;;  %1713 = vmatprep.mubr.msk.f32.mxu1 %vm283_vm0, %v247_v14  ;;  %v228_v39 = vld [vmem:[%s1941_s12 + $0x78] sm:$0xff]  ;;  %v229_v41 = vld [vmem:[%s1941_s12 + $0x80] sm:$0xff]  ;;  %v230_v43 = vld [vmem:[%s1941_s12 + $0x88] sm:$0xff] }
  0x21   : > { %v260_v40 = vld [vmem:[%s1941_s12 + $0x178] sm:$0xff]  ;;  %v261_v42 = vld [vmem:[%s1941_s12 + $0x180] sm:$0xff]  ;;  %v262_v44 = vld [vmem:[%s1941_s12 + $0x188] sm:$0xff] }
  0x22   : > { %v231_v45 = vld [vmem:[%s1941_s12 + $0x90] sm:$0xff]  ;;  %v232_v47 = vld [vmem:[%s1941_s12 + $0x98] sm:$0xff]  ;;  %v233_v49 = vld [vmem:[%s1941_s12 + $0xa0] sm:$0xff] }
  0x23   : > { %1666 = vmatmul.mubr.msk.f32.gmra.mrb[2].mxu0 %vm283_vm0, %v216_v15  ;;  %1714 = vmatmul.mubr.msk.f32.gmra.mrb[2].mxu1 %vm283_vm0, %v248_v16  ;;  %v263_v46 = vld [vmem:[%s1941_s12 + $0x190] sm:$0xff]  ;;  %v264_v48 = vld [vmem:[%s1941_s12 + $0x198] sm:$0xff]  ;;  %v265_v50 = vld [vmem:[%s1941_s12 + $0x1a0] sm:$0xff] }
  0x24   : > { %1668 = vmatprep.mubr.msk.f32.mxu0 %vm283_vm0, %v217_v17  ;;  %1716 = vmatprep.mubr.msk.f32.mxu1 %vm283_vm0, %v249_v18  ;;  %v234_v51 = vld [vmem:[%s1941_s12 + $0xa8] sm:$0xff]  ;;  %v235_v53 = vld [vmem:[%s1941_s12 + $0xb0] sm:$0xff]  ;;  %v236_v55 = vld [vmem:[%s1941_s12 + $0xb8] sm:$0xff] }
  0x25   : > { %v266_v52 = vld [vmem:[%s1941_s12 + $0x1a8] sm:$0xff]  ;;  %v267_v54 = vld [vmem:[%s1941_s12 + $0x1b0] sm:$0xff]  ;;  %v268_v56 = vld [vmem:[%s1941_s12 + $0x1b8] sm:$0xff] }
  0x26   : > { %v237_v57 = vld [vmem:[%s1941_s12 + $0xc0] sm:$0xff]  ;;  %v238_v59 = vld [vmem:[%s1941_s12 + $0xc8] sm:$0xff]  ;;  %v239_v61 = vld [vmem:[%s1941_s12 + $0xd0] sm:$0xff] }
  0x27   : > { %1669 = vmatmul.mubr.msk.f32.gmra.mrb[4].mxu0 %vm283_vm0, %v218_v19  ;;  %1717 = vmatmul.mubr.msk.f32.gmra.mrb[4].mxu1 %vm283_vm0, %v250_v20  ;;  %v269_v58 = vld [vmem:[%s1941_s12 + $0x1c0] sm:$0xff]  ;;  %v270_v60 = vld [vmem:[%s1941_s12 + $0x1c8] sm:$0xff]  ;;  %v271_v62 = vld [vmem:[%s1941_s12 + $0x1d0] sm:$0xff] }
  0x28   : > { %1671 = vmatprep.mubr.msk.f32.mxu0 %vm283_vm0, %v219_v21  ;;  %1719 = vmatprep.mubr.msk.f32.mxu1 %vm283_vm0, %v251_v22  ;;  %v240_v63 = vld [vmem:[%s1941_s12 + $0xd8] sm:$0xff]  ;;  %v241_v1 = vld [vmem:[%s1941_s12 + $0xe0] sm:$0xff]  ;;  %v242_v3 = vld [vmem:[%s1941_s12 + $0xe8] sm:$0xff] }
  0x29   : > { %v272_v0 = vld [vmem:[%s1941_s12 + $0x1d8] sm:$0xff]  ;;  %v273_v2 = vld [vmem:[%s1941_s12 + $0x1e0] sm:$0xff]  ;;  %v274_v4 = vld [vmem:[%s1941_s12 + $0x1e8] sm:$0xff] }
  0x2a   : > { %v243_v5 = vld [vmem:[%s1941_s12 + $0xf0] sm:$0xff]  ;;  %v244_v7 = vld [vmem:[%s1941_s12 + $0xf8] sm:$0xff] }
  0x2b   : > { %1672 = vmatmul.mubr.msk.f32.gmra.mrb[6].mxu0 %vm283_vm0, %v220_v23  ;;  %1720 = vmatmul.mubr.msk.f32.gmra.mrb[6].mxu1 %vm283_vm0, %v252_v24  ;;  %v275_v6 = vld [vmem:[%s1941_s12 + $0x1f0] sm:$0xff]  ;;  %v276_v8 = vld [vmem:[%s1941_s12 + $0x1f8] sm:$0xff] }
  0x2c   : > { %1674 = vmatprep.mubr.msk.f32.mxu0 %vm283_vm0, %v221_v25  ;;  %1722 = vmatprep.mubr.msk.f32.mxu1 %vm283_vm0, %v253_v26 }
  0x2f   : > { %1675 = vmatmul.mubr.msk.f32.gmra.mrb[8].mxu0 %vm283_vm0, %v222_v27  ;;  %1723 = vmatmul.mubr.msk.f32.gmra.mrb[8].mxu1 %vm283_vm0, %v254_v28 }
  0x30   : > { %1677 = vmatprep.mubr.msk.f32.mxu0 %vm283_vm0, %v223_v29  ;;  %1725 = vmatprep.mubr.msk.f32.mxu1 %vm283_vm0, %v255_v30 }
  0x33   : > { %1678 = vmatmul.mubr.msk.f32.gmra.mrb[10].mxu0 %vm283_vm0, %v224_v31  ;;  %1726 = vmatmul.mubr.msk.f32.gmra.mrb[10].mxu1 %vm283_vm0, %v256_v32 }
  0x34   : > { %1680 = vmatprep.mubr.msk.f32.mxu0 %vm283_vm0, %v225_v33  ;;  %1728 = vmatprep.mubr.msk.f32.mxu1 %vm283_vm0, %v257_v34 }
  0x37   : > { %1681 = vmatmul.mubr.msk.f32.gmra.mrb[12].mxu0 %vm283_vm0, %v226_v35  ;;  %1729 = vmatmul.mubr.msk.f32.gmra.mrb[12].mxu1 %vm283_vm0, %v258_v36 }
  0x38   : > { %1683 = vmatprep.mubr.msk.f32.mxu0 %vm283_vm0, %v227_v37  ;;  %1731 = vmatprep.mubr.msk.f32.mxu1 %vm283_vm0, %v259_v38 }
  0x3b   : > { %1684 = vmatmul.mubr.msk.f32.gmra.mrb[14].mxu0 %vm283_vm0, %v228_v39  ;;  %1732 = vmatmul.mubr.msk.f32.gmra.mrb[14].mxu1 %vm283_vm0, %v260_v40 }
  0x3c   : > { %1686 = vmatprep.mubr.msk.f32.mxu0 %vm283_vm0, %v229_v41  ;;  %1734 = vmatprep.mubr.msk.f32.mxu1 %vm283_vm0, %v261_v42 }
  0x3f   : > { %1687 = vmatmul.mubr.msk.f32.gmra.mrb[16].mxu0 %vm283_vm0, %v230_v43  ;;  %1735 = vmatmul.mubr.msk.f32.gmra.mrb[16].mxu1 %vm283_vm0, %v262_v44 }
  0x40   : > { %1689 = vmatprep.mubr.msk.f32.mxu0 %vm283_vm0, %v231_v45  ;;  %1737 = vmatprep.mubr.msk.f32.mxu1 %vm283_vm0, %v263_v46 }
  0x43   : > { %1690 = vmatmul.mubr.msk.f32.gmra.mrb[18].mxu0 %vm283_vm0, %v232_v47  ;;  %1738 = vmatmul.mubr.msk.f32.gmra.mrb[18].mxu1 %vm283_vm0, %v264_v48 }
  0x44   : > { %1692 = vmatprep.mubr.msk.f32.mxu0 %vm283_vm0, %v233_v49  ;;  %1740 = vmatprep.mubr.msk.f32.mxu1 %vm283_vm0, %v265_v50 }
  0x47   : > { %1693 = vmatmul.mubr.msk.f32.gmra.mrb[20].mxu0 %vm283_vm0, %v234_v51  ;;  %1741 = vmatmul.mubr.msk.f32.gmra.mrb[20].mxu1 %vm283_vm0, %v266_v52 }
  0x48   : > { %1695 = vmatprep.mubr.msk.f32.mxu0 %vm283_vm0, %v235_v53  ;;  %1743 = vmatprep.mubr.msk.f32.mxu1 %vm283_vm0, %v267_v54 }
  0x4b   : > { %1696 = vmatmul.mubr.msk.f32.gmra.mrb[22].mxu0 %vm283_vm0, %v236_v55  ;;  %1744 = vmatmul.mubr.msk.f32.gmra.mrb[22].mxu1 %vm283_vm0, %v268_v56 }
  0x4c   : > { %1698 = vmatprep.mubr.msk.f32.mxu0 %vm283_vm0, %v237_v57  ;;  %1746 = vmatprep.mubr.msk.f32.mxu1 %vm283_vm0, %v269_v58 }
  0x4f   : > { %1699 = vmatmul.mubr.msk.f32.gmra.mrb[24].mxu0 %vm283_vm0, %v238_v59  ;;  %1747 = vmatmul.mubr.msk.f32.gmra.mrb[24].mxu1 %vm283_vm0, %v270_v60 }
  0x50   : > { %1701 = vmatprep.mubr.msk.f32.mxu0 %vm283_vm0, %v239_v61  ;;  %1749 = vmatprep.mubr.msk.f32.mxu1 %vm283_vm0, %v271_v62 }
  0x53   : > { %1702 = vmatmul.mubr.msk.f32.gmra.mrb[26].mxu0 %vm283_vm0, %v240_v63  ;;  %1750 = vmatmul.mubr.msk.f32.gmra.mrb[26].mxu1 %vm283_vm0, %v272_v0 }
  0x54   : > { %1704 = vmatprep.mubr.msk.f32.mxu0 %vm283_vm0, %v241_v1  ;;  %1752 = vmatprep.mubr.msk.f32.mxu1 %vm283_vm0, %v273_v2 }
  0x57   : > { %1705 = vmatmul.mubr.msk.f32.gmra.mrb[28].mxu0 %vm283_vm0, %v242_v3  ;;  %1753 = vmatmul.mubr.msk.f32.gmra.mrb[28].mxu1 %vm283_vm0, %v274_v4 }
  0x58   : > { %1707 = vmatprep.mubr.msk.f32.mxu0 %vm283_vm0, %v243_v5  ;;  %1755 = vmatprep.mubr.msk.f32.mxu1 %vm283_vm0, %v275_v6 }
  0x5b   : > { %1708 = vmatmul.mubr.msk.f32.gmra.mrb[30].mxu0 %vm283_vm0, %v244_v7  ;;  %1756 = vmatmul.mubr.msk.f32.gmra.mrb[30].mxu1 %vm283_vm0, %v276_v8 }
  0xf2   : > { %v2082_v9 = vpop.f32.mrb[0].mxu0  ;;  %v2084_v10 = vpop.f32.mrb[0].mxu1 }
  0xf3   : > { %3153 = vst [vmem:[#allocation4_spill] sm:$0xff] %v2082_v9  ;;  %v2086_v11 = vpop.f32.mrb[1].mxu0  ;;  %v2088_v12 = vpop.f32.mrb[1].mxu1 }
  0xf4   : > { %3154 = vst [vmem:[#allocation5_spill] sm:$0xff] %v2086_v11 }
  0xf6   : > { %v2090_v13 = vpop.f32.mrb[2].mxu0  ;;  %v2092_v14 = vpop.f32.mrb[2].mxu1 }
  0xf7   : > { %v2094_v15 = vpop.f32.mrb[3].mxu0  ;;  %v2096_v16 = vpop.f32.mrb[3].mxu1 }
  0xf8   : > { %3155 = vst [vmem:[#allocation6_spill] sm:$0xff] %v2094_v15 }
  0xfa   : > { %v2098_v17 = vpop.f32.mrb[4].mxu0  ;;  %v2100_v18 = vpop.f32.mrb[4].mxu1 }
  0xfb   : > { %3156 = vst [vmem:[#allocation7_spill] sm:$0xff] %v2100_v18  ;;  %v2102_v19 = vpop.f32.mrb[5].mxu0  ;;  %v2104_v20 = vpop.f32.mrb[5].mxu1 }
  0xfe   : > { %v2106_v21 = vpop.f32.mrb[6].mxu0  ;;  %v2108_v22 = vpop.f32.mrb[6].mxu1 }
  0xff   : > { %v2110_v23 = vpop.f32.mrb[7].mxu0  ;;  %v2112_v24 = vpop.f32.mrb[7].mxu1 }
 0x102   : > { %v2114_v25 = vpop.f32.mrb[8].mxu0  ;;  %v2116_v26 = vpop.f32.mrb[8].mxu1 }
 0x103   : > { %v2118_v27 = vpop.f32.mrb[9].mxu0  ;;  %v2120_v28 = vpop.f32.mrb[9].mxu1 }
 0x106   : > { %v2122_v29 = vpop.f32.mrb[10].mxu0  ;;  %v2124_v30 = vpop.f32.mrb[10].mxu1 }
 0x107   : > { %3157 = vst [vmem:[#allocation8_spill] sm:$0xff] %v2124_v30  ;;  %v2126_v31 = vpop.f32.mrb[11].mxu0  ;;  %v2128_v32 = vpop.f32.mrb[11].mxu1 }
 0x108   : > { %3158 = vst [vmem:[#allocation9_spill] sm:$0xff] %v2128_v32 }
 0x10a   : > { %v2130_v33 = vpop.f32.mrb[12].mxu0  ;;  %v2132_v34 = vpop.f32.mrb[12].mxu1 }
 0x10b   : > { %3159 = vst [vmem:[#allocation10_spill] sm:$0xff] %v2132_v34  ;;  %v2134_v35 = vpop.f32.mrb[13].mxu0  ;;  %v2136_v36 = vpop.f32.mrb[13].mxu1 }
 0x10c   : > { %3160 = vst [vmem:[#allocation11_spill] sm:$0xff] %v2136_v36 }
 0x10e   : > { %v2138_v37 = vpop.f32.mrb[14].mxu0  ;;  %v2140_v38 = vpop.f32.mrb[14].mxu1 }
 0x10f   : > { %3161 = vst [vmem:[#allocation12_spill] sm:$0xff] %v2140_v38  ;;  %v2142_v39 = vpop.f32.mrb[15].mxu0  ;;  %v2144_v40 = vpop.f32.mrb[15].mxu1 }
 0x110   : > { %3162 = vst [vmem:[#allocation13_spill] sm:$0xff] %v2144_v40 }
 0x112   : > { %v2146_v41 = vpop.f32.mrb[16].mxu0  ;;  %v2148_v42 = vpop.f32.mrb[16].mxu1 }
 0x113   : > { %3163 = vst [vmem:[#allocation14_spill] sm:$0xff] %v2148_v42  ;;  %v2150_v43 = vpop.f32.mrb[17].mxu0  ;;  %v2152_v44 = vpop.f32.mrb[17].mxu1 }
 0x114   : > { %3164 = vst [vmem:[#allocation15_spill] sm:$0xff] %v2152_v44 }
 0x116   : > { %v2154_v45 = vpop.f32.mrb[18].mxu0  ;;  %v2156_v46 = vpop.f32.mrb[18].mxu1 }
 0x117   : > { %3165 = vst [vmem:[#allocation16_spill] sm:$0xff] %v2156_v46  ;;  %v2158_v47 = vpop.f32.mrb[19].mxu0  ;;  %v2160_v48 = vpop.f32.mrb[19].mxu1 }
 0x118   : > { %3166 = vst [vmem:[#allocation17_spill] sm:$0xff] %v2160_v48 }
 0x11a   : > { %v2162_v49 = vpop.f32.mrb[20].mxu0  ;;  %v2164_v50 = vpop.f32.mrb[20].mxu1 }
 0x11b   : > { %3167 = vst [vmem:[#allocation18_spill] sm:$0xff] %v2164_v50  ;;  %v2166_v51 = vpop.f32.mrb[21].mxu0  ;;  %v2168_v52 = vpop.f32.mrb[21].mxu1 }
 0x11c   : > { %3168 = vst [vmem:[#allocation19_spill] sm:$0xff] %v2168_v52 }
 0x11e   : > { %v2170_v53 = vpop.f32.mrb[22].mxu0  ;;  %v2172_v54 = vpop.f32.mrb[22].mxu1 }
 0x11f   : > { %3169 = vst [vmem:[#allocation20_spill] sm:$0xff] %v2172_v54  ;;  %v2174_v55 = vpop.f32.mrb[23].mxu0  ;;  %v2176_v56 = vpop.f32.mrb[23].mxu1 }
 0x120   : > { %3170 = vst [vmem:[#allocation21_spill] sm:$0xff] %v2176_v56 }
 0x122   : > { %v2178_v57 = vpop.f32.mrb[24].mxu0  ;;  %v2180_v58 = vpop.f32.mrb[24].mxu1 }
 0x123   : > { %3171 = vst [vmem:[#allocation22_spill] sm:$0xff] %v2180_v58  ;;  %v2182_v59 = vpop.f32.mrb[25].mxu0  ;;  %v2184_v60 = vpop.f32.mrb[25].mxu1 }
 0x124   : > { %3172 = vst [vmem:[#allocation23_spill] sm:$0xff] %v2184_v60 }
 0x126   : > { %v2186_v61 = vpop.f32.mrb[26].mxu0  ;;  %v2188_v62 = vpop.f32.mrb[26].mxu1 }
 0x127   : > { %3173 = vst [vmem:[#allocation24_spill] sm:$0xff] %v2188_v62  ;;  %v2190_v63 = vpop.f32.mrb[27].mxu0  ;;  %v2192_v0 = vpop.f32.mrb[27].mxu1  ;;  %v1859_v62 = vmov (!%p2078_p8), 0.0  }
 0x128   : > { %3174 = vst [vmem:[#allocation25_spill] sm:$0xff] %v2192_v0  ;;  %867 = vst [vmem:[#allocation2] sm:$0x1] (!%p2078_p8), %v1859_v62 }
 0x129   : > { %868 = vst [vmem:[#allocation3] sm:$0x1] (!%p2078_p8), %v1859_v62 }
 0x12a   : > { %v2194_v1 = vpop.f32.mrb[28].mxu0  ;;  %v2196_v2 = vpop.f32.mrb[28].mxu1  ;;  %866 = sbr.rel (%p2078_p8) target bundleno = 305 (0x131), region = 40 }
 0x12b   : > { %3175 = vst [vmem:[#allocation26_spill] sm:$0xff] %v2196_v2  ;;  %v2198_v3 = vpop.f32.mrb[29].mxu0  ;;  %v2200_v4 = vpop.f32.mrb[29].mxu1 }
 0x12c   : > { %3176 = vst [vmem:[#allocation27_spill] sm:$0xff] %v2200_v4 }
 0x12e   : > { %v2202_v5 = vpop.f32.mrb[30].mxu0  ;;  %v2204_v6 = vpop.f32.mrb[30].mxu1 }
 0x12f   : > { %3177 = vst [vmem:[#allocation28_spill] sm:$0xff] %v2204_v6  ;;  %v2206_v7 = vpop.f32.mrb[31].mxu0  ;;  %v2208_v8 = vpop.f32.mrb[31].mxu1 }
 0x130   : > { %3178 = vst [vmem:[#allocation29_spill] sm:$0xff] %v2208_v8 }
 0x131 PF: > { %p1575_p9 = scmp.ne.s32.totalorder %s1845_s16, 0 }
 0x132   : > { %v2215_v62 = vadd.f32 (!%p1575_p9), %v2082_v9, %v2086_v11  ;;  %1080 = vst [vmem:[%s1946_s22] sm:$0xff] (!%p1575_p9), %v2086_v11  ;;  %1081 = vst [vmem:[%s1946_s22 + $0x8] sm:$0xff] (!%p1575_p9), %v2082_v9 }
 0x133   : > { %871 = sbr.rel (%p1575_p9) target bundleno = 484 (0x1e4), region = 44  ;;  %1082 = vst [vmem:[%s1946_s22 + $0x10] sm:$0xff] (!%p1575_p9), %v2094_v15  ;;  %1083 = vst [vmem:[%s1946_s22 + $0x18] sm:$0xff] (!%p1575_p9), %v2090_v13 }
 0x134   : > { %1084 = vst [vmem:[%s1946_s22 + $0x20] sm:$0xff] (!%p1575_p9), %v2102_v19  ;;  %1085 = vst [vmem:[%s1946_s22 + $0x28] sm:$0xff] (!%p1575_p9), %v2098_v17 }
 0x135   : > { %1086 = vst [vmem:[%s1946_s22 + $0x30] sm:$0xff] (!%p1575_p9), %v2110_v23  ;;  %1087 = vst [vmem:[%s1946_s22 + $0x38] sm:$0xff] (!%p1575_p9), %v2106_v21 }
 0x136   : > { %1088 = vst [vmem:[%s1946_s22 + $0x40] sm:$0xff] (!%p1575_p9), %v2118_v27  ;;  %1089 = vst [vmem:[%s1946_s22 + $0x48] sm:$0xff] (!%p1575_p9), %v2114_v25 }
 0x137   : > { %1090 = vst [vmem:[%s1946_s22 + $0x50] sm:$0xff] (!%p1575_p9), %v2126_v31  ;;  %1091 = vst [vmem:[%s1946_s22 + $0x58] sm:$0xff] (!%p1575_p9), %v2122_v29 }
 0x138   : > { %1092 = vst [vmem:[%s1946_s22 + $0x60] sm:$0xff] (!%p1575_p9), %v2134_v35  ;;  %1093 = vst [vmem:[%s1946_s22 + $0x68] sm:$0xff] (!%p1575_p9), %v2130_v33 }
 0x139   : > { %1094 = vst [vmem:[%s1946_s22 + $0x70] sm:$0xff] (!%p1575_p9), %v2142_v39  ;;  %1095 = vst [vmem:[%s1946_s22 + $0x78] sm:$0xff] (!%p1575_p9), %v2138_v37 }
 0x13a   : > { %1096 = vst [vmem:[%s1946_s22 + $0x80] sm:$0xff] %v2150_v43  ;;  %1097 = vst [vmem:[%s1946_s22 + $0x88] sm:$0xff] %v2146_v41 }
 0x13b   : > { %1098 = vst [vmem:[%s1946_s22 + $0x90] sm:$0xff] %v2158_v47  ;;  %1099 = vst [vmem:[%s1946_s22 + $0x98] sm:$0xff] %v2154_v45 }
 0x13c   : > { %1100 = vst [vmem:[%s1946_s22 + $0xa0] sm:$0xff] %v2166_v51  ;;  %1101 = vst [vmem:[%s1946_s22 + $0xa8] sm:$0xff] %v2162_v49 }
 0x13d   : > { %1102 = vst [vmem:[%s1946_s22 + $0xb0] sm:$0xff] %v2174_v55  ;;  %1103 = vst [vmem:[%s1946_s22 + $0xb8] sm:$0xff] %v2170_v53 }
 0x13e   : > { %1104 = vst [vmem:[%s1946_s22 + $0xc0] sm:$0xff] %v2182_v59  ;;  %1105 = vst [vmem:[%s1946_s22 + $0xc8] sm:$0xff] %v2178_v57 }
 0x13f   : > { %1106 = vst [vmem:[%s1946_s22 + $0xd0] sm:$0xff] %v2190_v63  ;;  %1107 = vst [vmem:[%s1946_s22 + $0xd8] sm:$0xff] %v2186_v61 }
 0x140   : > { %1108 = vst [vmem:[%s1946_s22 + $0xe0] sm:$0xff] %v2198_v3  ;;  %1109 = vst [vmem:[%s1946_s22 + $0xe8] sm:$0xff] %v2194_v1 }
 0x141   : > { %1110 = vst [vmem:[%s1946_s22 + $0xf0] sm:$0xff] %v2206_v7  ;;  %1111 = vst [vmem:[%s1946_s22 + $0xf8] sm:$0xff] %v2202_v5 }
 0x142   : > { %1112 = vst [vmem:[%s1946_s22 + $0x100] sm:$0xff] %v2088_v12  ;;  %1113 = vst [vmem:[%s1946_s22 + $0x108] sm:$0xff] %v2084_v10 }
 0x143   : > { %1114 = vst [vmem:[%s1946_s22 + $0x110] sm:$0xff] %v2096_v16  ;;  %1115 = vst [vmem:[%s1946_s22 + $0x118] sm:$0xff] %v2092_v14 }
 0x144   : > { %1116 = vst [vmem:[%s1946_s22 + $0x120] sm:$0xff] %v2104_v20  ;;  %1117 = vst [vmem:[%s1946_s22 + $0x128] sm:$0xff] %v2100_v18 }
 0x145   : > { %1118 = vst [vmem:[%s1946_s22 + $0x130] sm:$0xff] %v2112_v24  ;;  %1119 = vst [vmem:[%s1946_s22 + $0x138] sm:$0xff] %v2108_v22 }
 0x146   : > { %1120 = vst [vmem:[%s1946_s22 + $0x140] sm:$0xff] %v2120_v28  ;;  %1121 = vst [vmem:[%s1946_s22 + $0x148] sm:$0xff] %v2116_v26 }
 0x147   : > { %1122 = vst [vmem:[%s1946_s22 + $0x150] sm:$0xff] %v2128_v32  ;;  %1123 = vst [vmem:[%s1946_s22 + $0x158] sm:$0xff] %v2124_v30 }
 0x148   : > { %1124 = vst [vmem:[%s1946_s22 + $0x160] sm:$0xff] %v2136_v36  ;;  %1125 = vst [vmem:[%s1946_s22 + $0x168] sm:$0xff] %v2132_v34 }
 0x149   : > { %1126 = vst [vmem:[%s1946_s22 + $0x170] sm:$0xff] %v2144_v40  ;;  %1127 = vst [vmem:[%s1946_s22 + $0x178] sm:$0xff] %v2140_v38 }
 0x14a   : > { %1128 = vst [vmem:[%s1946_s22 + $0x180] sm:$0xff] %v2152_v44  ;;  %1129 = vst [vmem:[%s1946_s22 + $0x188] sm:$0xff] %v2148_v42  ;;  %v3179_v44 = vld [vmem:[#allocation24_spill] sm:$0xff] }
 0x14b   : > { %1130 = vst [vmem:[%s1946_s22 + $0x190] sm:$0xff] %v2160_v48  ;;  %1131 = vst [vmem:[%s1946_s22 + $0x198] sm:$0xff] %v2156_v46 }
 0x14c   : > { %1132 = vst [vmem:[%s1946_s22 + $0x1a0] sm:$0xff] %v2168_v52  ;;  %1133 = vst [vmem:[%s1946_s22 + $0x1a8] sm:$0xff] %v2164_v50 }
 0x14d   : > { %1134 = vst [vmem:[%s1946_s22 + $0x1b0] sm:$0xff] %v2176_v56  ;;  %1135 = vst [vmem:[%s1946_s22 + $0x1b8] sm:$0xff] %v2172_v54  ;;  %v874_v56 = vadd.f32 %v2215_v62, %v2094_v15 }
 0x14e   : > { %1136 = vst [vmem:[%s1946_s22 + $0x1c0] sm:$0xff] %v2184_v60  ;;  %1137 = vst [vmem:[%s1946_s22 + $0x1c8] sm:$0xff] %v2180_v58 }
 0x14f   : > { %1138 = vst [vmem:[%s1946_s22 + $0x1d0] sm:$0xff] %v2192_v0  ;;  %1139 = vst [vmem:[%s1946_s22 + $0x1d8] sm:$0xff] %v3179_v44  ;;  %v875_v54 = vadd.f32 %v2090_v13, %v874_v56  ;;  %v947_v56 = vmul.f32 %v2094_v15, %v2094_v15 }
 0x150   : > { %1140 = vst [vmem:[%s1946_s22 + $0x1e0] sm:$0xff] %v2200_v4  ;;  %1141 = vst [vmem:[%s1946_s22 + $0x1e8] sm:$0xff] %v2196_v2 }
 0x151   : > { %1142 = vst [vmem:[%s1946_s22 + $0x1f0] sm:$0xff] %v2208_v8  ;;  %1143 = vst [vmem:[%s1946_s22 + $0x1f8] sm:$0xff] %v2204_v6  ;;  %v876_v60 = vadd.f32 %v875_v54, %v2102_v19  ;;  %v945_v8 = vmul.f32 %v2086_v11, %v2086_v11  ;;  %v946_v6 = vmul.f32 %v2082_v9, %v2082_v9 }
 0x153   : > { %v877_v58 = vadd.f32 %v2098_v17, %v876_v60  ;;  %v1009_v60 = vadd.f32 %v946_v6, %v945_v8  ;;  %v952_v8 = vmul.f32 %v2106_v21, %v2106_v21 }
 0x155   : > { %v878_v0 = vadd.f32 %v877_v58, %v2110_v23  ;;  %v948_v58 = vmul.f32 %v2090_v13, %v2090_v13  ;;  %v1010_v11 = vadd.f32 %v1009_v60, %v947_v56  ;;  %v953_v60 = vmul.f32 %v2118_v27, %v2118_v27 }
 0x157   : > { %v879_v44 = vadd.f32 %v2106_v21, %v878_v0  ;;  %v1011_v9 = vadd.f32 %v1010_v11, %v948_v58 }
 0x159   : > { %v880_v4 = vadd.f32 %v879_v44, %v2118_v27  ;;  %v949_v44 = vmul.f32 %v2102_v19, %v2102_v19 }
 0x15b   : > { %v881_v62 = vadd.f32 %v2114_v25, %v880_v4  ;;  %v950_v4 = vmul.f32 %v2098_v17, %v2098_v17  ;;  %v1012_v50 = vadd.f32 %v1011_v9, %v949_v44 }
 0x15d   : > { %v882_v54 = vadd.f32 %v881_v62, %v2126_v31  ;;  %v951_v62 = vmul.f32 %v2110_v23, %v2110_v23 }
 0x15f   : > { %v883_v0 = vadd.f32 %v2122_v29, %v882_v54  ;;  %v1013_v54 = vadd.f32 %v1012_v50, %v950_v4  ;;  %v956_v4 = vmul.f32 %v2122_v29, %v2122_v29 }
 0x161   : > { %v884_v2 = vadd.f32 %v883_v0, %v2134_v35  ;;  %v1014_v0 = vadd.f32 %v1013_v54, %v951_v62  ;;  %v957_v54 = vmul.f32 %v2134_v35, %v2134_v35 }
 0x163   : > { %v885_v15 = vadd.f32 %v2130_v33, %v884_v2  ;;  %v954_v2 = vmul.f32 %v2114_v25, %v2114_v25  ;;  %v1015_v58 = vadd.f32 %v1014_v0, %v952_v8  ;;  %v958_v0 = vmul.f32 %v2130_v33, %v2130_v33 }
 0x165   : > { %v886_v6 = vadd.f32 %v885_v15, %v2142_v39  ;;  %v955_v15 = vmul.f32 %v2126_v31, %v2126_v31  ;;  %v1016_v44 = vadd.f32 %v1015_v58, %v953_v60  ;;  %v959_v58 = vmul.f32 %v2142_v39, %v2142_v39 }
 0x167   : > { %v887_v56 = vadd.f32 %v2138_v37, %v886_v6  ;;  %v1017_v6 = vadd.f32 %v1016_v44, %v954_v2  ;;  %v960_v44 = vmul.f32 %v2138_v37, %v2138_v37 }
 0x169   : > { %v888_v11 = vadd.f32 %v887_v56, %v2150_v43  ;;  %v1018_v56 = vadd.f32 %v1017_v6, %v955_v15  ;;  %v961_v6 = vmul.f32 %v2150_v43, %v2150_v43 }
 0x16b   : > { %v889_v9 = vadd.f32 %v2146_v41, %v888_v11  ;;  %v1019_v11 = vadd.f32 %v1018_v56, %v956_v4  ;;  %v962_v56 = vmul.f32 %v2146_v41, %v2146_v41 }
 0x16d   : > { %v890_v50 = vadd.f32 %v889_v9, %v2158_v47  ;;  %v1020_v9 = vadd.f32 %v1019_v11, %v957_v54  ;;  %v963_v11 = vmul.f32 %v2158_v47, %v2158_v47 }
 0x16f   : > { %v891_v62 = vadd.f32 %v2154_v45, %v890_v50  ;;  %v1021_v50 = vadd.f32 %v1020_v9, %v958_v0  ;;  %v964_v9 = vmul.f32 %v2154_v45, %v2154_v45 }
 0x171   : > { %v892_v8 = vadd.f32 %v891_v62, %v2166_v51  ;;  %v1022_v62 = vadd.f32 %v1021_v50, %v959_v58  ;;  %v965_v50 = vmul.f32 %v2166_v51, %v2166_v51 }
 0x173   : > { %v893_v60 = vadd.f32 %v2162_v49, %v892_v8  ;;  %v1023_v8 = vadd.f32 %v1022_v62, %v960_v44  ;;  %v966_v62 = vmul.f32 %v2162_v49, %v2162_v49 }
 0x175   : > { %v894_v2 = vadd.f32 %v893_v60, %v2174_v55  ;;  %v1024_v60 = vadd.f32 %v1023_v8, %v961_v6  ;;  %v967_v8 = vmul.f32 %v2174_v55, %v2174_v55 }
 0x177   : > { %v895_v15 = vadd.f32 %v2170_v53, %v894_v2  ;;  %v1025_v2 = vadd.f32 %v1024_v60, %v962_v56  ;;  %v968_v60 = vmul.f32 %v2170_v53, %v2170_v53 }
 0x179   : > { %v896_v4 = vadd.f32 %v895_v15, %v2182_v59  ;;  %v1026_v15 = vadd.f32 %v1025_v2, %v963_v11  ;;  %v969_v2 = vmul.f32 %v2182_v59, %v2182_v59 }
 0x17b   : > { %v897_v54 = vadd.f32 %v2178_v57, %v896_v4  ;;  %v1027_v4 = vadd.f32 %v1026_v15, %v964_v9  ;;  %v970_v15 = vmul.f32 %v2178_v57, %v2178_v57 }
 0x17d   : > { %v898_v0 = vadd.f32 %v897_v54, %v2190_v63  ;;  %v1028_v54 = vadd.f32 %v1027_v4, %v965_v50  ;;  %v971_v4 = vmul.f32 %v2190_v63, %v2190_v63 }
 0x17f   : > { %v899_v58 = vadd.f32 %v2186_v61, %v898_v0  ;;  %v1029_v0 = vadd.f32 %v1028_v54, %v966_v62  ;;  %v972_v54 = vmul.f32 %v2186_v61, %v2186_v61 }
 0x181   : > { %v900_v44 = vadd.f32 %v899_v58, %v2198_v3  ;;  %v1030_v58 = vadd.f32 %v1029_v0, %v967_v8  ;;  %v973_v0 = vmul.f32 %v2198_v3, %v2198_v3 }
 0x183   : > { %v901_v6 = vadd.f32 %v2194_v1, %v900_v44  ;;  %v1031_v44 = vadd.f32 %v1030_v58, %v968_v60  ;;  %v974_v58 = vmul.f32 %v2194_v1, %v2194_v1 }
 0x185   : > { %v902_v56 = vadd.f32 %v901_v6, %v2206_v7  ;;  %v1032_v6 = vadd.f32 %v1031_v44, %v969_v2  ;;  %v975_v44 = vmul.f32 %v2206_v7, %v2206_v7 }
 0x187   : > { %v903_v11 = vadd.f32 %v2202_v5, %v902_v56  ;;  %v1033_v56 = vadd.f32 %v1032_v6, %v970_v15  ;;  %v976_v6 = vmul.f32 %v2202_v5, %v2202_v5 }
 0x189   : > { %v904_v9 = vadd.f32 %v903_v11, %v2088_v12  ;;  %v1034_v11 = vadd.f32 %v1033_v56, %v971_v4  ;;  %v977_v56 = vmul.f32 %v2088_v12, %v2088_v12 }
 0x18b   : > { %v905_v50 = vadd.f32 %v2084_v10, %v904_v9  ;;  %v1035_v9 = vadd.f32 %v1034_v11, %v972_v54  ;;  %v978_v11 = vmul.f32 %v2084_v10, %v2084_v10 }
 0x18d   : > { %v906_v62 = vadd.f32 %v905_v50, %v2096_v16  ;;  %v1036_v50 = vadd.f32 %v1035_v9, %v973_v0  ;;  %v979_v9 = vmul.f32 %v2096_v16, %v2096_v16 }
 0x18f   : > { %v907_v8 = vadd.f32 %v2092_v14, %v906_v62  ;;  %v1037_v62 = vadd.f32 %v1036_v50, %v974_v58  ;;  %v980_v50 = vmul.f32 %v2092_v14, %v2092_v14 }
 0x191   : > { %v908_v60 = vadd.f32 %v907_v8, %v2104_v20  ;;  %v1038_v8 = vadd.f32 %v1037_v62, %v975_v44  ;;  %v981_v62 = vmul.f32 %v2104_v20, %v2104_v20 }
 0x193   : > { %v909_v2 = vadd.f32 %v2100_v18, %v908_v60  ;;  %v1039_v60 = vadd.f32 %v1038_v8, %v976_v6  ;;  %v982_v8 = vmul.f32 %v2100_v18, %v2100_v18  ;;  %v3180_v18 = vld [vmem:[#allocation15_spill] sm:$0xff] }
 0x195   : > { %v910_v15 = vadd.f32 %v909_v2, %v2112_v24  ;;  %v1040_v2 = vadd.f32 %v1039_v60, %v977_v56  ;;  %v983_v60 = vmul.f32 %v2112_v24, %v2112_v24 }
 0x197   : > { %v911_v4 = vadd.f32 %v2108_v22, %v910_v15  ;;  %v1041_v15 = vadd.f32 %v1040_v2, %v978_v11  ;;  %v984_v2 = vmul.f32 %v2108_v22, %v2108_v22 }
 0x199   : > { %v912_v54 = vadd.f32 %v911_v4, %v2120_v28  ;;  %v1042_v4 = vadd.f32 %v1041_v15, %v979_v9  ;;  %v985_v15 = vmul.f32 %v2120_v28, %v2120_v28 }
 0x19b   : > { %v913_v0 = vadd.f32 %v2116_v26, %v912_v54  ;;  %v1043_v54 = vadd.f32 %v1042_v4, %v980_v50  ;;  %v986_v4 = vmul.f32 %v2116_v26, %v2116_v26 }
 0x19d   : > { %v914_v58 = vadd.f32 %v913_v0, %v2128_v32  ;;  %v1044_v0 = vadd.f32 %v1043_v54, %v981_v62  ;;  %v987_v54 = vmul.f32 %v2128_v32, %v2128_v32  ;;  %v3181_v32 = vld [vmem:[#allocation18_spill] sm:$0xff] }
 0x19f   : > { %v915_v44 = vadd.f32 %v2124_v30, %v914_v58  ;;  %v1045_v58 = vadd.f32 %v1044_v0, %v982_v8  ;;  %v988_v0 = vmul.f32 %v2124_v30, %v2124_v30  ;;  %v3182_v30 = vld [vmem:[#allocation21_spill] sm:$0xff] }
 0x1a1   : > { %v916_v6 = vadd.f32 %v915_v44, %v2136_v36  ;;  %v1046_v44 = vadd.f32 %v1045_v58, %v983_v60  ;;  %v989_v58 = vmul.f32 %v2136_v36, %v2136_v36  ;;  %v3183_v36 = vld [vmem:[#allocation20_spill] sm:$0xff] }
 0x1a3   : > { %v917_v56 = vadd.f32 %v2132_v34, %v916_v6  ;;  %v1047_v6 = vadd.f32 %v1046_v44, %v984_v2  ;;  %v990_v44 = vmul.f32 %v2132_v34, %v2132_v34  ;;  %v3184_v34 = vld [vmem:[#allocation23_spill] sm:$0xff] }
 0x1a5   : > { %v918_v11 = vadd.f32 %v917_v56, %v2144_v40  ;;  %v1048_v56 = vadd.f32 %v1047_v6, %v985_v15  ;;  %v991_v6 = vmul.f32 %v2144_v40, %v2144_v40  ;;  %v3185_v40 = vld [vmem:[#allocation22_spill] sm:$0xff] }
 0x1a7   : > { %v919_v9 = vadd.f32 %v2140_v38, %v918_v11  ;;  %v1049_v11 = vadd.f32 %v1048_v56, %v986_v4  ;;  %v992_v56 = vmul.f32 %v2140_v38, %v2140_v38  ;;  %v3186_v38 = vld [vmem:[#allocation25_spill] sm:$0xff] }
 0x1a9   : > { %v920_v50 = vadd.f32 %v919_v9, %v3180_v18  ;;  %v1050_v9 = vadd.f32 %v1049_v11, %v987_v54  ;;  %v993_v11 = vmul.f32 %v3180_v18, %v3180_v18  ;;  %v3187_v18 = vld [vmem:[#allocation24_spill] sm:$0xff] }
 0x1ab   : > { %v921_v62 = vadd.f32 %v2148_v42, %v920_v50  ;;  %v1051_v50 = vadd.f32 %v1050_v9, %v988_v0  ;;  %v994_v9 = vmul.f32 %v2148_v42, %v2148_v42  ;;  %v3188_v42 = vld [vmem:[#allocation27_spill] sm:$0xff] }
 0x1ad   : > { %v922_v8 = vadd.f32 %v921_v62, %v2160_v48  ;;  %v1052_v62 = vadd.f32 %v1051_v50, %v989_v58  ;;  %v995_v50 = vmul.f32 %v2160_v48, %v2160_v48  ;;  %v3189_v48 = vld [vmem:[#allocation26_spill] sm:$0xff] }
 0x1af   : > { %v923_v60 = vadd.f32 %v2156_v46, %v922_v8  ;;  %v1053_v8 = vadd.f32 %v1052_v62, %v990_v44  ;;  %v996_v62 = vmul.f32 %v2156_v46, %v2156_v46  ;;  %v3190_v46 = vld [vmem:[#allocation29_spill] sm:$0xff] }
 0x1b1   : > { %v924_v2 = vadd.f32 %v923_v60, %v2168_v52  ;;  %v1054_v60 = vadd.f32 %v1053_v8, %v991_v6  ;;  %v997_v8 = vmul.f32 %v2168_v52, %v2168_v52  ;;  %v3191_v52 = vld [vmem:[#allocation28_spill] sm:$0xff] }
 0x1b3   : > { %v925_v15 = vadd.f32 %v3181_v32, %v924_v2  ;;  %v1055_v2 = vadd.f32 %v1054_v60, %v992_v56  ;;  %v998_v60 = vmul.f32 %v3181_v32, %v3181_v32 }
 0x1b5   : > { %v926_v4 = vadd.f32 %v925_v15, %v3182_v30  ;;  %v1056_v15 = vadd.f32 %v1055_v2, %v993_v11  ;;  %v999_v2 = vmul.f32 %v3182_v30, %v3182_v30  ;;  %v1003_v30 = vmul.f32 %v3186_v38, %v3186_v38 }
 0x1b7   : > { %v927_v54 = vadd.f32 %v3183_v36, %v926_v4  ;;  %v1057_v4 = vadd.f32 %v1056_v15, %v994_v9  ;;  %v1000_v15 = vmul.f32 %v3183_v36, %v3183_v36  ;;  %v1004_v36 = vmul.f32 %v3187_v18, %v3187_v18 }
 0x1b9   : > { %v928_v0 = vadd.f32 %v927_v54, %v3184_v34  ;;  %v1058_v54 = vadd.f32 %v1057_v4, %v995_v50  ;;  %v1001_v4 = vmul.f32 %v3184_v34, %v3184_v34  ;;  %v1005_v34 = vmul.f32 %v3188_v42, %v3188_v42 }
 0x1bb   : > { %v929_v58 = vadd.f32 %v3185_v40, %v928_v0  ;;  %v1059_v0 = vadd.f32 %v1058_v54, %v996_v62  ;;  %v1002_v62 = vmul.f32 %v3185_v40, %v3185_v40  ;;  %v1006_v40 = vmul.f32 %v3189_v48, %v3189_v48 }
 0x1bd   : > { %v930_v44 = vadd.f32 %v929_v58, %v3186_v38  ;;  %v1060_v58 = vadd.f32 %v1059_v0, %v997_v8  ;;  %v1007_v38 = vmul.f32 %v3190_v46, %v3190_v46 }
 0x1bf   : > { %v931_v6 = vadd.f32 %v3187_v18, %v930_v44  ;;  %v1061_v44 = vadd.f32 %v1060_v58, %v998_v60  ;;  %v1008_v18 = vmul.f32 %v3191_v52, %v3191_v52 }
 0x1c1   : > { %v932_v56 = vadd.f32 %v931_v6, %v3188_v42  ;;  %v1062_v6 = vadd.f32 %v1061_v44, %v999_v2 }
 0x1c3   : > { %v933_v11 = vadd.f32 %v3189_v48, %v932_v56  ;;  %v1063_v54 = vadd.f32 %v1062_v6, %v1000_v15  ;;  %v872_v15 = vld [vmem:[#allocation2] sm:$0x1] }
 0x1c5   : > { %v934_v9 = vadd.f32 %v933_v11, %v3190_v46  ;;  %v1064_v8 = vadd.f32 %v1063_v54, %v1001_v4 }
 0x1c7   : > { %v935_v50 = vadd.f32 %v3191_v52, %v934_v9  ;;  %v1065_v60 = vadd.f32 %v1064_v8, %v1002_v62  ;;  %v944_v8 = vld [vmem:[#allocation3] sm:$0x1] }
 0x1c9   : > { %v936_v32 = vrot.slane %v935_v50, 4  ;;  %v1066_v2 = vadd.f32 %v1065_v60, %v1003_v30 }
 0x1cb   : > { %v937_v56 = vadd.f32 %v936_v32, %v935_v50  ;;  %v1067_v9 = vadd.f32 %v1066_v2, %v1004_v36 }
 0x1cd   : > { %v938_v0 = vrot.slane %v937_v56, 2  ;;  %v1068_v50 = vadd.f32 %v1067_v9, %v1005_v34 }
 0x1cf   : > { %v939_v11 = vadd.f32 %v938_v0, %v937_v56  ;;  %v1069_v6 = vadd.f32 %v1068_v50, %v1006_v40 }
 0x1d1   : > { %v940_v58 = vrot.slane %v939_v11, 1  ;;  %v1070_v32 = vadd.f32 %v1069_v6, %v1007_v38 }
 0x1d3   : > { %v941_v44 = vadd.f32 %v940_v58, %v939_v11  ;;  %v1071_v42 = vadd.f32 %v1070_v32, %v1008_v18 }
 0x1d5   : > { %v942_v4 = vadd.f32 %v941_v44, %v872_v15  ;;  %v1072_v62 = vrot.slane %v1071_v42, 4 }
 0x1d7   : > { %943 = vst [vmem:[#allocation2] sm:$0x1] %v942_v4  ;;  %v1073_v54 = vadd.f32 %v1072_v62, %v1071_v42 }
 0x1d9   : > { %v1074_v56 = vrot.slane %v1073_v54, 2 }
 0x1db   : > { %v1075_v30 = vadd.f32 %v1074_v56, %v1073_v54 }
 0x1dd   : > { %v1076_v48 = vrot.slane %v1075_v30, 1 }
 0x1df   : > { %v1077_v0 = vadd.f32 %v1076_v48, %v1075_v30 }
 0x1e1   : > { %v1078_v36 = vadd.f32 %v1077_v0, %v944_v8 }
 0x1e3   : > { %1079 = vst [vmem:[#allocation3] sm:$0x1] %v1078_v36 }
 0x1e4 PF: > { %p1576_p10 = scmp.ne.s32.totalorder %s1845_s16, 1 }
 0x1e5   : > { %v1148_v46 = vld [vmem:[#allocation2] sm:$0x1] (!%p1576_p10)  ;;  %v1158_v52 = vlaneseq (!%p1576_p10)  ;;  %v3192_v50 = vld [vmem:[#allocation5_spill] sm:$0xff] (!%p1576_p10)  ;;  %v3193_v18 = vld [vmem:[#allocation4_spill] sm:$0xff] (!%p1576_p10) }
 0x1e6   : > { %1147 = sbr.rel (%p1576_p10) target bundleno = 570 (0x23a), region = 48  ;;  %v1149_v11 = vmul.f32 (!%p1576_p10), 0.00048828125, %v1148_v46  ;;  %v3194_v32 = vld [vmem:[#allocation6_spill] sm:$0xff] (!%p1576_p10)  ;;  %v3198_v0 = vld [vmem:[#allocation11_spill] sm:$0xff] (!%p1576_p10)  ;;  %v3204_v6 = vld [vmem:[#allocation17_spill] sm:$0xff] (!%p1576_p10) }
 0x1e7   : > { %v2537_v2 = vshrl.u32 (!%p1576_p10), %v1158_v52, 7  ;;  %v3203_v46 = vld [vmem:[#allocation14_spill] sm:$0xff] (!%p1576_p10)  ;;  %v3208_v54 = vld [vmem:[#allocation21_spill] sm:$0xff] (!%p1576_p10)  ;;  %v3209_v62 = vld [vmem:[#allocation20_spill] sm:$0xff] (!%p1576_p10) }
 0x1e8   : > { %v1152_v58 = vmul.f32 (!%p1576_p10), %v1149_v11, %v1149_v11 }
 0x1e9   : > { %v3151_v40 = vsub.s32 (!%p1576_p10), 0, %v2537_v2  ;;  %v3211_v8 = vsub.s32 (!%p1576_p10), 0, %v2537_v2  ;;  %v3216_v2 = vld [vmem:[#allocation26_spill] sm:$0xff] (!%p1576_p10) }
 0x1ea   : > { %v1150_v60 = vld [vmem:[#allocation3] sm:$0x1] (!%p1576_p10) }
 0x1eb   : > { %v1151_v34 = vmul.f32 (!%p1576_p10), 0.00048828125, %v1150_v60  ;;  %v2542_v15 = vrot.slane (!%p1576_p10), %v1149_v11, %v3151_v40  ;;  %v3197_v60 = vld [vmem:[#allocation8_spill] sm:$0xff] (!%p1576_p10)  ;;  %v2674_v11 = vld [vmem:[%s3086_s3] ss:$0 sm:$0xff] (!%p1576_p10) }
 0x1ed   : > { %v1153_v9 = vsub.f32 %v1151_v34, %v1152_v58  ;;  %v3195_v58 = vld [vmem:[#allocation7_spill] sm:$0xff]  ;;  %v3196_v34 = vld [vmem:[#allocation9_spill] sm:$0xff]  ;;  %v3219_v56 = vsub.f32 %v3192_v50, %v2542_v15  ;;  %v3222_v40 = vsub.f32 %v2090_v13, %v2542_v15  ;;  %v3226_v13 = vsub.f32 %v2106_v21, %v2542_v15 }
 0x1ef   : > { %v1154_v44 = vmax.f32 %v1153_v9, 0.0  ;;  %v1227_v9 = vld [vmem:[%s3085_s2] sm:$0x1] }
 0x1f1   : > { %v1155_v38 = vadd.f32 1e-05, %v1154_v44  ;;  %v3220_v44 = vsub.f32 %v3193_v18, %v2542_v15 }
 0x1f3   : > { %1817 = vrsqrt.f32 %v1155_v38 }
 0x1fd   : > { %v1818_v30 = vpop.eup %1817 }
 0x1fe   : > { %v1228_v36 = vmul.f32 %v1818_v30, %v1227_v9  ;;  %v3210_v30 = vld [vmem:[#allocation23_spill] sm:$0xff] }
 0x1ff   : > { %v3215_v9 = vld [vmem:[#allocation27_spill] sm:$0xff] }
 0x200   : > { %v2663_v42 = vrot.slane %v1228_v36, %v3211_v8  ;;  %v3217_v36 = vld [vmem:[#allocation29_spill] sm:$0xff]  ;;  %v3221_v8 = vsub.f32 %v3194_v32, %v2542_v15 }
 0x202   : > { %v1235_v38 = vmul.f32 %v2663_v42, %v3219_v56  ;;  %v1236_v52 = vmul.f32 %v2663_v42, %v3220_v44  ;;  %v1237_v4 = vmul.f32 %v2663_v42, %v3221_v8  ;;  %v1238_v50 = vmul.f32 %v2663_v42, %v3222_v40 }
 0x203   : > { %v3223_v56 = vsub.f32 %v2102_v19, %v2542_v15  ;;  %v3224_v44 = vsub.f32 %v2098_v17, %v2542_v15  ;;  %v3225_v8 = vsub.f32 %v2110_v23, %v2542_v15  ;;  %v1242_v40 = vmul.f32 %v2663_v42, %v3226_v13 }
 0x204   : > { %v1306_v19 = vadd.f32 %v2674_v11, %v1235_v38  ;;  %v1308_v17 = vadd.f32 %v2674_v11, %v1237_v4  ;;  %v3228_v38 = vsub.f32 %v2114_v25, %v2542_v15  ;;  %v3231_v25 = vsub.f32 %v2134_v35, %v2542_v15 }
 0x205   : > { %v1239_v18 = vmul.f32 %v2663_v42, %v3223_v56  ;;  %v1240_v32 = vmul.f32 %v2663_v42, %v3224_v44  ;;  %v1241_v48 = vmul.f32 %v2663_v42, %v3225_v8  ;;  %v1307_v56 = vadd.f32 %v2674_v11, %v1236_v52 }
 0x206   : > { %v1309_v44 = vadd.f32 %v2674_v11, %v1238_v50  ;;  %v1313_v13 = vadd.f32 %v2674_v11, %v1242_v40  ;;  %1370 = vst [vmem:[%s1946_s22] sm:$0xff] %v1306_v19  ;;  %1372 = vst [vmem:[%s1946_s22 + $0x10] sm:$0xff] %v1308_v17  ;;  %v3227_v52 = vsub.f32 %v2118_v27, %v2542_v15 }
 0x207   : > { %v1310_v23 = vadd.f32 %v2674_v11, %v1239_v18  ;;  %v1311_v8 = vadd.f32 %v2674_v11, %v1240_v32  ;;  %v1312_v21 = vadd.f32 %v2674_v11, %v1241_v48  ;;  %1371 = vst [vmem:[%s1946_s22 + $0x8] sm:$0xff] %v1307_v56  ;;  %v1244_v50 = vmul.f32 %v2663_v42, %v3228_v38 }
 0x208   : > { %1373 = vst [vmem:[%s1946_s22 + $0x18] sm:$0xff] %v1309_v44  ;;  %v1243_v4 = vmul.f32 %v2663_v42, %v3227_v52  ;;  %v3229_v18 = vsub.f32 %v2126_v31, %v2542_v15  ;;  %v3230_v32 = vsub.f32 %v2122_v29, %v2542_v15  ;;  %1377 = vst [vmem:[%s1946_s22 + $0x38] sm:$0xff] %v1313_v13 }
 0x209   : > { %1374 = vst [vmem:[%s1946_s22 + $0x20] sm:$0xff] %v1310_v23  ;;  %1375 = vst [vmem:[%s1946_s22 + $0x28] sm:$0xff] %v1311_v8  ;;  %v1247_v27 = vmul.f32 %v2663_v42, %v3231_v25  ;;  %v3232_v31 = vsub.f32 %v2130_v33, %v2542_v15  ;;  %v3233_v19 = vsub.f32 %v2142_v39, %v2542_v15 }
 0x20a   : > { %v1245_v48 = vmul.f32 %v2663_v42, %v3229_v18  ;;  %v1246_v40 = vmul.f32 %v2663_v42, %v3230_v32  ;;  %1376 = vst [vmem:[%s1946_s22 + $0x30] sm:$0xff] %v1312_v21  ;;  %v3234_v17 = vsub.f32 %v2138_v37, %v2542_v15  ;;  %v1314_v35 = vadd.f32 %v2674_v11, %v1243_v4 }
 0x20b   : > { %v1248_v29 = vmul.f32 %v2663_v42, %v3232_v31  ;;  %v1249_v56 = vmul.f32 %v2663_v42, %v3233_v19  ;;  %v1315_v23 = vadd.f32 %v2674_v11, %v1244_v50  ;;  %v1318_v39 = vadd.f32 %v2674_v11, %v1247_v27 }
 0x20c   : > { %v1250_v44 = vmul.f32 %v2663_v42, %v3234_v17  ;;  %v1316_v33 = vadd.f32 %v2674_v11, %v1245_v48  ;;  %v1317_v8 = vadd.f32 %v2674_v11, %v1246_v40  ;;  %1378 = vst [vmem:[%s1946_s22 + $0x40] sm:$0xff] %v1314_v35  ;;  %v3235_v52 = vsub.f32 %v2150_v43, %v2542_v15 }
 0x20d   : > { %v1319_v21 = vadd.f32 %v2674_v11, %v1248_v29  ;;  %v1320_v37 = vadd.f32 %v2674_v11, %v1249_v56  ;;  %1379 = vst [vmem:[%s1946_s22 + $0x48] sm:$0xff] %v1315_v23  ;;  %v3236_v38 = vsub.f32 %v2146_v41, %v2542_v15  ;;  %v3237_v18 = vsub.f32 %v2158_v47, %v2542_v15 }
 0x20e   : > { %v1321_v13 = vadd.f32 %v2674_v11, %v1250_v44  ;;  %1380 = vst [vmem:[%s1946_s22 + $0x50] sm:$0xff] %v1316_v33  ;;  %1381 = vst [vmem:[%s1946_s22 + $0x58] sm:$0xff] %v1317_v8  ;;  %v1251_v4 = vmul.f32 %v2663_v42, %v3235_v52  ;;  %v3238_v32 = vsub.f32 %v2154_v45, %v2542_v15 }
 0x20f   : > { %v1252_v50 = vmul.f32 %v2663_v42, %v3236_v38  ;;  %v1253_v48 = vmul.f32 %v2663_v42, %v3237_v18  ;;  %1382 = vst [vmem:[%s1946_s22 + $0x60] sm:$0xff] %v1318_v39  ;;  %1383 = vst [vmem:[%s1946_s22 + $0x68] sm:$0xff] %v1319_v21  ;;  %v3239_v41 = vsub.f32 %v2166_v51, %v2542_v15 }
 0x210   : > { %v1254_v40 = vmul.f32 %v2663_v42, %v3238_v32  ;;  %1384 = vst [vmem:[%s1946_s22 + $0x70] sm:$0xff] %v1320_v37  ;;  %1385 = vst [vmem:[%s1946_s22 + $0x78] sm:$0xff] %v1321_v13  ;;  %v3240_v47 = vsub.f32 %v2162_v49, %v2542_v15  ;;  %v3241_v25 = vsub.f32 %v2174_v55, %v2542_v15 }
 0x211   : > { %v1255_v43 = vmul.f32 %v2663_v42, %v3239_v41  ;;  %v3242_v31 = vsub.f32 %v2170_v53, %v2542_v15  ;;  %v1322_v51 = vadd.f32 %v2674_v11, %v1251_v4  ;;  %v1323_v19 = vadd.f32 %v2674_v11, %v1252_v50 }
 0x212   : > { %v1256_v45 = vmul.f32 %v2663_v42, %v3240_v47  ;;  %v1257_v27 = vmul.f32 %v2663_v42, %v3241_v25  ;;  %v1324_v49 = vadd.f32 %v2674_v11, %v1253_v48  ;;  %v1325_v56 = vadd.f32 %v2674_v11, %v1254_v40 }
 0x213   : > { %v1258_v29 = vmul.f32 %v2663_v42, %v3242_v31  ;;  %v1326_v55 = vadd.f32 %v2674_v11, %v1255_v43  ;;  %1386 = vst [vmem:[%s1946_s22 + $0x80] sm:$0xff] %v1322_v51  ;;  %1387 = vst [vmem:[%s1946_s22 + $0x88] sm:$0xff] %v1323_v19  ;;  %v3243_v35 = vsub.f32 %v2182_v59, %v2542_v15 }
 0x214   : > { %v1327_v17 = vadd.f32 %v2674_v11, %v1256_v45  ;;  %v1328_v53 = vadd.f32 %v2674_v11, %v1257_v27  ;;  %1388 = vst [vmem:[%s1946_s22 + $0x90] sm:$0xff] %v1324_v49  ;;  %1389 = vst [vmem:[%s1946_s22 + $0x98] sm:$0xff] %v1325_v56  ;;  %v3244_v33 = vsub.f32 %v2178_v57, %v2542_v15 }
 0x215   : > { %v1329_v44 = vadd.f32 %v2674_v11, %v1258_v29  ;;  %v1259_v23 = vmul.f32 %v2663_v42, %v3243_v35  ;;  %v3245_v39 = vsub.f32 %v2190_v63, %v2542_v15  ;;  %v3246_v37 = vsub.f32 %v2186_v61, %v2542_v15  ;;  %1390 = vst [vmem:[%s1946_s22 + $0xa0] sm:$0xff] %v1326_v55 }
 0x216   : > { %v1260_v8 = vmul.f32 %v2663_v42, %v3244_v33  ;;  %1391 = vst [vmem:[%s1946_s22 + $0xa8] sm:$0xff] %v1327_v17  ;;  %1392 = vst [vmem:[%s1946_s22 + $0xb0] sm:$0xff] %v1328_v53  ;;  %v3247_v57 = vsub.f32 %v2198_v3, %v2542_v15  ;;  %v3248_v63 = vsub.f32 %v2194_v1, %v2542_v15 }
 0x217   : > { %v1261_v21 = vmul.f32 %v2663_v42, %v3245_v39  ;;  %v1262_v13 = vmul.f32 %v2663_v42, %v3246_v37  ;;  %1393 = vst [vmem:[%s1946_s22 + $0xb8] sm:$0xff] %v1329_v44  ;;  %v3249_v52 = vsub.f32 %v2206_v7, %v2542_v15  ;;  %v3250_v38 = vsub.f32 %v2202_v5, %v2542_v15 }
 0x218   : > { %v1263_v59 = vmul.f32 %v2663_v42, %v3247_v57  ;;  %v1264_v61 = vmul.f32 %v2663_v42, %v3248_v63  ;;  %v1330_v3 = vadd.f32 %v2674_v11, %v1259_v23  ;;  %v1331_v18 = vadd.f32 %v2674_v11, %v1260_v8 }
 0x219   : > { %v1265_v4 = vmul.f32 %v2663_v42, %v3249_v52  ;;  %v1266_v50 = vmul.f32 %v2663_v42, %v3250_v38  ;;  %v1332_v1 = vadd.f32 %v2674_v11, %v1261_v21  ;;  %v1333_v48 = vadd.f32 %v2674_v11, %v1262_v13  ;;  %v3268_v52 = vld [vmem:[#allocation12_spill] sm:$0xff] }
 0x21a   : > { %v1334_v7 = vadd.f32 %v2674_v11, %v1263_v59  ;;  %v1335_v32 = vadd.f32 %v2674_v11, %v1264_v61  ;;  %1394 = vst [vmem:[%s1946_s22 + $0xc0] sm:$0xff] %v1330_v3  ;;  %1395 = vst [vmem:[%s1946_s22 + $0xc8] sm:$0xff] %v1331_v18  ;;  %v3251_v41 = vsub.f32 %v2088_v12, %v2542_v15  ;;  %v3266_v59 = vld [vmem:[#allocation13_spill] sm:$0xff] }
 0x21b   : > { %v1336_v5 = vadd.f32 %v2674_v11, %v1265_v4  ;;  %v1337_v40 = vadd.f32 %v2674_v11, %v1266_v50  ;;  %1396 = vst [vmem:[%s1946_s22 + $0xd0] sm:$0xff] %v1332_v1  ;;  %1397 = vst [vmem:[%s1946_s22 + $0xd8] sm:$0xff] %v1333_v48  ;;  %v3252_v47 = vsub.f32 %v2084_v10, %v2542_v15 }
 0x21c   : > { %v1267_v43 = vmul.f32 %v2663_v42, %v3251_v41  ;;  %v3253_v25 = vsub.f32 %v2096_v16, %v2542_v15  ;;  %v3254_v31 = vsub.f32 %v2092_v14, %v2542_v15  ;;  %1398 = vst [vmem:[%s1946_s22 + $0xe0] sm:$0xff] %v1334_v7  ;;  %1399 = vst [vmem:[%s1946_s22 + $0xe8] sm:$0xff] %v1335_v32 }
 0x21d   : > { %v1268_v45 = vmul.f32 %v2663_v42, %v3252_v47  ;;  %1400 = vst [vmem:[%s1946_s22 + $0xf0] sm:$0xff] %v1336_v5  ;;  %1401 = vst [vmem:[%s1946_s22 + $0xf8] sm:$0xff] %v1337_v40  ;;  %v3255_v10 = vsub.f32 %v2104_v20, %v2542_v15  ;;  %v3256_v16 = vsub.f32 %v3195_v58, %v2542_v15  ;;  %v3270_v5 = vld [vmem:[#allocation15_spill] sm:$0xff] }
 0x21e   : > { %v1269_v27 = vmul.f32 %v2663_v42, %v3253_v25  ;;  %v1270_v29 = vmul.f32 %v2663_v42, %v3254_v31  ;;  %v3257_v51 = vsub.f32 %v2112_v24, %v2542_v15  ;;  %v3258_v49 = vsub.f32 %v2108_v22, %v2542_v15 }
 0x21f   : > { %v1271_v12 = vmul.f32 %v2663_v42, %v3255_v10  ;;  %v1272_v14 = vmul.f32 %v2663_v42, %v3256_v16  ;;  %v1338_v20 = vadd.f32 %v2674_v11, %v1267_v43  ;;  %v1339_v55 = vadd.f32 %v2674_v11, %v1268_v45 }
 0x220   : > { %v1273_v19 = vmul.f32 %v2663_v42, %v3257_v51  ;;  %v1274_v56 = vmul.f32 %v2663_v42, %v3258_v49  ;;  %v1340_v58 = vadd.f32 %v2674_v11, %v1269_v27  ;;  %v1341_v17 = vadd.f32 %v2674_v11, %v1270_v29  ;;  %v3274_v27 = vld [vmem:[#allocation16_spill] sm:$0xff] }
 0x221   : > { %v1342_v24 = vadd.f32 %v2674_v11, %v1271_v12  ;;  %v1343_v53 = vadd.f32 %v2674_v11, %v1272_v14  ;;  %1402 = vst [vmem:[%s1946_s22 + $0x100] sm:$0xff] %v1338_v20  ;;  %1403 = vst [vmem:[%s1946_s22 + $0x108] sm:$0xff] %v1339_v55  ;;  %v3259_v35 = vsub.f32 %v2120_v28, %v2542_v15  ;;  %v3278_v12 = vld [vmem:[#allocation18_spill] sm:$0xff] }
 0x222   : > { %v1344_v22 = vadd.f32 %v2674_v11, %v1273_v19  ;;  %v1345_v44 = vadd.f32 %v2674_v11, %v1274_v56  ;;  %1404 = vst [vmem:[%s1946_s22 + $0x110] sm:$0xff] %v1340_v58  ;;  %1405 = vst [vmem:[%s1946_s22 + $0x118] sm:$0xff] %v1341_v17  ;;  %v3260_v33 = vsub.f32 %v2116_v26, %v2542_v15 }
 0x223   : > { %v1275_v23 = vmul.f32 %v2663_v42, %v3259_v35  ;;  %v3261_v39 = vsub.f32 %v3196_v34, %v2542_v15  ;;  %v3262_v37 = vsub.f32 %v3197_v60, %v2542_v15  ;;  %1406 = vst [vmem:[%s1946_s22 + $0x120] sm:$0xff] %v1342_v24  ;;  %1407 = vst [vmem:[%s1946_s22 + $0x128] sm:$0xff] %v1343_v53  ;;  %v3264_v34 = vld [vmem:[#allocation10_spill] sm:$0xff] }
 0x224   : > { %v1276_v8 = vmul.f32 %v2663_v42, %v3260_v33  ;;  %1408 = vst [vmem:[%s1946_s22 + $0x130] sm:$0xff] %v1344_v22  ;;  %1409 = vst [vmem:[%s1946_s22 + $0x138] sm:$0xff] %v1345_v44  ;;  %v3263_v26 = vsub.f32 %v3198_v0, %v2542_v15  ;;  %v3265_v57 = vsub.f32 %v3264_v34, %v2542_v15  ;;  %v3283_v35 = vld [vmem:[#allocation22_spill] sm:$0xff] }
 0x225   : > { %v1277_v21 = vmul.f32 %v2663_v42, %v3261_v39  ;;  %v1278_v13 = vmul.f32 %v2663_v42, %v3262_v37  ;;  %v3267_v63 = vsub.f32 %v3266_v59, %v2542_v15  ;;  %v3269_v4 = vsub.f32 %v3268_v52, %v2542_v15  ;;  %v3287_v37 = vld [vmem:[#allocation24_spill] sm:$0xff] }
 0x226   : > { %v1279_v28 = vmul.f32 %v2663_v42, %v3263_v26  ;;  %v1280_v60 = vmul.f32 %v2663_v42, %v3265_v57  ;;  %v1346_v0 = vadd.f32 %v2674_v11, %v1275_v23  ;;  %v1347_v50 = vadd.f32 %v2674_v11, %v1276_v8  ;;  %v3285_v8 = vld [vmem:[#allocation25_spill] sm:$0xff] }
 0x227   : > { %v1281_v61 = vmul.f32 %v2663_v42, %v3267_v63  ;;  %v1282_v38 = vmul.f32 %v2663_v42, %v3269_v4  ;;  %v1348_v3 = vadd.f32 %v2674_v11, %v1277_v21  ;;  %v1349_v18 = vadd.f32 %v2674_v11, %v1278_v13  ;;  %v3292_v63 = vld [vmem:[#allocation28_spill] sm:$0xff] }
 0x228   : > { %v1350_v1 = vadd.f32 %v2674_v11, %v1279_v28  ;;  %v1351_v48 = vadd.f32 %v2674_v11, %v1280_v60  ;;  %1410 = vst [vmem:[%s1946_s22 + $0x140] sm:$0xff] %v1346_v0  ;;  %1411 = vst [vmem:[%s1946_s22 + $0x148] sm:$0xff] %v1347_v50  ;;  %v3271_v40 = vsub.f32 %v3270_v5, %v2542_v15 }
 0x229   : > { %v1352_v7 = vadd.f32 %v2674_v11, %v1281_v61  ;;  %v1353_v32 = vadd.f32 %v2674_v11, %v1282_v38  ;;  %1412 = vst [vmem:[%s1946_s22 + $0x150] sm:$0xff] %v1348_v3  ;;  %1413 = vst [vmem:[%s1946_s22 + $0x158] sm:$0xff] %v1349_v18  ;;  %v3272_v43 = vsub.f32 %v3203_v46, %v2542_v15  ;;  %v3276_v46 = vld [vmem:[#allocation19_spill] sm:$0xff] }
 0x22a   : > { %v1283_v41 = vmul.f32 %v2663_v42, %v3271_v40  ;;  %v3273_v45 = vsub.f32 %v3204_v6, %v2542_v15  ;;  %v3275_v31 = vsub.f32 %v3274_v27, %v2542_v15  ;;  %1414 = vst [vmem:[%s1946_s22 + $0x160] sm:$0xff] %v1350_v1  ;;  %1415 = vst [vmem:[%s1946_s22 + $0x168] sm:$0xff] %v1351_v48 }
 0x22b   : > { %v1284_v47 = vmul.f32 %v2663_v42, %v3272_v43  ;;  %1416 = vst [vmem:[%s1946_s22 + $0x170] sm:$0xff] %v1352_v7  ;;  %1417 = vst [vmem:[%s1946_s22 + $0x178] sm:$0xff] %v1353_v32  ;;  %v3277_v10 = vsub.f32 %v3276_v46, %v2542_v15  ;;  %v3279_v16 = vsub.f32 %v3278_v12, %v2542_v15 }
 0x22c   : > { %v1285_v25 = vmul.f32 %v2663_v42, %v3273_v45  ;;  %v1286_v29 = vmul.f32 %v2663_v42, %v3275_v31  ;;  %v3280_v51 = vsub.f32 %v3208_v54, %v2542_v15  ;;  %v3281_v49 = vsub.f32 %v3209_v62, %v2542_v15 }
 0x22d   : > { %v1287_v6 = vmul.f32 %v2663_v42, %v3277_v10  ;;  %v1288_v14 = vmul.f32 %v2663_v42, %v3279_v16  ;;  %v1354_v20 = vadd.f32 %v2674_v11, %v1283_v41  ;;  %v1355_v55 = vadd.f32 %v2674_v11, %v1284_v47 }
 0x22e   : > { %v1289_v19 = vmul.f32 %v2663_v42, %v3280_v51  ;;  %v1290_v56 = vmul.f32 %v2663_v42, %v3281_v49  ;;  %v1356_v58 = vadd.f32 %v2674_v11, %v1285_v25  ;;  %v1357_v17 = vadd.f32 %v2674_v11, %v1286_v29 }
 0x22f   : > { %v1358_v54 = vadd.f32 %v2674_v11, %v1287_v6  ;;  %v1359_v24 = vadd.f32 %v2674_v11, %v1288_v14  ;;  %1418 = vst [vmem:[%s1946_s22 + $0x180] sm:$0xff] %v1354_v20  ;;  %1419 = vst [vmem:[%s1946_s22 + $0x188] sm:$0xff] %v1355_v55  ;;  %v3282_v22 = vsub.f32 %v3210_v30, %v2542_v15 }
 0x230   : > { %v1360_v62 = vadd.f32 %v2674_v11, %v1289_v19  ;;  %v1361_v53 = vadd.f32 %v2674_v11, %v1290_v56  ;;  %1420 = vst [vmem:[%s1946_s22 + $0x190] sm:$0xff] %v1356_v58  ;;  %1421 = vst [vmem:[%s1946_s22 + $0x198] sm:$0xff] %v1357_v17  ;;  %v3284_v23 = vsub.f32 %v3283_v35, %v2542_v15 }
 0x231   : > { %v1291_v44 = vmul.f32 %v2663_v42, %v3282_v22  ;;  %v3286_v39 = vsub.f32 %v3285_v8, %v2542_v15  ;;  %v3288_v13 = vsub.f32 %v3287_v37, %v2542_v15  ;;  %1422 = vst [vmem:[%s1946_s22 + $0x1a0] sm:$0xff] %v1358_v54  ;;  %1423 = vst [vmem:[%s1946_s22 + $0x1a8] sm:$0xff] %v1359_v24 }
 0x232   : > { %v1292_v33 = vmul.f32 %v2663_v42, %v3284_v23  ;;  %1424 = vst [vmem:[%s1946_s22 + $0x1b0] sm:$0xff] %v1360_v62  ;;  %1425 = vst [vmem:[%s1946_s22 + $0x1b8] sm:$0xff] %v1361_v53  ;;  %v3289_v30 = vsub.f32 %v3215_v9, %v2542_v15  ;;  %v3290_v34 = vsub.f32 %v3216_v2, %v2542_v15 }
 0x233   : > { %v1293_v21 = vmul.f32 %v2663_v42, %v3286_v39  ;;  %v1294_v26 = vmul.f32 %v2663_v42, %v3288_v13  ;;  %v3291_v60 = vsub.f32 %v3217_v36, %v2542_v15  ;;  %v3293_v61 = vsub.f32 %v3292_v63, %v2542_v15 }
 0x234   : > { %v1295_v28 = vmul.f32 %v2663_v42, %v3289_v30  ;;  %v1296_v57 = vmul.f32 %v2663_v42, %v3290_v34  ;;  %v1362_v52 = vadd.f32 %v2674_v11, %v1291_v44  ;;  %v1363_v2 = vadd.f32 %v2674_v11, %v1292_v33 }
 0x235   : > { %v1297_v59 = vmul.f32 %v2663_v42, %v3291_v60  ;;  %v1298_v9 = vmul.f32 %v2663_v42, %v3293_v61  ;;  %v1364_v4 = vadd.f32 %v2674_v11, %v1293_v21  ;;  %v1365_v38 = vadd.f32 %v2674_v11, %v1294_v26 }
 0x236   : > { %v1366_v36 = vadd.f32 %v2674_v11, %v1295_v28  ;;  %v1367_v0 = vadd.f32 %v2674_v11, %v1296_v57  ;;  %1426 = vst [vmem:[%s1946_s22 + $0x1c0] sm:$0xff] %v1362_v52  ;;  %1427 = vst [vmem:[%s1946_s22 + $0x1c8] sm:$0xff] %v1363_v2 }
 0x237   : > { %v1368_v50 = vadd.f32 %v2674_v11, %v1297_v59  ;;  %v1369_v15 = vadd.f32 %v2674_v11, %v1298_v9  ;;  %1428 = vst [vmem:[%s1946_s22 + $0x1d0] sm:$0xff] %v1364_v4  ;;  %1429 = vst [vmem:[%s1946_s22 + $0x1d8] sm:$0xff] %v1365_v38 }
 0x238   : > { %1430 = vst [vmem:[%s1946_s22 + $0x1e0] sm:$0xff] %v1366_v36  ;;  %1431 = vst [vmem:[%s1946_s22 + $0x1e8] sm:$0xff] %v1367_v0 }
 0x239   : > { %1432 = vst [vmem:[%s1946_s22 + $0x1f0] sm:$0xff] %v1368_v50  ;;  %1433 = vst [vmem:[%s1946_s22 + $0x1f8] sm:$0xff] %v1369_v15 }
 0x23a PF: > { %s14_s19 = sadd.s32 1, %s1857_s19   ;;  %s3294_s15 = smov %s1849_s17 }
 0x23b   : > { %p11_p11 = scmp.ge.s32.totalorder %s14_s19, 10   ;;  %s3295_s16 = smov %s1853_s18 }
 0x23c   : > { %s3296_s17 = smov %s3299_s20  ;;  %s3297_s18 = smov %s3303_s21 }
 0x23d   :  { %13 = sbr.rel (!%p11_p11) target bundleno = 3 (0x3), region = 78 }

// kernel: d_forward.6
= control target key start
LH: loop header
LB: loop body
LE: loop exit
PB: predicated region body
PF: predicated region fallthrough
CT: control target
= control target key end

     0   :  { %s2660_s1 = inlined_call_operand.vmem [shape: f32[128,128], index: 1, kind: input, shape index: {}]   ;;  %s2661_s0 = inlined_call_operand.vmem [shape: f32[512,128], index: 0, kind: input, shape index: {}]   ;;  %s2662_s2 = inlined_call_operand.vmem [shape: f32[1,128], index: 2, kind: input, shape index: {}]   ;;  %s2663_s3 = inlined_call_operand.vmem [shape: f32[1,128], index: 3, kind: input, shape index: {}]   ;;  %s2664_s4 = inlined_call_operand.vmem [shape: f32[512,128], index: 4, kind: output, shape index: {}]  }
   0x1   :  { %v81_v0 = vld [vmem:[%s2660_s1] sm:$0xff]  ;;  %v82_v1 = vld [vmem:[%s2660_s1 + $0x8] sm:$0xff]  ;;  %v83_v2 = vld [vmem:[%s2660_s1 + $0x10] sm:$0xff] }
   0x2   :  { %v1176_v3 = vpack.c.bf16 %v82_v1, %v81_v0  ;;  %v84_v4 = vld [vmem:[%s2660_s1 + $0x18] sm:$0xff]  ;;  %v85_v6 = vld [vmem:[%s2660_s1 + $0x20] sm:$0xff]  ;;  %v86_v7 = vld [vmem:[%s2660_s1 + $0x28] sm:$0xff] }
   0x3   :  { %v1180_v5 = vpack.c.bf16 %v84_v4, %v83_v2  ;;  %v1184_v8 = vpack.c.bf16 %v86_v7, %v85_v6  ;;  %v17_v9 = vld [vmem:[%s2661_s0] sm:$0xff]  ;;  %v87_v10 = vld [vmem:[%s2660_s1 + $0x30] sm:$0xff]  ;;  %v88_v11 = vld [vmem:[%s2660_s1 + $0x38] sm:$0xff] }
   0x4   :  { %1177 = vmatprep.subr.bf16.mxu0 %v1176_v3  ;;  %1208 = vmatprep.subr.bf16.mxu1 %v1176_v3  ;;  %v1188_v12 = vpack.c.bf16 %v88_v11, %v87_v10  ;;  %v89_v13 = vld [vmem:[%s2660_s1 + $0x40] sm:$0xff]  ;;  %v90_v14 = vld [vmem:[%s2660_s1 + $0x48] sm:$0xff]  ;;  %v91_v16 = vld [vmem:[%s2660_s1 + $0x50] sm:$0xff] }
   0x5   :  { %1179 = vmatpush3.bf16.msra.mxu0 %v1176_v3  ;;  %1216 = vmatpush3.bf16.msra.mxu1 %v1176_v3  ;;  %v1192_v15 = vpack.c.bf16 %v90_v14, %v89_v13  ;;  %v92_v17 = vld [vmem:[%s2660_s1 + $0x58] sm:$0xff]  ;;  %v49_v18 = vld [vmem:[%s2661_s0 + $0x100] sm:$0xff]  ;;  %v94_v21 = vld [vmem:[%s2660_s1 + $0x68] sm:$0xff] }
   0x6   :  { %1181 = vmatprep.subr.bf16.mxu0 %v1180_v5  ;;  %1209 = vmatprep.subr.bf16.mxu1 %v1180_v5  ;;  %v1196_v19 = vpack.c.bf16 %v92_v17, %v91_v16  ;;  %v93_v20 = vld [vmem:[%s2660_s1 + $0x60] sm:$0xff]  ;;  %v95_v23 = vld [vmem:[%s2660_s1 + $0x70] sm:$0xff]  ;;  %v96_v24 = vld [vmem:[%s2660_s1 + $0x78] sm:$0xff] }
   0x7   :  { %1080 = vmatprep.mubr.f32.mxu0 %v17_v9  ;;  %1128 = vmatprep.mubr.f32.mxu1 %v49_v18  ;;  %v1200_v22 = vpack.c.bf16 %v94_v21, %v93_v20  ;;  %v1204_v25 = vpack.c.bf16 %v96_v24, %v95_v23  ;;  %v18_v26 = vld [vmem:[%s2661_s0 + $0x8] sm:$0xff]  ;;  %v19_v28 = vld [vmem:[%s2661_s0 + $0x10] sm:$0xff]  ;;  %v20_v30 = vld [vmem:[%s2661_s0 + $0x18] sm:$0xff] }
   0x8   :  { %v50_v27 = vld [vmem:[%s2661_s0 + $0x108] sm:$0xff]  ;;  %v51_v29 = vld [vmem:[%s2661_s0 + $0x110] sm:$0xff]  ;;  %v52_v31 = vld [vmem:[%s2661_s0 + $0x118] sm:$0xff] }
   0x9   :  { %1183 = vmatpush3.bf16.msra.mxu0 %v1180_v5  ;;  %1217 = vmatpush3.bf16.msra.mxu1 %v1180_v5  ;;  %v21_v32 = vld [vmem:[%s2661_s0 + $0x20] sm:$0xff]  ;;  %v22_v34 = vld [vmem:[%s2661_s0 + $0x28] sm:$0xff]  ;;  %v23_v36 = vld [vmem:[%s2661_s0 + $0x30] sm:$0xff] }
   0xa   :  { %1185 = vmatprep.subr.bf16.mxu0 %v1184_v8  ;;  %1210 = vmatprep.subr.bf16.mxu1 %v1184_v8  ;;  %v53_v33 = vld [vmem:[%s2661_s0 + $0x120] sm:$0xff]  ;;  %v54_v35 = vld [vmem:[%s2661_s0 + $0x128] sm:$0xff]  ;;  %v55_v37 = vld [vmem:[%s2661_s0 + $0x130] sm:$0xff] }
   0xb   :  { %v24_v38 = vld [vmem:[%s2661_s0 + $0x38] sm:$0xff]  ;;  %v25_v40 = vld [vmem:[%s2661_s0 + $0x40] sm:$0xff]  ;;  %v26_v42 = vld [vmem:[%s2661_s0 + $0x48] sm:$0xff] }
   0xc   :  { %v56_v39 = vld [vmem:[%s2661_s0 + $0x138] sm:$0xff]  ;;  %v57_v41 = vld [vmem:[%s2661_s0 + $0x140] sm:$0xff]  ;;  %v58_v43 = vld [vmem:[%s2661_s0 + $0x148] sm:$0xff] }
   0xd   :  { %1187 = vmatpush3.bf16.msra.mxu0 %v1184_v8  ;;  %1218 = vmatpush3.bf16.msra.mxu1 %v1184_v8  ;;  %v27_v44 = vld [vmem:[%s2661_s0 + $0x50] sm:$0xff]  ;;  %v28_v46 = vld [vmem:[%s2661_s0 + $0x58] sm:$0xff]  ;;  %v29_v48 = vld [vmem:[%s2661_s0 + $0x60] sm:$0xff] }
   0xe   :  { %1189 = vmatprep.subr.bf16.mxu0 %v1188_v12  ;;  %1211 = vmatprep.subr.bf16.mxu1 %v1188_v12  ;;  %v59_v45 = vld [vmem:[%s2661_s0 + $0x150] sm:$0xff]  ;;  %v60_v47 = vld [vmem:[%s2661_s0 + $0x158] sm:$0xff]  ;;  %v61_v49 = vld [vmem:[%s2661_s0 + $0x160] sm:$0xff] }
   0xf   :  { %v30_v50 = vld [vmem:[%s2661_s0 + $0x68] sm:$0xff]  ;;  %v31_v52 = vld [vmem:[%s2661_s0 + $0x70] sm:$0xff]  ;;  %v32_v54 = vld [vmem:[%s2661_s0 + $0x78] sm:$0xff] }
  0x10   :  { %v62_v51 = vld [vmem:[%s2661_s0 + $0x168] sm:$0xff]  ;;  %v63_v53 = vld [vmem:[%s2661_s0 + $0x170] sm:$0xff]  ;;  %v64_v55 = vld [vmem:[%s2661_s0 + $0x178] sm:$0xff] }
  0x11   :  { %1191 = vmatpush3.bf16.msra.mxu0 %v1188_v12  ;;  %1219 = vmatpush3.bf16.msra.mxu1 %v1188_v12  ;;  %v33_v56 = vld [vmem:[%s2661_s0 + $0x80] sm:$0xff]  ;;  %v34_v58 = vld [vmem:[%s2661_s0 + $0x88] sm:$0xff]  ;;  %v35_v60 = vld [vmem:[%s2661_s0 + $0x90] sm:$0xff] }
  0x12   :  { %1193 = vmatprep.subr.bf16.mxu0 %v1192_v15  ;;  %1212 = vmatprep.subr.bf16.mxu1 %v1192_v15  ;;  %v65_v57 = vld [vmem:[%s2661_s0 + $0x180] sm:$0xff]  ;;  %v66_v59 = vld [vmem:[%s2661_s0 + $0x188] sm:$0xff]  ;;  %v67_v61 = vld [vmem:[%s2661_s0 + $0x190] sm:$0xff] }
  0x13   :  { %v36_v62 = vld [vmem:[%s2661_s0 + $0x98] sm:$0xff]  ;;  %v37_v0 = vld [vmem:[%s2661_s0 + $0xa0] sm:$0xff]  ;;  %v38_v2 = vld [vmem:[%s2661_s0 + $0xa8] sm:$0xff] }
  0x14   :  { %v68_v63 = vld [vmem:[%s2661_s0 + $0x198] sm:$0xff]  ;;  %v69_v1 = vld [vmem:[%s2661_s0 + $0x1a0] sm:$0xff]  ;;  %v70_v3 = vld [vmem:[%s2661_s0 + $0x1a8] sm:$0xff] }
  0x15   :  { %1195 = vmatpush3.bf16.msra.mxu0 %v1192_v15  ;;  %1220 = vmatpush3.bf16.msra.mxu1 %v1192_v15  ;;  %v39_v4 = vld [vmem:[%s2661_s0 + $0xb0] sm:$0xff]  ;;  %v40_v6 = vld [vmem:[%s2661_s0 + $0xb8] sm:$0xff]  ;;  %v41_v8 = vld [vmem:[%s2661_s0 + $0xc0] sm:$0xff] }
  0x16   :  { %1197 = vmatprep.subr.bf16.mxu0 %v1196_v19  ;;  %1213 = vmatprep.subr.bf16.mxu1 %v1196_v19  ;;  %v71_v5 = vld [vmem:[%s2661_s0 + $0x1b0] sm:$0xff]  ;;  %v72_v7 = vld [vmem:[%s2661_s0 + $0x1b8] sm:$0xff]  ;;  %v73_v9 = vld [vmem:[%s2661_s0 + $0x1c0] sm:$0xff] }
  0x17   :  { %v42_v10 = vld [vmem:[%s2661_s0 + $0xc8] sm:$0xff]  ;;  %v43_v12 = vld [vmem:[%s2661_s0 + $0xd0] sm:$0xff]  ;;  %v44_v14 = vld [vmem:[%s2661_s0 + $0xd8] sm:$0xff] }
  0x18   :  { %v74_v11 = vld [vmem:[%s2661_s0 + $0x1c8] sm:$0xff]  ;;  %v75_v13 = vld [vmem:[%s2661_s0 + $0x1d0] sm:$0xff]  ;;  %v76_v15 = vld [vmem:[%s2661_s0 + $0x1d8] sm:$0xff] }
  0x19   :  { %1199 = vmatpush3.bf16.msra.mxu0 %v1196_v19  ;;  %1221 = vmatpush3.bf16.msra.mxu1 %v1196_v19  ;;  %v45_v16 = vld [vmem:[%s2661_s0 + $0xe0] sm:$0xff]  ;;  %v46_v18 = vld [vmem:[%s2661_s0 + $0xe8] sm:$0xff]  ;;  %v47_v20 = vld [vmem:[%s2661_s0 + $0xf0] sm:$0xff] }
  0x1a   :  { %1201 = vmatprep.subr.bf16.mxu0 %v1200_v22  ;;  %1214 = vmatprep.subr.bf16.mxu1 %v1200_v22  ;;  %v77_v17 = vld [vmem:[%s2661_s0 + $0x1e0] sm:$0xff]  ;;  %v78_v19 = vld [vmem:[%s2661_s0 + $0x1e8] sm:$0xff]  ;;  %v79_v21 = vld [vmem:[%s2661_s0 + $0x1f0] sm:$0xff] }
  0x1b   :  { %v80_v23 = vld [vmem:[%s2661_s0 + $0x1f8] sm:$0xff] }
  0x1d   :  { %1203 = vmatpush3.bf16.msra.mxu0 %v1200_v22  ;;  %1222 = vmatpush3.bf16.msra.mxu1 %v1200_v22  ;;  %v48_v22 = vld [vmem:[%s2661_s0 + $0xf8] sm:$0xff] }
  0x1e   :  { %1205 = vmatprep.subr.bf16.mxu0 %v1204_v25  ;;  %1215 = vmatprep.subr.bf16.mxu1 %v1204_v25 }
  0x21   :  { %1207 = vmatpush3.bf16.msra.mxu0 %v1204_v25  ;;  %1223 = vmatpush3.bf16.msra.mxu1 %v1204_v25 }
  0x24   :  { %1081 = vmatmul.mubr.f32.vlgmr.msra.gmra.mrb[0].mxu0 %v18_v26  ;;  %1129 = vmatmul.mubr.f32.vlgmr.msra.gmra.mrb[0].mxu1 %v50_v27 }
  0x25   :  { %1083 = vmatprep.mubr.f32.mxu0 %v19_v28  ;;  %1131 = vmatprep.mubr.f32.mxu1 %v51_v29 }
  0x28   :  { %1084 = vmatmul.mubr.f32.gmra.mrb[2].mxu0 %v20_v30  ;;  %1132 = vmatmul.mubr.f32.gmra.mrb[2].mxu1 %v52_v31 }
  0x29   :  { %1086 = vmatprep.mubr.f32.mxu0 %v21_v32  ;;  %1134 = vmatprep.mubr.f32.mxu1 %v53_v33 }
  0x2c   :  { %1087 = vmatmul.mubr.f32.gmra.mrb[4].mxu0 %v22_v34  ;;  %1135 = vmatmul.mubr.f32.gmra.mrb[4].mxu1 %v54_v35 }
  0x2d   :  { %1089 = vmatprep.mubr.f32.mxu0 %v23_v36  ;;  %1137 = vmatprep.mubr.f32.mxu1 %v55_v37 }
  0x30   :  { %1090 = vmatmul.mubr.f32.gmra.mrb[6].mxu0 %v24_v38  ;;  %1138 = vmatmul.mubr.f32.gmra.mrb[6].mxu1 %v56_v39 }
  0x31   :  { %1092 = vmatprep.mubr.f32.mxu0 %v25_v40  ;;  %1140 = vmatprep.mubr.f32.mxu1 %v57_v41 }
  0x34   :  { %1093 = vmatmul.mubr.f32.gmra.mrb[8].mxu0 %v26_v42  ;;  %1141 = vmatmul.mubr.f32.gmra.mrb[8].mxu1 %v58_v43 }
  0x35   :  { %1095 = vmatprep.mubr.f32.mxu0 %v27_v44  ;;  %1143 = vmatprep.mubr.f32.mxu1 %v59_v45 }
  0x38   :  { %1096 = vmatmul.mubr.f32.gmra.mrb[10].mxu0 %v28_v46  ;;  %1144 = vmatmul.mubr.f32.gmra.mrb[10].mxu1 %v60_v47 }
  0x39   :  { %1098 = vmatprep.mubr.f32.mxu0 %v29_v48  ;;  %1146 = vmatprep.mubr.f32.mxu1 %v61_v49 }
  0x3c   :  { %1099 = vmatmul.mubr.f32.gmra.mrb[12].mxu0 %v30_v50  ;;  %1147 = vmatmul.mubr.f32.gmra.mrb[12].mxu1 %v62_v51 }
  0x3d   :  { %1101 = vmatprep.mubr.f32.mxu0 %v31_v52  ;;  %1149 = vmatprep.mubr.f32.mxu1 %v63_v53 }
  0x40   :  { %1102 = vmatmul.mubr.f32.gmra.mrb[14].mxu0 %v32_v54  ;;  %1150 = vmatmul.mubr.f32.gmra.mrb[14].mxu1 %v64_v55 }
  0x41   :  { %1104 = vmatprep.mubr.f32.mxu0 %v33_v56  ;;  %1152 = vmatprep.mubr.f32.mxu1 %v65_v57 }
  0x44   :  { %1105 = vmatmul.mubr.f32.gmra.mrb[16].mxu0 %v34_v58  ;;  %1153 = vmatmul.mubr.f32.gmra.mrb[16].mxu1 %v66_v59 }
  0x45   :  { %1107 = vmatprep.mubr.f32.mxu0 %v35_v60  ;;  %1155 = vmatprep.mubr.f32.mxu1 %v67_v61 }
  0x48   :  { %1108 = vmatmul.mubr.f32.gmra.mrb[18].mxu0 %v36_v62  ;;  %1156 = vmatmul.mubr.f32.gmra.mrb[18].mxu1 %v68_v63 }
  0x49   :  { %1110 = vmatprep.mubr.f32.mxu0 %v37_v0  ;;  %1158 = vmatprep.mubr.f32.mxu1 %v69_v1 }
  0x4c   :  { %1111 = vmatmul.mubr.f32.gmra.mrb[20].mxu0 %v38_v2  ;;  %1159 = vmatmul.mubr.f32.gmra.mrb[20].mxu1 %v70_v3 }
  0x4d   :  { %1113 = vmatprep.mubr.f32.mxu0 %v39_v4  ;;  %1161 = vmatprep.mubr.f32.mxu1 %v71_v5 }
  0x50   :  { %1114 = vmatmul.mubr.f32.gmra.mrb[22].mxu0 %v40_v6  ;;  %1162 = vmatmul.mubr.f32.gmra.mrb[22].mxu1 %v72_v7 }
  0x51   :  { %1116 = vmatprep.mubr.f32.mxu0 %v41_v8  ;;  %1164 = vmatprep.mubr.f32.mxu1 %v73_v9 }
  0x54   :  { %1117 = vmatmul.mubr.f32.gmra.mrb[24].mxu0 %v42_v10  ;;  %1165 = vmatmul.mubr.f32.gmra.mrb[24].mxu1 %v74_v11 }
  0x55   :  { %1119 = vmatprep.mubr.f32.mxu0 %v43_v12  ;;  %1167 = vmatprep.mubr.f32.mxu1 %v75_v13 }
  0x58   :  { %1120 = vmatmul.mubr.f32.gmra.mrb[26].mxu0 %v44_v14  ;;  %1168 = vmatmul.mubr.f32.gmra.mrb[26].mxu1 %v76_v15 }
  0x59   :  { %1122 = vmatprep.mubr.f32.mxu0 %v45_v16  ;;  %1170 = vmatprep.mubr.f32.mxu1 %v77_v17 }
  0x5c   :  { %1123 = vmatmul.mubr.f32.gmra.mrb[28].mxu0 %v46_v18  ;;  %1171 = vmatmul.mubr.f32.gmra.mrb[28].mxu1 %v78_v19 }
  0x5d   :  { %1125 = vmatprep.mubr.f32.mxu0 %v47_v20  ;;  %1173 = vmatprep.mubr.f32.mxu1 %v79_v21 }
  0x60   :  { %1126 = vmatmul.mubr.f32.gmra.mrb[30].mxu0 %v48_v22  ;;  %1174 = vmatmul.mubr.f32.gmra.mrb[30].mxu1 %v80_v23 }
  0xf7   :  { %v1491_v24 = vpop.f32.mrb[0].mxu0  ;;  %v1493_v25 = vpop.f32.mrb[0].mxu1 }
  0xf8   :  { %v554_v26 = vmul.f32 %v1491_v24, %v1491_v24  ;;  %v1497_v27 = vpop.f32.mrb[1].mxu0  ;;  %v1499_v28 = vpop.f32.mrb[1].mxu1 }
  0xf9   :  { %v482_v29 = vadd.f32 %v1491_v24, %v1497_v27  ;;  %v553_v30 = vmul.f32 %v1497_v27, %v1497_v27 }
  0xfb   :  { %v617_v31 = vadd.f32 %v554_v26, %v553_v30  ;;  %v1505_v32 = vpop.f32.mrb[2].mxu0  ;;  %v1507_v33 = vpop.f32.mrb[2].mxu1 }
  0xfc   :  { %v1509_v34 = vpop.f32.mrb[3].mxu0  ;;  %v1511_v35 = vpop.f32.mrb[3].mxu1  ;;  %v556_v38 = vmul.f32 %v1505_v32, %v1505_v32 }
  0xfd   :  { %v483_v36 = vadd.f32 %v482_v29, %v1509_v34  ;;  %v555_v37 = vmul.f32 %v1509_v34, %v1509_v34 }
  0xff   :  { %v618_v39 = vadd.f32 %v617_v31, %v555_v37  ;;  %v1518_v40 = vpop.f32.mrb[4].mxu0  ;;  %v484_v41 = vadd.f32 %v1505_v32, %v483_v36  ;;  %v1521_v42 = vpop.f32.mrb[4].mxu1 }
 0x100   :  { %v1523_v43 = vpop.f32.mrb[5].mxu0  ;;  %v1525_v44 = vpop.f32.mrb[5].mxu1  ;;  %v558_v48 = vmul.f32 %v1518_v40, %v1518_v40 }
 0x101   :  { %v485_v45 = vadd.f32 %v484_v41, %v1523_v43  ;;  %v557_v46 = vmul.f32 %v1523_v43, %v1523_v43  ;;  %v619_v47 = vadd.f32 %v618_v39, %v556_v38 }
 0x103   :  { %v620_v49 = vadd.f32 %v619_v47, %v557_v46  ;;  %v1532_v50 = vpop.f32.mrb[6].mxu0  ;;  %v486_v51 = vadd.f32 %v1518_v40, %v485_v45  ;;  %v1535_v52 = vpop.f32.mrb[6].mxu1 }
 0x104   :  { %v1537_v53 = vpop.f32.mrb[7].mxu0  ;;  %v1539_v54 = vpop.f32.mrb[7].mxu1  ;;  %v560_v58 = vmul.f32 %v1532_v50, %v1532_v50 }
 0x105   :  { %v487_v55 = vadd.f32 %v486_v51, %v1537_v53  ;;  %v559_v56 = vmul.f32 %v1537_v53, %v1537_v53  ;;  %v621_v57 = vadd.f32 %v620_v49, %v558_v48 }
 0x107   :  { %v622_v59 = vadd.f32 %v621_v57, %v559_v56  ;;  %v1546_v60 = vpop.f32.mrb[8].mxu0  ;;  %v488_v61 = vadd.f32 %v1532_v50, %v487_v55  ;;  %v1549_v62 = vpop.f32.mrb[8].mxu1 }
 0x108   :  { %v1551_v63 = vpop.f32.mrb[9].mxu0  ;;  %v1553_v0 = vpop.f32.mrb[9].mxu1  ;;  %v562_v4 = vmul.f32 %v1546_v60, %v1546_v60 }
 0x109   :  { %v489_v1 = vadd.f32 %v488_v61, %v1551_v63  ;;  %v561_v2 = vmul.f32 %v1551_v63, %v1551_v63  ;;  %v623_v3 = vadd.f32 %v622_v59, %v560_v58 }
 0x10b   :  { %v624_v5 = vadd.f32 %v623_v3, %v561_v2  ;;  %v1560_v6 = vpop.f32.mrb[10].mxu0  ;;  %v490_v7 = vadd.f32 %v1546_v60, %v489_v1  ;;  %v1563_v8 = vpop.f32.mrb[10].mxu1 }
 0x10c   :  { %v1565_v9 = vpop.f32.mrb[11].mxu0  ;;  %v1567_v10 = vpop.f32.mrb[11].mxu1  ;;  %v564_v14 = vmul.f32 %v1560_v6, %v1560_v6 }
 0x10d   :  { %v491_v11 = vadd.f32 %v490_v7, %v1565_v9  ;;  %v563_v12 = vmul.f32 %v1565_v9, %v1565_v9  ;;  %v625_v13 = vadd.f32 %v624_v5, %v562_v4 }
 0x10f   :  { %v626_v15 = vadd.f32 %v625_v13, %v563_v12  ;;  %v1574_v16 = vpop.f32.mrb[12].mxu0  ;;  %v492_v17 = vadd.f32 %v1560_v6, %v491_v11  ;;  %v1577_v18 = vpop.f32.mrb[12].mxu1 }
 0x110   :  { %v1579_v19 = vpop.f32.mrb[13].mxu0  ;;  %v1581_v20 = vpop.f32.mrb[13].mxu1  ;;  %v566_v26 = vmul.f32 %v1574_v16, %v1574_v16 }
 0x111   :  { %v493_v21 = vadd.f32 %v492_v17, %v1579_v19  ;;  %v565_v22 = vmul.f32 %v1579_v19, %v1579_v19  ;;  %v627_v23 = vadd.f32 %v626_v15, %v564_v14 }
 0x113   :  { %v628_v29 = vadd.f32 %v627_v23, %v565_v22  ;;  %v1588_v30 = vpop.f32.mrb[14].mxu0  ;;  %v494_v31 = vadd.f32 %v1574_v16, %v493_v21  ;;  %v1591_v36 = vpop.f32.mrb[14].mxu1 }
 0x114   :  { %v1593_v37 = vpop.f32.mrb[15].mxu0  ;;  %v1595_v38 = vpop.f32.mrb[15].mxu1  ;;  %v568_v46 = vmul.f32 %v1588_v30, %v1588_v30 }
 0x115   :  { %v495_v39 = vadd.f32 %v494_v31, %v1593_v37  ;;  %v567_v41 = vmul.f32 %v1593_v37, %v1593_v37  ;;  %v629_v45 = vadd.f32 %v628_v29, %v566_v26 }
 0x117   :  { %v630_v47 = vadd.f32 %v629_v45, %v567_v41  ;;  %v1602_v48 = vpop.f32.mrb[16].mxu0  ;;  %v496_v49 = vadd.f32 %v1588_v30, %v495_v39  ;;  %v1605_v51 = vpop.f32.mrb[16].mxu1 }
 0x118   :  { %2714 = vst [vmem:[#allocation2_spill] sm:$0xff] %v1602_v48  ;;  %v1607_v55 = vpop.f32.mrb[17].mxu0  ;;  %v1609_v56 = vpop.f32.mrb[17].mxu1  ;;  %v570_v61 = vmul.f32 %v1602_v48, %v1602_v48 }
 0x119   :  { %2715 = vst [vmem:[#allocation3_spill] sm:$0xff] %v1607_v55  ;;  %v497_v57 = vadd.f32 %v496_v49, %v1607_v55  ;;  %v569_v58 = vmul.f32 %v1607_v55, %v1607_v55  ;;  %v631_v59 = vadd.f32 %v630_v47, %v568_v46 }
 0x11b   :  { %v632_v1 = vadd.f32 %v631_v59, %v569_v58  ;;  %v1616_v2 = vpop.f32.mrb[18].mxu0  ;;  %v498_v3 = vadd.f32 %v1602_v48, %v497_v57  ;;  %v1619_v4 = vpop.f32.mrb[18].mxu1  ;;  %v586_v48 = vmul.f32 %v1493_v25, %v1493_v25 }
 0x11c   :  { %2716 = vst [vmem:[#allocation4_spill] sm:$0xff] %v1616_v2  ;;  %2717 = vst [vmem:[#allocation5_spill] sm:$0xff] %v1619_v4  ;;  %v1621_v5 = vpop.f32.mrb[19].mxu0  ;;  %v1623_v7 = vpop.f32.mrb[19].mxu1  ;;  %v572_v14 = vmul.f32 %v1616_v2, %v1616_v2 }
 0x11d   :  { %2718 = vst [vmem:[#allocation6_spill] sm:$0xff] %v1621_v5  ;;  %2719 = vst [vmem:[#allocation7_spill] sm:$0xff] %v1623_v7  ;;  %v499_v11 = vadd.f32 %v498_v3, %v1621_v5  ;;  %v571_v12 = vmul.f32 %v1621_v5, %v1621_v5  ;;  %v633_v13 = vadd.f32 %v632_v1, %v570_v61 }
 0x11f   :  { %v634_v15 = vadd.f32 %v633_v13, %v571_v12  ;;  %v1630_v17 = vpop.f32.mrb[20].mxu0  ;;  %v500_v21 = vadd.f32 %v1616_v2, %v499_v11  ;;  %v1633_v22 = vpop.f32.mrb[20].mxu1 }
 0x120   :  { %2720 = vst [vmem:[#allocation8_spill] sm:$0xff] %v1630_v17  ;;  %2721 = vst [vmem:[#allocation9_spill] sm:$0xff] %v1633_v22  ;;  %v1635_v23 = vpop.f32.mrb[21].mxu0  ;;  %v1637_v26 = vpop.f32.mrb[21].mxu1  ;;  %v574_v41 = vmul.f32 %v1630_v17, %v1630_v17 }
 0x121   :  { %2722 = vst [vmem:[#allocation10_spill] sm:$0xff] %v1635_v23  ;;  %2723 = vst [vmem:[#allocation11_spill] sm:$0xff] %v1637_v26  ;;  %v501_v29 = vadd.f32 %v500_v21, %v1635_v23  ;;  %v573_v31 = vmul.f32 %v1635_v23, %v1635_v23  ;;  %v635_v39 = vadd.f32 %v634_v15, %v572_v14 }
 0x123   :  { %v636_v45 = vadd.f32 %v635_v39, %v573_v31  ;;  %v1644_v46 = vpop.f32.mrb[22].mxu0  ;;  %v502_v47 = vadd.f32 %v1630_v17, %v501_v29  ;;  %v1647_v49 = vpop.f32.mrb[22].mxu1 }
 0x124   :  { %2724 = vst [vmem:[#allocation12_spill] sm:$0xff] %v1644_v46  ;;  %v1649_v57 = vpop.f32.mrb[23].mxu0  ;;  %v1651_v58 = vpop.f32.mrb[23].mxu1  ;;  %v576_v3 = vmul.f32 %v1644_v46, %v1644_v46 }
 0x125   :  { %2725 = vst [vmem:[#allocation13_spill] sm:$0xff] %v1649_v57  ;;  %2726 = vst [vmem:[#allocation14_spill] sm:$0xff] %v1651_v58  ;;  %v503_v59 = vadd.f32 %v502_v47, %v1649_v57  ;;  %v575_v61 = vmul.f32 %v1649_v57, %v1649_v57  ;;  %v637_v1 = vadd.f32 %v636_v45, %v574_v41 }
 0x127   :  { %v638_v11 = vadd.f32 %v637_v1, %v575_v61  ;;  %v1658_v12 = vpop.f32.mrb[24].mxu0  ;;  %v504_v13 = vadd.f32 %v1644_v46, %v503_v59  ;;  %v1661_v14 = vpop.f32.mrb[24].mxu1 }
 0x128   :  { %2727 = vst [vmem:[#allocation15_spill] sm:$0xff] %v1658_v12  ;;  %2728 = vst [vmem:[#allocation16_spill] sm:$0xff] %v1661_v14  ;;  %v1663_v15 = vpop.f32.mrb[25].mxu0  ;;  %v1665_v21 = vpop.f32.mrb[25].mxu1  ;;  %v578_v41 = vmul.f32 %v1658_v12, %v1658_v12 }
 0x129   :  { %2729 = vst [vmem:[#allocation17_spill] sm:$0xff] %v1663_v15  ;;  %2730 = vst [vmem:[#allocation18_spill] sm:$0xff] %v1665_v21  ;;  %v505_v29 = vadd.f32 %v504_v13, %v1663_v15  ;;  %v577_v31 = vmul.f32 %v1663_v15, %v1663_v15  ;;  %v639_v39 = vadd.f32 %v638_v11, %v576_v3 }
 0x12b   :  { %v640_v45 = vadd.f32 %v639_v39, %v577_v31  ;;  %v1672_v47 = vpop.f32.mrb[26].mxu0  ;;  %v506_v59 = vadd.f32 %v1658_v12, %v505_v29  ;;  %v1675_v61 = vpop.f32.mrb[26].mxu1 }
 0x12c   :  { %2731 = vst [vmem:[#allocation19_spill] sm:$0xff] %v1672_v47  ;;  %2732 = vst [vmem:[#allocation20_spill] sm:$0xff] %v1675_v61  ;;  %v1677_v1 = vpop.f32.mrb[27].mxu0  ;;  %v1679_v46 = vpop.f32.mrb[27].mxu1  ;;  %v580_v11 = vmul.f32 %v1672_v47, %v1672_v47 }
 0x12d   :  { %2733 = vst [vmem:[#allocation21_spill] sm:$0xff] %v1677_v1  ;;  %2734 = vst [vmem:[#allocation22_spill] sm:$0xff] %v1679_v46  ;;  %v507_v13 = vadd.f32 %v506_v59, %v1677_v1  ;;  %v579_v15 = vmul.f32 %v1677_v1, %v1677_v1  ;;  %v641_v3 = vadd.f32 %v640_v45, %v578_v41 }
 0x12f   :  { %v642_v31 = vadd.f32 %v641_v3, %v579_v15  ;;  %v1686_v39 = vpop.f32.mrb[28].mxu0  ;;  %v508_v29 = vadd.f32 %v1672_v47, %v507_v13  ;;  %v1689_v12 = vpop.f32.mrb[28].mxu1 }
 0x130   :  { %2735 = vst [vmem:[#allocation23_spill] sm:$0xff] %v1686_v39  ;;  %2736 = vst [vmem:[#allocation24_spill] sm:$0xff] %v1689_v12  ;;  %v1691_v57 = vpop.f32.mrb[29].mxu0  ;;  %v1693_v17 = vpop.f32.mrb[29].mxu1  ;;  %v582_v45 = vmul.f32 %v1686_v39, %v1686_v39 }
 0x131   :  { %2737 = vst [vmem:[#allocation25_spill] sm:$0xff] %v1691_v57  ;;  %2738 = vst [vmem:[#allocation26_spill] sm:$0xff] %v1693_v17  ;;  %v509_v59 = vadd.f32 %v508_v29, %v1691_v57  ;;  %v581_v1 = vmul.f32 %v1691_v57, %v1691_v57  ;;  %v643_v41 = vadd.f32 %v642_v31, %v580_v11 }
 0x133   :  { %v644_v15 = vadd.f32 %v643_v41, %v581_v1  ;;  %v1700_v3 = vpop.f32.mrb[30].mxu0  ;;  %v510_v13 = vadd.f32 %v1686_v39, %v509_v59  ;;  %v1703_v47 = vpop.f32.mrb[30].mxu1  ;;  %v585_v59 = vmul.f32 %v1499_v28, %v1499_v28 }
 0x134   :  { %v1705_v23 = vpop.f32.mrb[31].mxu0  ;;  %v1707_v2 = vpop.f32.mrb[31].mxu1  ;;  %v584_v31 = vmul.f32 %v1700_v3, %v1700_v3 }
 0x135   :  { %2739 = vst [vmem:[#allocation27_spill] sm:$0xff] %v1705_v23  ;;  %2740 = vst [vmem:[#allocation28_spill] sm:$0xff] %v1707_v2  ;;  %v511_v29 = vadd.f32 %v510_v13, %v1705_v23  ;;  %v583_v57 = vmul.f32 %v1705_v23, %v1705_v23  ;;  %v645_v11 = vadd.f32 %v644_v15, %v582_v45 }
 0x136   :  { %v587_v45 = vmul.f32 %v1511_v35, %v1511_v35 }
 0x137   :  { %v512_v1 = vadd.f32 %v1700_v3, %v511_v29  ;;  %v646_v41 = vadd.f32 %v645_v11, %v583_v57  ;;  %v588_v57 = vmul.f32 %v1507_v33, %v1507_v33 }
 0x139   :  { %v647_v39 = vadd.f32 %v646_v41, %v584_v31  ;;  %v513_v5 = vadd.f32 %v512_v1, %v1499_v28  ;;  %v589_v31 = vmul.f32 %v1525_v44, %v1525_v44 }
 0x13b   :  { %v648_v13 = vadd.f32 %v647_v39, %v585_v59  ;;  %v514_v55 = vadd.f32 %v1493_v25, %v513_v5  ;;  %v590_v5 = vmul.f32 %v1521_v42, %v1521_v42 }
 0x13d   :  { %v515_v15 = vadd.f32 %v514_v55, %v1511_v35  ;;  %v649_v23 = vadd.f32 %v648_v13, %v586_v48  ;;  %v591_v48 = vmul.f32 %v1539_v54, %v1539_v54  ;;  %v592_v13 = vmul.f32 %v1535_v52, %v1535_v52 }
 0x13f   :  { %v650_v29 = vadd.f32 %v649_v23, %v587_v45  ;;  %v516_v11 = vadd.f32 %v1507_v33, %v515_v15 }
 0x141   :  { %v517_v1 = vadd.f32 %v516_v11, %v1525_v44  ;;  %v651_v39 = vadd.f32 %v650_v29, %v588_v57  ;;  %v593_v57 = vmul.f32 %v1553_v0, %v1553_v0 }
 0x143   :  { %v652_v41 = vadd.f32 %v651_v39, %v589_v31  ;;  %v518_v59 = vadd.f32 %v1521_v42, %v517_v1  ;;  %v594_v31 = vmul.f32 %v1549_v62, %v1549_v62 }
 0x145   :  { %v519_v55 = vadd.f32 %v518_v59, %v1539_v54  ;;  %v653_v23 = vadd.f32 %v652_v41, %v590_v5  ;;  %v595_v5 = vmul.f32 %v1567_v10, %v1567_v10 }
 0x147   :  { %v654_v45 = vadd.f32 %v653_v23, %v591_v48  ;;  %v520_v15 = vadd.f32 %v1535_v52, %v519_v55  ;;  %v596_v48 = vmul.f32 %v1563_v8, %v1563_v8 }
 0x149   :  { %v521_v29 = vadd.f32 %v520_v15, %v1553_v0  ;;  %v655_v11 = vadd.f32 %v654_v45, %v592_v13  ;;  %v597_v13 = vmul.f32 %v1581_v20, %v1581_v20 }
 0x14b   :  { %v656_v1 = vadd.f32 %v655_v11, %v593_v57  ;;  %v522_v39 = vadd.f32 %v1549_v62, %v521_v29  ;;  %v598_v57 = vmul.f32 %v1577_v18, %v1577_v18 }
 0x14d   :  { %v523_v41 = vadd.f32 %v522_v39, %v1567_v10  ;;  %v657_v59 = vadd.f32 %v656_v1, %v594_v31  ;;  %v599_v31 = vmul.f32 %v1595_v38, %v1595_v38 }
 0x14f   :  { %v658_v55 = vadd.f32 %v657_v59, %v595_v5  ;;  %v524_v23 = vadd.f32 %v1563_v8, %v523_v41  ;;  %v600_v5 = vmul.f32 %v1591_v36, %v1591_v36 }
 0x151   :  { %v525_v45 = vadd.f32 %v524_v23, %v1581_v20  ;;  %v659_v15 = vadd.f32 %v658_v55, %v596_v48  ;;  %v601_v48 = vmul.f32 %v1609_v56, %v1609_v56 }
 0x153   :  { %v660_v29 = vadd.f32 %v659_v15, %v597_v13  ;;  %v526_v11 = vadd.f32 %v1577_v18, %v525_v45  ;;  %v602_v13 = vmul.f32 %v1605_v51, %v1605_v51 }
 0x155   :  { %v527_v1 = vadd.f32 %v526_v11, %v1595_v38  ;;  %v661_v39 = vadd.f32 %v660_v29, %v598_v57  ;;  %v603_v57 = vmul.f32 %v1623_v7, %v1623_v7 }
 0x157   :  { %v662_v41 = vadd.f32 %v661_v39, %v599_v31  ;;  %v528_v59 = vadd.f32 %v1591_v36, %v527_v1  ;;  %v604_v31 = vmul.f32 %v1619_v4, %v1619_v4 }
 0x159   :  { %v529_v55 = vadd.f32 %v528_v59, %v1609_v56  ;;  %v663_v23 = vadd.f32 %v662_v41, %v600_v5  ;;  %v605_v5 = vmul.f32 %v1637_v26, %v1637_v26 }
 0x15b   :  { %v664_v45 = vadd.f32 %v663_v23, %v601_v48  ;;  %v530_v15 = vadd.f32 %v1605_v51, %v529_v55  ;;  %v606_v48 = vmul.f32 %v1633_v22, %v1633_v22 }
 0x15d   :  { %v531_v29 = vadd.f32 %v530_v15, %v1623_v7  ;;  %v665_v11 = vadd.f32 %v664_v45, %v602_v13  ;;  %v607_v13 = vmul.f32 %v1651_v58, %v1651_v58 }
 0x15f   :  { %v666_v1 = vadd.f32 %v665_v11, %v603_v57  ;;  %v532_v39 = vadd.f32 %v1619_v4, %v531_v29  ;;  %v608_v57 = vmul.f32 %v1647_v49, %v1647_v49 }
 0x161   :  { %v533_v41 = vadd.f32 %v532_v39, %v1637_v26  ;;  %v667_v59 = vadd.f32 %v666_v1, %v604_v31  ;;  %v609_v31 = vmul.f32 %v1665_v21, %v1665_v21 }
 0x163   :  { %v668_v55 = vadd.f32 %v667_v59, %v605_v5  ;;  %v534_v23 = vadd.f32 %v1633_v22, %v533_v41  ;;  %v610_v5 = vmul.f32 %v1661_v14, %v1661_v14 }
 0x165   :  { %v535_v45 = vadd.f32 %v534_v23, %v1651_v58  ;;  %v669_v15 = vadd.f32 %v668_v55, %v606_v48  ;;  %v611_v48 = vmul.f32 %v1679_v46, %v1679_v46 }
 0x167   :  { %v670_v29 = vadd.f32 %v669_v15, %v607_v13  ;;  %v536_v11 = vadd.f32 %v1647_v49, %v535_v45  ;;  %v612_v13 = vmul.f32 %v1675_v61, %v1675_v61 }
 0x169   :  { %v537_v1 = vadd.f32 %v536_v11, %v1665_v21  ;;  %v671_v39 = vadd.f32 %v670_v29, %v608_v57  ;;  %v613_v57 = vmul.f32 %v1693_v17, %v1693_v17 }
 0x16b   :  { %v672_v41 = vadd.f32 %v671_v39, %v609_v31  ;;  %v538_v59 = vadd.f32 %v1661_v14, %v537_v1  ;;  %v614_v31 = vmul.f32 %v1689_v12, %v1689_v12  ;;  %v759_v14 = vlaneseq }
 0x16d   :  { %v539_v55 = vadd.f32 %v538_v59, %v1679_v46  ;;  %v673_v23 = vadd.f32 %v672_v41, %v610_v5  ;;  %v615_v5 = vmul.f32 %v1707_v2, %v1707_v2 }
 0x16f   :  { %v674_v45 = vadd.f32 %v673_v23, %v611_v48  ;;  %v540_v15 = vadd.f32 %v1675_v61, %v539_v55  ;;  %v616_v48 = vmul.f32 %v1703_v47, %v1703_v47 }
 0x171   :  { %v541_v29 = vadd.f32 %v540_v15, %v1693_v17  ;;  %v675_v11 = vadd.f32 %v674_v45, %v612_v13 }
 0x173   :  { %v676_v1 = vadd.f32 %v675_v11, %v613_v57  ;;  %v542_v39 = vadd.f32 %v1689_v12, %v541_v29 }
 0x175   :  { %v543_v41 = vadd.f32 %v542_v39, %v1707_v2  ;;  %v677_v59 = vadd.f32 %v676_v1, %v614_v31  ;;  %v1813_v2 = vshrl.u32 %v759_v14, 7  ;;  %v2753_v14 = vld [vmem:[#allocation25_spill] sm:$0xff] }
 0x177   :  { %v544_v55 = vadd.f32 %v1703_v47, %v543_v41  ;;  %v678_v23 = vadd.f32 %v677_v59, %v615_v5  ;;  %v756_v59 = vld [vmem:[%s2662_s2] sm:$0x1]  ;;  %v761_v4 = vsub.s32 0, %v1813_v2 }
 0x179   :  { %v545_v15 = vrot.slane %v544_v55, 4  ;;  %v679_v13 = vadd.f32 %v678_v23, %v616_v48  ;;  %v2750_v23 = vld [vmem:[#allocation15_spill] sm:$0xff] }
 0x17a   :  { %v2752_v48 = vld [vmem:[#allocation19_spill] sm:$0xff] }
 0x17b   :  { %v546_v45 = vadd.f32 %v545_v15, %v544_v55  ;;  %v680_v17 = vrot.slane %v679_v13, 4  ;;  %v2749_v15 = vld [vmem:[#allocation17_spill] sm:$0xff] }
 0x17d   :  { %v547_v61 = vrot.slane %v546_v45, 2  ;;  %v681_v57 = vadd.f32 %v680_v17, %v679_v13  ;;  %v2742_v13 = vld [vmem:[#allocation2_spill] sm:$0xff] }
 0x17e   :  { %v2760_v17 = vld [vmem:[#allocation26_spill] sm:$0xff] }
 0x17f   :  { %v548_v11 = vadd.f32 %v547_v61, %v546_v45  ;;  %v682_v29 = vrot.slane %v681_v57, 2  ;;  %v2743_v45 = vld [vmem:[#allocation6_spill] sm:$0xff] }
 0x181   :  { %v549_v12 = vrot.slane %v548_v11, 1  ;;  %v683_v46 = vadd.f32 %v682_v29, %v681_v57  ;;  %v2745_v29 = vld [vmem:[#allocation10_spill] sm:$0xff]  ;;  %v2762_v57 = vld [vmem:[#allocation28_spill] sm:$0xff] }
 0x183   :  { %v550_v21 = vadd.f32 %v549_v12, %v548_v11  ;;  %v684_v39 = vrot.slane %v683_v46, 1  ;;  %v2755_v12 = vld [vmem:[#allocation27_spill] sm:$0xff] }
 0x185   :  { %v1811_v31 = vmul.f32 0.001953125, %v550_v21  ;;  %v685_v1 = vadd.f32 %v684_v39, %v683_v46  ;;  %v2754_v46 = vld [vmem:[#allocation23_spill] sm:$0xff] }
 0x187   :  { %v686_v41 = vmul.f32 0.001953125, %v685_v1  ;;  %v687_v5 = vmul.f32 %v1811_v31, %v1811_v31  ;;  %v2757_v1 = vld [vmem:[#allocation16_spill] sm:$0xff]  ;;  %v2763_v22 = vsub.f32 %v1497_v27, %v1811_v31  ;;  %v2765_v7 = vsub.f32 %v1509_v34, %v1811_v31 }
 0x189   :  { %v688_v21 = vsub.f32 %v686_v41, %v687_v5  ;;  %v2741_v41 = vld [vmem:[#allocation3_spill] sm:$0xff] }
 0x18b   :  { %v689_v11 = vmax.f32 %v688_v21, 0.0  ;;  %v2744_v21 = vld [vmem:[#allocation4_spill] sm:$0xff] }
 0x18d   :  { %v690_v55 = vadd.f32 1e-05, %v689_v11  ;;  %v2751_v11 = vld [vmem:[#allocation21_spill] sm:$0xff] }
 0x18f   :  { %1224 = vrsqrt.f32 %v690_v55  ;;  %v2764_v55 = vsub.f32 %v1491_v24, %v1811_v31 }
 0x199   :  { %v1225_v5 = vpop.eup %1224 }
 0x19a   :  { %v757_v26 = vmul.f32 %v1225_v5, %v756_v59  ;;  %v2770_v59 = vsub.f32 %v1532_v50, %v1811_v31  ;;  %v2771_v5 = vsub.f32 %v1551_v63, %v1811_v31 }
 0x19c   :  { %v1949_v61 = vrot.slane %v757_v26, %v761_v4  ;;  %v2766_v4 = vsub.f32 %v1505_v32, %v1811_v31  ;;  %v2768_v26 = vsub.f32 %v1518_v40, %v1811_v31 }
 0x19e   :  { %v1955_v58 = vmul.f32 %v1949_v61, %v2763_v22  ;;  %v1961_v39 = vmul.f32 %v1949_v61, %v2764_v55  ;;  %v1967_v2 = vmul.f32 %v1949_v61, %v2765_v7  ;;  %v1973_v27 = vmul.f32 %v1949_v61, %v2766_v4 }
 0x19f   :  { %v2767_v22 = vsub.f32 %v1523_v43, %v1811_v31  ;;  %v1985_v34 = vmul.f32 %v1949_v61, %v2768_v26  ;;  %v2769_v7 = vsub.f32 %v1537_v53, %v1811_v31  ;;  %v1997_v43 = vmul.f32 %v1949_v61, %v2770_v59 }
 0x1a0   :  { %v2003_v40 = vmul.f32 %v1949_v61, %v2771_v5  ;;  %v2772_v55 = vsub.f32 %v1546_v60, %v1811_v31  ;;  %v2773_v4 = vsub.f32 %v1565_v9, %v1811_v31  ;;  %v2775_v26 = vsub.f32 %v1579_v19, %v1811_v31 }
 0x1a1   :  { %v1979_v24 = vmul.f32 %v1949_v61, %v2767_v22  ;;  %v1991_v32 = vmul.f32 %v1949_v61, %v2769_v7  ;;  %v2774_v22 = vsub.f32 %v1560_v6, %v1811_v31  ;;  %v2776_v7 = vsub.f32 %v1574_v16, %v1811_v31 }
 0x1a2   :  { %v2009_v53 = vmul.f32 %v1949_v61, %v2772_v55  ;;  %v2015_v50 = vmul.f32 %v1949_v61, %v2773_v4  ;;  %v2027_v60 = vmul.f32 %v1949_v61, %v2775_v26  ;;  %v2777_v59 = vsub.f32 %v1593_v37, %v1811_v31 }
 0x1a3   :  { %v2021_v63 = vmul.f32 %v1949_v61, %v2774_v22  ;;  %v2033_v9 = vmul.f32 %v1949_v61, %v2776_v7  ;;  %v2778_v5 = vsub.f32 %v1588_v30, %v1811_v31  ;;  %v2779_v55 = vsub.f32 %v2741_v41, %v1811_v31 }
 0x1a4   :  { %v2039_v6 = vmul.f32 %v1949_v61, %v2777_v59  ;;  %v2780_v4 = vsub.f32 %v2742_v13, %v1811_v31  ;;  %v2781_v22 = vsub.f32 %v2743_v45, %v1811_v31  ;;  %v2782_v26 = vsub.f32 %v2744_v21, %v1811_v31  ;;  %v2784_v59 = vld [vmem:[#allocation8_spill] sm:$0xff] }
 0x1a5   :  { %v2045_v19 = vmul.f32 %v1949_v61, %v2778_v5  ;;  %v2051_v16 = vmul.f32 %v1949_v61, %v2779_v55  ;;  %v2783_v7 = vsub.f32 %v2745_v29, %v1811_v31  ;;  %v2785_v5 = vsub.f32 %v2784_v59, %v1811_v31  ;;  %v2786_v55 = vld [vmem:[#allocation13_spill] sm:$0xff] }
 0x1a6   :  { %v2057_v37 = vmul.f32 %v1949_v61, %v2780_v4  ;;  %v2063_v30 = vmul.f32 %v1949_v61, %v2781_v22  ;;  %v2069_v41 = vmul.f32 %v1949_v61, %v2782_v26  ;;  %v2787_v4 = vsub.f32 %v2786_v55, %v1811_v31  ;;  %v2788_v22 = vld [vmem:[#allocation12_spill] sm:$0xff] }
 0x1a7   :  { %v2075_v13 = vmul.f32 %v1949_v61, %v2783_v7  ;;  %v2081_v45 = vmul.f32 %v1949_v61, %v2785_v5  ;;  %v2789_v26 = vsub.f32 %v2788_v22, %v1811_v31  ;;  %v2790_v7 = vsub.f32 %v2749_v15, %v1811_v31 }
 0x1a8   :  { %v2087_v21 = vmul.f32 %v1949_v61, %v2787_v4  ;;  %v2791_v5 = vsub.f32 %v2750_v23, %v1811_v31  ;;  %v2792_v4 = vsub.f32 %v2751_v11, %v1811_v31 }
 0x1a9   :  { %v2093_v29 = vmul.f32 %v1949_v61, %v2789_v26  ;;  %v2099_v59 = vmul.f32 %v1949_v61, %v2790_v7  ;;  %v2793_v26 = vsub.f32 %v2752_v48, %v1811_v31  ;;  %v2794_v7 = vsub.f32 %v2753_v14, %v1811_v31 }
 0x1aa   :  { %v2105_v55 = vmul.f32 %v1949_v61, %v2791_v5  ;;  %v2111_v22 = vmul.f32 %v1949_v61, %v2792_v4  ;;  %v2795_v5 = vsub.f32 %v2754_v46, %v1811_v31  ;;  %v2796_v4 = vsub.f32 %v2755_v12, %v1811_v31 }
 0x1ab   :  { %v2117_v15 = vmul.f32 %v1949_v61, %v2793_v26  ;;  %v2123_v23 = vmul.f32 %v1949_v61, %v2794_v7  ;;  %v2797_v26 = vsub.f32 %v1700_v3, %v1811_v31  ;;  %v2798_v7 = vsub.f32 %v1499_v28, %v1811_v31 }
 0x1ac   :  { %v2129_v11 = vmul.f32 %v1949_v61, %v2795_v5  ;;  %v2135_v48 = vmul.f32 %v1949_v61, %v2796_v4  ;;  %v2799_v5 = vsub.f32 %v1493_v25, %v1811_v31  ;;  %v2800_v4 = vsub.f32 %v1511_v35, %v1811_v31 }
 0x1ad   :  { %v2141_v14 = vmul.f32 %v1949_v61, %v2797_v26  ;;  %v2147_v46 = vmul.f32 %v1949_v61, %v2798_v7  ;;  %v2801_v26 = vsub.f32 %v1507_v33, %v1811_v31  ;;  %v2802_v7 = vsub.f32 %v1525_v44, %v1811_v31 }
 0x1ae   :  { %v2153_v12 = vmul.f32 %v1949_v61, %v2799_v5  ;;  %v2159_v3 = vmul.f32 %v1949_v61, %v2800_v4  ;;  %v2803_v5 = vsub.f32 %v1521_v42, %v1811_v31  ;;  %v2804_v4 = vsub.f32 %v1539_v54, %v1811_v31 }
 0x1af   :  { %v2165_v28 = vmul.f32 %v1949_v61, %v2801_v26  ;;  %v2171_v25 = vmul.f32 %v1949_v61, %v2802_v7  ;;  %v2805_v26 = vsub.f32 %v1535_v52, %v1811_v31  ;;  %v2806_v7 = vsub.f32 %v1553_v0, %v1811_v31 }
 0x1b0   :  { %v2177_v35 = vmul.f32 %v1949_v61, %v2803_v5  ;;  %v2183_v33 = vmul.f32 %v1949_v61, %v2804_v4  ;;  %v2807_v5 = vsub.f32 %v1549_v62, %v1811_v31  ;;  %v2808_v4 = vsub.f32 %v1567_v10, %v1811_v31 }
 0x1b1   :  { %v2189_v44 = vmul.f32 %v1949_v61, %v2805_v26  ;;  %v2195_v42 = vmul.f32 %v1949_v61, %v2806_v7  ;;  %v2809_v26 = vsub.f32 %v1563_v8, %v1811_v31  ;;  %v2810_v7 = vsub.f32 %v1581_v20, %v1811_v31 }
 0x1b2   :  { %v2201_v54 = vmul.f32 %v1949_v61, %v2807_v5  ;;  %v2207_v52 = vmul.f32 %v1949_v61, %v2808_v4  ;;  %v2811_v5 = vsub.f32 %v1577_v18, %v1811_v31  ;;  %v2812_v4 = vsub.f32 %v1595_v38, %v1811_v31 }
 0x1b3   :  { %v2213_v0 = vmul.f32 %v1949_v61, %v2809_v26  ;;  %v2219_v62 = vmul.f32 %v1949_v61, %v2810_v7  ;;  %v2814_v26 = vsub.f32 %v1591_v36, %v1811_v31  ;;  %v2816_v7 = vsub.f32 %v1609_v56, %v1811_v31 }
 0x1b4   :  { %v2225_v10 = vmul.f32 %v1949_v61, %v2811_v5  ;;  %v2231_v8 = vmul.f32 %v1949_v61, %v2812_v4  ;;  %v2818_v5 = vsub.f32 %v1605_v51, %v1811_v31  ;;  %v2820_v4 = vld [vmem:[#allocation7_spill] sm:$0xff] }
 0x1b5   :  { %v2237_v20 = vmul.f32 %v1949_v61, %v2814_v26  ;;  %v2243_v18 = vmul.f32 %v1949_v61, %v2816_v7  ;;  %v2823_v26 = vld [vmem:[#allocation5_spill] sm:$0xff]  ;;  %v2825_v7 = vld [vmem:[#allocation11_spill] sm:$0xff] }
 0x1b6   :  { %2813 = vst [vmem:[#allocation3_spill] sm:$0xff] %v2231_v8  ;;  %v2249_v38 = vmul.f32 %v1949_v61, %v2818_v5  ;;  %v2821_v8 = vsub.f32 %v2820_v4, %v1811_v31  ;;  %v2828_v5 = vld [vmem:[#allocation9_spill] sm:$0xff] }
 0x1b7   :  { %2815 = vst [vmem:[#allocation2_spill] sm:$0xff] %v2237_v20  ;;  %2817 = vst [vmem:[#allocation6_spill] sm:$0xff] %v2243_v18  ;;  %v2824_v20 = vsub.f32 %v2823_v26, %v1811_v31  ;;  %v2826_v18 = vsub.f32 %v2825_v7, %v1811_v31 }
 0x1b8   :  { %2819 = vst [vmem:[#allocation4_spill] sm:$0xff] %v2249_v38  ;;  %v2255_v36 = vmul.f32 %v1949_v61, %v2821_v8  ;;  %v2829_v38 = vsub.f32 %v2828_v5, %v1811_v31  ;;  %v2831_v8 = vld [vmem:[#allocation14_spill] sm:$0xff] }
 0x1b9   :  { %v2261_v56 = vmul.f32 %v1949_v61, %v2824_v20  ;;  %v2267_v51 = vmul.f32 %v1949_v61, %v2826_v18  ;;  %v2834_v20 = vsub.f32 %v1647_v49, %v1811_v31  ;;  %v2290_v18 = vld [vmem:[%s2663_s3] ss:$0 sm:$0xff] }
 0x1ba   :  { %2822 = vst [vmem:[#allocation10_spill] sm:$0xff] %v2255_v36  ;;  %v2273_v4 = vmul.f32 %v1949_v61, %v2829_v38  ;;  %v2832_v36 = vsub.f32 %v2831_v8, %v1811_v31  ;;  %v2836_v5 = vld [vmem:[#allocation18_spill] sm:$0xff] }
 0x1bb   :  { %2827 = vst [vmem:[#allocation17_spill] sm:$0xff] %v2267_v51  ;;  %v2285_v7 = vmul.f32 %v1949_v61, %v2834_v20  ;;  %v2837_v38 = vsub.f32 %v2836_v5, %v1811_v31  ;;  %v2840_v49 = vld [vmem:[#allocation22_spill] sm:$0xff] }
 0x1bc   :  { %2830 = vst [vmem:[#allocation15_spill] sm:$0xff] %v2273_v4  ;;  %v2279_v26 = vmul.f32 %v1949_v61, %v2832_v36  ;;  %v2838_v36 = vsub.f32 %v2757_v1, %v1811_v31  ;;  %v2841_v20 = vsub.f32 %v2840_v49, %v1811_v31 }
 0x1bd   :  { %2835 = vst [vmem:[#allocation19_spill] sm:$0xff] %v2285_v7  ;;  %v2296_v4 = vmul.f32 %v1949_v61, %v2837_v38  ;;  %v2844_v38 = vsub.f32 %v2760_v17, %v1811_v31 }
 0x1be   :  { %2833 = vst [vmem:[#allocation21_spill] sm:$0xff] %v2279_v26  ;;  %v2302_v8 = vmul.f32 %v1949_v61, %v2838_v36  ;;  %v2308_v7 = vmul.f32 %v1949_v61, %v2841_v20  ;;  %v2842_v26 = vld [vmem:[#allocation20_spill] sm:$0xff]  ;;  %v2847_v20 = vsub.f32 %v2762_v57, %v1811_v31  ;;  %v838_v57 = vadd.f32 %v2290_v18, %v1973_v27 }
 0x1bf   :  { %v2843_v51 = vsub.f32 %v2842_v26, %v1811_v31  ;;  %v2320_v1 = vmul.f32 %v1949_v61, %v2844_v38  ;;  %v2845_v36 = vld [vmem:[#allocation24_spill] sm:$0xff]  ;;  %v835_v38 = vadd.f32 %v2290_v18, %v1955_v58  ;;  %v842_v58 = vadd.f32 %v2290_v18, %v1997_v43 }
 0x1c0   :  { %2839 = vst [vmem:[#allocation25_spill] sm:$0xff] %v2302_v8  ;;  %v2846_v8 = vsub.f32 %v2845_v36, %v1811_v31  ;;  %v2332_v26 = vmul.f32 %v1949_v61, %v2847_v20  ;;  %v836_v36 = vadd.f32 %v2290_v18, %v1961_v39  ;;  %v839_v20 = vadd.f32 %v2290_v18, %v1979_v24 }
 0x1c1   :  { %v2314_v5 = vmul.f32 %v1949_v61, %v2843_v51  ;;  %v2848_v51 = vsub.f32 %v1703_v47, %v1811_v31  ;;  %v840_v47 = vadd.f32 %v2290_v18, %v1985_v34  ;;  %v841_v31 = vadd.f32 %v2290_v18, %v1991_v32  ;;  %899 = vst [vmem:[%s2664_s4] sm:$0xff] %v835_v38 }
 0x1c2   :  { %v2326_v49 = vmul.f32 %v1949_v61, %v2846_v8  ;;  %v837_v8 = vadd.f32 %v2290_v18, %v1967_v2  ;;  %v844_v39 = vadd.f32 %v2290_v18, %v2009_v53  ;;  %v845_v2 = vadd.f32 %v2290_v18, %v2015_v50  ;;  %900 = vst [vmem:[%s2664_s4 + $0x8] sm:$0xff] %v836_v36 }
 0x1c3   :  { %v2338_v17 = vmul.f32 %v1949_v61, %v2848_v51  ;;  %v843_v61 = vadd.f32 %v2290_v18, %v2003_v40  ;;  %v846_v27 = vadd.f32 %v2290_v18, %v2021_v63  ;;  %902 = vst [vmem:[%s2664_s4 + $0x18] sm:$0xff] %v838_v57  ;;  %v847_v24 = vadd.f32 %v2290_v18, %v2027_v60  ;;  %v2853_v51 = vld [vmem:[#allocation10_spill] sm:$0xff] }
 0x1c4   :  { %901 = vst [vmem:[%s2664_s4 + $0x10] sm:$0xff] %v837_v8  ;;  %v848_v34 = vadd.f32 %v2290_v18, %v2033_v9  ;;  %v849_v32 = vadd.f32 %v2290_v18, %v2039_v6  ;;  %v850_v43 = vadd.f32 %v2290_v18, %v2045_v19  ;;  %903 = vst [vmem:[%s2664_s4 + $0x20] sm:$0xff] %v839_v20  ;;  %v2854_v8 = vld [vmem:[#allocation17_spill] sm:$0xff] }
 0x1c5   :  { %904 = vst [vmem:[%s2664_s4 + $0x28] sm:$0xff] %v840_v47  ;;  %905 = vst [vmem:[%s2664_s4 + $0x30] sm:$0xff] %v841_v31  ;;  %v851_v40 = vadd.f32 %v2290_v18, %v2051_v16  ;;  %v852_v53 = vadd.f32 %v2290_v18, %v2057_v37  ;;  %v853_v50 = vadd.f32 %v2290_v18, %v2063_v30  ;;  %v2856_v47 = vld [vmem:[#allocation21_spill] sm:$0xff] }
 0x1c6   :  { %906 = vst [vmem:[%s2664_s4 + $0x38] sm:$0xff] %v842_v58  ;;  %v854_v63 = vadd.f32 %v2290_v18, %v2069_v41  ;;  %907 = vst [vmem:[%s2664_s4 + $0x40] sm:$0xff] %v843_v61  ;;  %v855_v60 = vadd.f32 %v2290_v18, %v2075_v13  ;;  %v856_v9 = vadd.f32 %v2290_v18, %v2081_v45  ;;  %v2857_v58 = vld [vmem:[#allocation19_spill] sm:$0xff] }
 0x1c7   :  { %908 = vst [vmem:[%s2664_s4 + $0x48] sm:$0xff] %v844_v39  ;;  %909 = vst [vmem:[%s2664_s4 + $0x50] sm:$0xff] %v845_v2  ;;  %v857_v6 = vadd.f32 %v2290_v18, %v2087_v21  ;;  %v858_v19 = vadd.f32 %v2290_v18, %v2093_v29  ;;  %v859_v16 = vadd.f32 %v2290_v18, %v2099_v59  ;;  %v2858_v2 = vld [vmem:[#allocation25_spill] sm:$0xff] }
 0x1c8   :  { %910 = vst [vmem:[%s2664_s4 + $0x58] sm:$0xff] %v846_v27  ;;  %911 = vst [vmem:[%s2664_s4 + $0x60] sm:$0xff] %v847_v24  ;;  %v860_v37 = vadd.f32 %v2290_v18, %v2105_v55  ;;  %v861_v30 = vadd.f32 %v2290_v18, %v2111_v22  ;;  %v862_v41 = vadd.f32 %v2290_v18, %v2117_v15 }
 0x1c9   :  { %912 = vst [vmem:[%s2664_s4 + $0x68] sm:$0xff] %v848_v34  ;;  %913 = vst [vmem:[%s2664_s4 + $0x70] sm:$0xff] %v849_v32  ;;  %v863_v13 = vadd.f32 %v2290_v18, %v2123_v23  ;;  %v864_v45 = vadd.f32 %v2290_v18, %v2129_v11  ;;  %v865_v21 = vadd.f32 %v2290_v18, %v2135_v48 }
 0x1ca   :  { %914 = vst [vmem:[%s2664_s4 + $0x78] sm:$0xff] %v850_v43  ;;  %915 = vst [vmem:[%s2664_s4 + $0x80] sm:$0xff] %v851_v40  ;;  %v866_v29 = vadd.f32 %v2290_v18, %v2141_v14  ;;  %v867_v59 = vadd.f32 %v2290_v18, %v2147_v46  ;;  %v868_v55 = vadd.f32 %v2290_v18, %v2153_v12 }
 0x1cb   :  { %916 = vst [vmem:[%s2664_s4 + $0x88] sm:$0xff] %v852_v53  ;;  %917 = vst [vmem:[%s2664_s4 + $0x90] sm:$0xff] %v853_v50  ;;  %v869_v22 = vadd.f32 %v2290_v18, %v2159_v3  ;;  %v870_v15 = vadd.f32 %v2290_v18, %v2165_v28  ;;  %v871_v23 = vadd.f32 %v2290_v18, %v2171_v25 }
 0x1cc   :  { %918 = vst [vmem:[%s2664_s4 + $0x98] sm:$0xff] %v854_v63  ;;  %919 = vst [vmem:[%s2664_s4 + $0xa0] sm:$0xff] %v855_v60  ;;  %v872_v11 = vadd.f32 %v2290_v18, %v2177_v35  ;;  %v873_v48 = vadd.f32 %v2290_v18, %v2183_v33  ;;  %v874_v14 = vadd.f32 %v2290_v18, %v2189_v44  ;;  %v2849_v33 = vld [vmem:[#allocation3_spill] sm:$0xff] }
 0x1cd   :  { %920 = vst [vmem:[%s2664_s4 + $0xa8] sm:$0xff] %v856_v9  ;;  %921 = vst [vmem:[%s2664_s4 + $0xb0] sm:$0xff] %v857_v6  ;;  %v875_v46 = vadd.f32 %v2290_v18, %v2195_v42  ;;  %v876_v12 = vadd.f32 %v2290_v18, %v2201_v54  ;;  %v877_v3 = vadd.f32 %v2290_v18, %v2207_v52  ;;  %v2850_v42 = vld [vmem:[#allocation2_spill] sm:$0xff] }
 0x1ce   :  { %922 = vst [vmem:[%s2664_s4 + $0xb8] sm:$0xff] %v858_v19  ;;  %923 = vst [vmem:[%s2664_s4 + $0xc0] sm:$0xff] %v859_v16  ;;  %v878_v28 = vadd.f32 %v2290_v18, %v2213_v0  ;;  %v879_v25 = vadd.f32 %v2290_v18, %v2219_v62  ;;  %v880_v35 = vadd.f32 %v2290_v18, %v2225_v10  ;;  %v2851_v52 = vld [vmem:[#allocation6_spill] sm:$0xff]  ;;  %v2852_v62 = vld [vmem:[#allocation4_spill] sm:$0xff] }
 0x1cf   :  { %924 = vst [vmem:[%s2664_s4 + $0xc8] sm:$0xff] %v860_v37  ;;  %925 = vst [vmem:[%s2664_s4 + $0xd0] sm:$0xff] %v861_v30  ;;  %v881_v44 = vadd.f32 %v2290_v18, %v2849_v33  ;;  %v882_v54 = vadd.f32 %v2290_v18, %v2850_v42  ;;  %v883_v0 = vadd.f32 %v2290_v18, %v2851_v52 }
 0x1d0   :  { %926 = vst [vmem:[%s2664_s4 + $0xd8] sm:$0xff] %v862_v41  ;;  %927 = vst [vmem:[%s2664_s4 + $0xe0] sm:$0xff] %v863_v13  ;;  %v884_v10 = vadd.f32 %v2290_v18, %v2852_v62  ;;  %v885_v38 = vadd.f32 %v2290_v18, %v2853_v51  ;;  %v886_v36 = vadd.f32 %v2290_v18, %v2261_v56  ;;  %v2855_v56 = vld [vmem:[#allocation15_spill] sm:$0xff] }
 0x1d1   :  { %928 = vst [vmem:[%s2664_s4 + $0xe8] sm:$0xff] %v864_v45  ;;  %929 = vst [vmem:[%s2664_s4 + $0xf0] sm:$0xff] %v865_v21  ;;  %v887_v57 = vadd.f32 %v2290_v18, %v2854_v8  ;;  %v888_v20 = vadd.f32 %v2290_v18, %v2855_v56  ;;  %v889_v31 = vadd.f32 %v2290_v18, %v2856_v47 }
 0x1d2   :  { %930 = vst [vmem:[%s2664_s4 + $0xf8] sm:$0xff] %v866_v29  ;;  %931 = vst [vmem:[%s2664_s4 + $0x100] sm:$0xff] %v867_v59  ;;  %v890_v61 = vadd.f32 %v2290_v18, %v2857_v58  ;;  %v891_v39 = vadd.f32 %v2290_v18, %v2296_v4  ;;  %v892_v27 = vadd.f32 %v2290_v18, %v2858_v2 }
 0x1d3   :  { %932 = vst [vmem:[%s2664_s4 + $0x108] sm:$0xff] %v868_v55  ;;  %933 = vst [vmem:[%s2664_s4 + $0x110] sm:$0xff] %v869_v22  ;;  %v893_v24 = vadd.f32 %v2290_v18, %v2308_v7  ;;  %v894_v34 = vadd.f32 %v2290_v18, %v2314_v5  ;;  %v895_v4 = vadd.f32 %v2290_v18, %v2320_v1 }
 0x1d4   :  { %934 = vst [vmem:[%s2664_s4 + $0x118] sm:$0xff] %v870_v15  ;;  %935 = vst [vmem:[%s2664_s4 + $0x120] sm:$0xff] %v871_v23  ;;  %v896_v7 = vadd.f32 %v2290_v18, %v2326_v49  ;;  %v897_v5 = vadd.f32 %v2290_v18, %v2332_v26  ;;  %v898_v32 = vadd.f32 %v2290_v18, %v2338_v17 }
 0x1d5   :  { %936 = vst [vmem:[%s2664_s4 + $0x128] sm:$0xff] %v872_v11  ;;  %937 = vst [vmem:[%s2664_s4 + $0x130] sm:$0xff] %v873_v48 }
 0x1d6   :  { %938 = vst [vmem:[%s2664_s4 + $0x138] sm:$0xff] %v874_v14  ;;  %939 = vst [vmem:[%s2664_s4 + $0x140] sm:$0xff] %v875_v46 }
 0x1d7   :  { %940 = vst [vmem:[%s2664_s4 + $0x148] sm:$0xff] %v876_v12  ;;  %941 = vst [vmem:[%s2664_s4 + $0x150] sm:$0xff] %v877_v3 }
 0x1d8   :  { %942 = vst [vmem:[%s2664_s4 + $0x158] sm:$0xff] %v878_v28  ;;  %943 = vst [vmem:[%s2664_s4 + $0x160] sm:$0xff] %v879_v25 }
 0x1d9   :  { %944 = vst [vmem:[%s2664_s4 + $0x168] sm:$0xff] %v880_v35  ;;  %945 = vst [vmem:[%s2664_s4 + $0x170] sm:$0xff] %v881_v44 }
 0x1da   :  { %946 = vst [vmem:[%s2664_s4 + $0x178] sm:$0xff] %v882_v54  ;;  %947 = vst [vmem:[%s2664_s4 + $0x180] sm:$0xff] %v883_v0 }
 0x1db   :  { %948 = vst [vmem:[%s2664_s4 + $0x188] sm:$0xff] %v884_v10  ;;  %949 = vst [vmem:[%s2664_s4 + $0x190] sm:$0xff] %v885_v38 }
 0x1dc   :  { %950 = vst [vmem:[%s2664_s4 + $0x198] sm:$0xff] %v886_v36  ;;  %951 = vst [vmem:[%s2664_s4 + $0x1a0] sm:$0xff] %v887_v57 }
 0x1dd   :  { %952 = vst [vmem:[%s2664_s4 + $0x1a8] sm:$0xff] %v888_v20  ;;  %953 = vst [vmem:[%s2664_s4 + $0x1b0] sm:$0xff] %v889_v31 }
 0x1de   :  { %954 = vst [vmem:[%s2664_s4 + $0x1b8] sm:$0xff] %v890_v61  ;;  %955 = vst [vmem:[%s2664_s4 + $0x1c0] sm:$0xff] %v891_v39 }
 0x1df   :  { %956 = vst [vmem:[%s2664_s4 + $0x1c8] sm:$0xff] %v892_v27  ;;  %957 = vst [vmem:[%s2664_s4 + $0x1d0] sm:$0xff] %v893_v24 }
 0x1e0   :  { %958 = vst [vmem:[%s2664_s4 + $0x1d8] sm:$0xff] %v894_v34  ;;  %959 = vst [vmem:[%s2664_s4 + $0x1e0] sm:$0xff] %v895_v4 }
 0x1e1   :  { %960 = vst [vmem:[%s2664_s4 + $0x1e8] sm:$0xff] %v896_v7  ;;  %961 = vst [vmem:[%s2664_s4 + $0x1f0] sm:$0xff] %v897_v5 }
 0x1e2   :  { %962 = vst [vmem:[%s2664_s4 + $0x1f8] sm:$0xff] %v898_v32 }

// kernel: d_forward.7
= control target key start
LH: loop header
LB: loop body
LE: loop exit
PB: predicated region body
PF: predicated region fallthrough
CT: control target
= control target key end

     0   :  { %s873_s1 = inlined_call_operand.vmem [shape: f32[256,128], index: 1, kind: input, shape index: {}]   ;;  %s874_s0 = inlined_call_operand.vmem [shape: f32[128,256], index: 0, kind: input, shape index: {}]   ;;  %s875_s2 = inlined_call_operand.vmem [shape: f32[1,128], index: 2, kind: input, shape index: {}]   ;;  %s876_s3 = inlined_call_operand.vmem [shape: f32[1,128], index: 3, kind: input, shape index: {}]   ;;  %s877_s4 = inlined_call_operand.vmem [shape: f32[128,128], index: 4, kind: output, shape index: {}]  }
   0x1   :  { %v65_v0 = vld [vmem:[%s873_s1 + $0x80] sm:$0xff]  ;;  %v66_v1 = vld [vmem:[%s873_s1 + $0x88] sm:$0xff]  ;;  %v67_v5 = vld [vmem:[%s873_s1 + $0x90] sm:$0xff] }
   0x2   :  { %v49_v2 = vld [vmem:[%s873_s1] sm:$0xff]  ;;  %v456_v3 = vpack.c.bf16 %v66_v1, %v65_v0  ;;  %v50_v4 = vld [vmem:[%s873_s1 + $0x8] sm:$0xff]  ;;  %v68_v6 = vld [vmem:[%s873_s1 + $0x98] sm:$0xff] }
   0x3   :  { %v458_v7 = vpack.c.bf16 %v50_v4, %v49_v2  ;;  %v460_v8 = vpack.c.bf16 %v68_v6, %v67_v5  ;;  %v51_v9 = vld [vmem:[%s873_s1 + $0x10] sm:$0xff]  ;;  %v52_v10 = vld [vmem:[%s873_s1 + $0x18] sm:$0xff]  ;;  %v69_v11 = vld [vmem:[%s873_s1 + $0xa0] sm:$0xff] }
   0x4   :  { %457 = vmatprep.subr.bf16.mxu0 %v456_v3  ;;  %v70_v12 = vld [vmem:[%s873_s1 + $0xa8] sm:$0xff]  ;;  %488 = vmatprep.subr.bf16.mxu1 %v456_v3  ;;  %v462_v13 = vpack.c.bf16 %v52_v10, %v51_v9  ;;  %v53_v15 = vld [vmem:[%s873_s1 + $0x20] sm:$0xff]  ;;  %v71_v17 = vld [vmem:[%s873_s1 + $0xb0] sm:$0xff] }
   0x5   :  { %459 = vmatpush3.bf16.msra.mxu0 %v458_v7  ;;  %496 = vmatpush3.bf16.msra.mxu1 %v458_v7  ;;  %v464_v14 = vpack.c.bf16 %v70_v12, %v69_v11  ;;  %v54_v16 = vld [vmem:[%s873_s1 + $0x28] sm:$0xff]  ;;  %v72_v18 = vld [vmem:[%s873_s1 + $0xb8] sm:$0xff]  ;;  %v55_v21 = vld [vmem:[%s873_s1 + $0x30] sm:$0xff] }
   0x6   :  { %461 = vmatprep.subr.bf16.mxu0 %v460_v8  ;;  %489 = vmatprep.subr.bf16.mxu1 %v460_v8  ;;  %v466_v19 = vpack.c.bf16 %v54_v16, %v53_v15  ;;  %v468_v20 = vpack.c.bf16 %v72_v18, %v71_v17  ;;  %v56_v22 = vld [vmem:[%s873_s1 + $0x38] sm:$0xff]  ;;  %v73_v23 = vld [vmem:[%s873_s1 + $0xc0] sm:$0xff]  ;;  %v74_v24 = vld [vmem:[%s873_s1 + $0xc8] sm:$0xff] }
   0x7   :  { %v18_v25 = vld [vmem:[%s874_s0 + $0x8] sm:$0xff]  ;;  %v470_v26 = vpack.c.bf16 %v56_v22, %v55_v21  ;;  %v472_v27 = vpack.c.bf16 %v74_v24, %v73_v23  ;;  %v57_v28 = vld [vmem:[%s873_s1 + $0x40] sm:$0xff]  ;;  %v75_v31 = vld [vmem:[%s873_s1 + $0xd0] sm:$0xff] }
   0x8   :  { %145 = vmatprep.mubr.f32.mxu0 %v18_v25  ;;  %v58_v29 = vld [vmem:[%s873_s1 + $0x48] sm:$0xff]  ;;  %v76_v32 = vld [vmem:[%s873_s1 + $0xd8] sm:$0xff]  ;;  %v59_v35 = vld [vmem:[%s873_s1 + $0x50] sm:$0xff] }
   0x9   :  { %463 = vmatpush3.bf16.msra.mxu0 %v462_v13  ;;  %497 = vmatpush3.bf16.msra.mxu1 %v462_v13  ;;  %v34_v30 = vld [vmem:[%s874_s0 + $0x88] sm:$0xff]  ;;  %v474_v33 = vpack.c.bf16 %v58_v29, %v57_v28  ;;  %v476_v34 = vpack.c.bf16 %v76_v32, %v75_v31  ;;  %v60_v36 = vld [vmem:[%s873_s1 + $0x58] sm:$0xff]  ;;  %v77_v37 = vld [vmem:[%s873_s1 + $0xe0] sm:$0xff] }
   0xa   :  { %465 = vmatprep.subr.bf16.mxu0 %v464_v14  ;;  %490 = vmatprep.subr.bf16.mxu1 %v464_v14  ;;  %v78_v38 = vld [vmem:[%s873_s1 + $0xe8] sm:$0xff]  ;;  %v478_v39 = vpack.c.bf16 %v60_v36, %v59_v35  ;;  %v61_v41 = vld [vmem:[%s873_s1 + $0x60] sm:$0xff]  ;;  %v79_v43 = vld [vmem:[%s873_s1 + $0xf0] sm:$0xff] }
   0xb   :  { %185 = vmatprep.mubr.f32.mxu1 %v34_v30  ;;  %v480_v40 = vpack.c.bf16 %v78_v38, %v77_v37  ;;  %v62_v42 = vld [vmem:[%s873_s1 + $0x68] sm:$0xff]  ;;  %v80_v44 = vld [vmem:[%s873_s1 + $0xf8] sm:$0xff]  ;;  %v63_v47 = vld [vmem:[%s873_s1 + $0x70] sm:$0xff] }
   0xc   :  { %v482_v45 = vpack.c.bf16 %v62_v42, %v61_v41  ;;  %v484_v46 = vpack.c.bf16 %v80_v44, %v79_v43  ;;  %v64_v48 = vld [vmem:[%s873_s1 + $0x78] sm:$0xff]  ;;  %v17_v50 = vld [vmem:[%s874_s0] sm:$0xff]  ;;  %v19_v54 = vld [vmem:[%s874_s0 + $0x10] sm:$0xff] }
   0xd   :  { %467 = vmatpush3.bf16.msra.mxu0 %v466_v19  ;;  %498 = vmatpush3.bf16.msra.mxu1 %v466_v19  ;;  %v486_v49 = vpack.c.bf16 %v64_v48, %v63_v47  ;;  %v33_v51 = vld [vmem:[%s874_s0 + $0x80] sm:$0xff]  ;;  %v20_v52 = vld [vmem:[%s874_s0 + $0x18] sm:$0xff]  ;;  %v35_v55 = vld [vmem:[%s874_s0 + $0x90] sm:$0xff] }
   0xe   :  { %469 = vmatprep.subr.bf16.mxu0 %v468_v20  ;;  %491 = vmatprep.subr.bf16.mxu1 %v468_v20  ;;  %v36_v53 = vld [vmem:[%s874_s0 + $0x98] sm:$0xff]  ;;  %v22_v56 = vld [vmem:[%s874_s0 + $0x28] sm:$0xff]  ;;  %v21_v58 = vld [vmem:[%s874_s0 + $0x20] sm:$0xff] }
   0xf   :  { %v38_v57 = vld [vmem:[%s874_s0 + $0xa8] sm:$0xff]  ;;  %v37_v59 = vld [vmem:[%s874_s0 + $0xa0] sm:$0xff]  ;;  %v24_v60 = vld [vmem:[%s874_s0 + $0x38] sm:$0xff] }
  0x10   :  { %v40_v61 = vld [vmem:[%s874_s0 + $0xb8] sm:$0xff]  ;;  %v23_v62 = vld [vmem:[%s874_s0 + $0x30] sm:$0xff]  ;;  %v26_v0 = vld [vmem:[%s874_s0 + $0x48] sm:$0xff] }
  0x11   :  { %471 = vmatpush3.bf16.msra.mxu0 %v470_v26  ;;  %499 = vmatpush3.bf16.msra.mxu1 %v470_v26  ;;  %v39_v63 = vld [vmem:[%s874_s0 + $0xb0] sm:$0xff]  ;;  %v42_v1 = vld [vmem:[%s874_s0 + $0xc8] sm:$0xff]  ;;  %v25_v2 = vld [vmem:[%s874_s0 + $0x40] sm:$0xff] }
  0x12   :  { %473 = vmatprep.subr.bf16.mxu0 %v472_v27  ;;  %492 = vmatprep.subr.bf16.mxu1 %v472_v27  ;;  %v41_v3 = vld [vmem:[%s874_s0 + $0xc0] sm:$0xff]  ;;  %v28_v4 = vld [vmem:[%s874_s0 + $0x58] sm:$0xff]  ;;  %v27_v6 = vld [vmem:[%s874_s0 + $0x50] sm:$0xff] }
  0x13   :  { %v44_v5 = vld [vmem:[%s874_s0 + $0xd8] sm:$0xff]  ;;  %v43_v7 = vld [vmem:[%s874_s0 + $0xd0] sm:$0xff]  ;;  %v30_v8 = vld [vmem:[%s874_s0 + $0x68] sm:$0xff] }
  0x14   :  { %v46_v9 = vld [vmem:[%s874_s0 + $0xe8] sm:$0xff]  ;;  %v29_v10 = vld [vmem:[%s874_s0 + $0x60] sm:$0xff]  ;;  %v32_v12 = vld [vmem:[%s874_s0 + $0x78] sm:$0xff] }
  0x15   :  { %475 = vmatpush3.bf16.msra.mxu0 %v474_v33  ;;  %500 = vmatpush3.bf16.msra.mxu1 %v474_v33  ;;  %v45_v11 = vld [vmem:[%s874_s0 + $0xe0] sm:$0xff]  ;;  %v48_v13 = vld [vmem:[%s874_s0 + $0xf8] sm:$0xff]  ;;  %v31_v14 = vld [vmem:[%s874_s0 + $0x70] sm:$0xff] }
  0x16   :  { %477 = vmatprep.subr.bf16.mxu0 %v476_v34  ;;  %493 = vmatprep.subr.bf16.mxu1 %v476_v34  ;;  %v47_v15 = vld [vmem:[%s874_s0 + $0xf0] sm:$0xff] }
  0x19   :  { %479 = vmatpush3.bf16.msra.mxu0 %v478_v39  ;;  %501 = vmatpush3.bf16.msra.mxu1 %v478_v39 }
  0x1a   :  { %481 = vmatprep.subr.bf16.mxu0 %v480_v40  ;;  %494 = vmatprep.subr.bf16.mxu1 %v480_v40 }
  0x1d   :  { %483 = vmatpush3.bf16.msra.mxu0 %v482_v45  ;;  %502 = vmatpush3.bf16.msra.mxu1 %v482_v45 }
  0x1e   :  { %485 = vmatprep.subr.bf16.mxu0 %v484_v46  ;;  %495 = vmatprep.subr.bf16.mxu1 %v484_v46 }
  0x21   :  { %487 = vmatpush3.bf16.msra.mxu0 %v486_v49  ;;  %503 = vmatpush3.bf16.msra.mxu1 %v486_v49 }
  0x24   :  { %146 = vmatmul.mubr.f32.vlgmr.msra.gmra.mrb[0].mxu0 %v17_v50  ;;  %186 = vmatmul.mubr.f32.vlgmr.msra.gmra.mrb[0].mxu1 %v33_v51 }
  0x25   :  { %150 = vmatprep.mubr.f32.mxu0 %v20_v52  ;;  %190 = vmatprep.mubr.f32.mxu1 %v36_v53 }
  0x28   :  { %151 = vmatmul.mubr.f32.gmra.mrb[2].mxu0 %v19_v54  ;;  %191 = vmatmul.mubr.f32.gmra.mrb[2].mxu1 %v35_v55 }
  0x29   :  { %155 = vmatprep.mubr.f32.mxu0 %v22_v56  ;;  %195 = vmatprep.mubr.f32.mxu1 %v38_v57 }
  0x2c   :  { %156 = vmatmul.mubr.f32.gmra.mrb[4].mxu0 %v21_v58  ;;  %196 = vmatmul.mubr.f32.gmra.mrb[4].mxu1 %v37_v59 }
  0x2d   :  { %160 = vmatprep.mubr.f32.mxu0 %v24_v60  ;;  %200 = vmatprep.mubr.f32.mxu1 %v40_v61 }
  0x30   :  { %161 = vmatmul.mubr.f32.gmra.mrb[6].mxu0 %v23_v62  ;;  %201 = vmatmul.mubr.f32.gmra.mrb[6].mxu1 %v39_v63 }
  0x31   :  { %165 = vmatprep.mubr.f32.mxu0 %v26_v0  ;;  %205 = vmatprep.mubr.f32.mxu1 %v42_v1 }
  0x34   :  { %166 = vmatmul.mubr.f32.gmra.mrb[8].mxu0 %v25_v2  ;;  %206 = vmatmul.mubr.f32.gmra.mrb[8].mxu1 %v41_v3 }
  0x35   :  { %170 = vmatprep.mubr.f32.mxu0 %v28_v4  ;;  %210 = vmatprep.mubr.f32.mxu1 %v44_v5 }
  0x38   :  { %171 = vmatmul.mubr.f32.gmra.mrb[10].mxu0 %v27_v6  ;;  %211 = vmatmul.mubr.f32.gmra.mrb[10].mxu1 %v43_v7 }
  0x39   :  { %175 = vmatprep.mubr.f32.mxu0 %v30_v8  ;;  %215 = vmatprep.mubr.f32.mxu1 %v46_v9 }
  0x3c   :  { %176 = vmatmul.mubr.f32.gmra.mrb[12].mxu0 %v29_v10  ;;  %216 = vmatmul.mubr.f32.gmra.mrb[12].mxu1 %v45_v11 }
  0x3d   :  { %180 = vmatprep.mubr.f32.mxu0 %v32_v12  ;;  %220 = vmatprep.mubr.f32.mxu1 %v48_v13 }
  0x40   :  { %181 = vmatmul.mubr.f32.gmra.mrb[14].mxu0 %v31_v14  ;;  %221 = vmatmul.mubr.f32.gmra.mrb[14].mxu1 %v47_v15 }
  0xf7   :  { %v408_v16 = vpop.f32.mrb[0].mxu0  ;;  %v432_v17 = vpop.f32.mrb[0].mxu1 }
  0xf8   :  { %v409_v18 = vpop.f32.mrb[1].mxu0  ;;  %v433_v19 = vpop.f32.mrb[1].mxu1 }
  0xf9   :  { %v723_v20 = vadd.f32 %v409_v18, %v408_v16  ;;  %v725_v21 = vadd.f32 %v433_v19, %v432_v17 }
  0xfb   :  { %v411_v22 = vpop.f32.mrb[2].mxu0  ;;  %v435_v23 = vpop.f32.mrb[2].mxu1  ;;  %v249_v28 = vmul.f32 %v723_v20, %v723_v20 }
  0xfc   :  { %v412_v24 = vpop.f32.mrb[3].mxu0  ;;  %v436_v25 = vpop.f32.mrb[3].mxu1 }
  0xfd   :  { %v727_v26 = vadd.f32 %v412_v24, %v411_v22  ;;  %v729_v27 = vadd.f32 %v436_v25, %v435_v23  ;;  %v257_v23 = vmul.f32 %v725_v21, %v725_v21 }
  0xff   :  { %v226_v29 = vadd.f32 %v727_v26, %v723_v20  ;;  %v250_v30 = vmul.f32 %v727_v26, %v727_v26  ;;  %v414_v31 = vpop.f32.mrb[4].mxu0  ;;  %v438_v32 = vpop.f32.mrb[4].mxu1 }
 0x100   :  { %v415_v33 = vpop.f32.mrb[5].mxu0  ;;  %v439_v34 = vpop.f32.mrb[5].mxu1 }
 0x101   :  { %v265_v35 = vadd.f32 %v250_v30, %v249_v28  ;;  %v737_v36 = vadd.f32 %v415_v33, %v414_v31  ;;  %v739_v37 = vadd.f32 %v439_v34, %v438_v32  ;;  %v258_v28 = vmul.f32 %v729_v27, %v729_v27 }
 0x103   :  { %v227_v38 = vadd.f32 %v737_v36, %v226_v29  ;;  %v251_v39 = vmul.f32 %v737_v36, %v737_v36  ;;  %v417_v40 = vpop.f32.mrb[6].mxu0  ;;  %v441_v41 = vpop.f32.mrb[6].mxu1  ;;  %v259_v31 = vmul.f32 %v739_v37, %v739_v37 }
 0x104   :  { %v418_v42 = vpop.f32.mrb[7].mxu0  ;;  %v442_v43 = vpop.f32.mrb[7].mxu1 }
 0x105   :  { %v266_v44 = vadd.f32 %v265_v35, %v251_v39  ;;  %v744_v45 = vadd.f32 %v418_v42, %v417_v40  ;;  %v746_v46 = vadd.f32 %v442_v43, %v441_v41 }
 0x107   :  { %v228_v47 = vadd.f32 %v744_v45, %v227_v38  ;;  %v252_v48 = vmul.f32 %v744_v45, %v744_v45  ;;  %v420_v49 = vpop.f32.mrb[8].mxu0  ;;  %v444_v50 = vpop.f32.mrb[8].mxu1  ;;  %v260_v34 = vmul.f32 %v746_v46, %v746_v46 }
 0x108   :  { %v421_v51 = vpop.f32.mrb[9].mxu0  ;;  %v445_v52 = vpop.f32.mrb[9].mxu1 }
 0x109   :  { %v267_v53 = vadd.f32 %v266_v44, %v252_v48  ;;  %v751_v54 = vadd.f32 %v421_v51, %v420_v49  ;;  %v753_v55 = vadd.f32 %v445_v52, %v444_v50 }
 0x10b   :  { %v229_v56 = vadd.f32 %v751_v54, %v228_v47  ;;  %v253_v57 = vmul.f32 %v751_v54, %v751_v54  ;;  %v423_v58 = vpop.f32.mrb[10].mxu0  ;;  %v447_v59 = vpop.f32.mrb[10].mxu1  ;;  %v261_v40 = vmul.f32 %v753_v55, %v753_v55 }
 0x10c   :  { %v424_v60 = vpop.f32.mrb[11].mxu0  ;;  %v448_v61 = vpop.f32.mrb[11].mxu1 }
 0x10d   :  { %v268_v62 = vadd.f32 %v267_v53, %v253_v57  ;;  %v758_v63 = vadd.f32 %v424_v60, %v423_v58  ;;  %v760_v0 = vadd.f32 %v448_v61, %v447_v59 }
 0x10f   :  { %v230_v1 = vadd.f32 %v758_v63, %v229_v56  ;;  %v254_v2 = vmul.f32 %v758_v63, %v758_v63  ;;  %v426_v3 = vpop.f32.mrb[12].mxu0  ;;  %v450_v4 = vpop.f32.mrb[12].mxu1  ;;  %v262_v44 = vmul.f32 %v760_v0, %v760_v0 }
 0x110   :  { %v427_v5 = vpop.f32.mrb[13].mxu0  ;;  %v451_v6 = vpop.f32.mrb[13].mxu1 }
 0x111   :  { %v269_v7 = vadd.f32 %v268_v62, %v254_v2  ;;  %v765_v8 = vadd.f32 %v427_v5, %v426_v3  ;;  %v767_v9 = vadd.f32 %v451_v6, %v450_v4 }
 0x113   :  { %v231_v10 = vadd.f32 %v765_v8, %v230_v1  ;;  %v255_v11 = vmul.f32 %v765_v8, %v765_v8  ;;  %v429_v12 = vpop.f32.mrb[14].mxu0  ;;  %v453_v13 = vpop.f32.mrb[14].mxu1  ;;  %v263_v49 = vmul.f32 %v767_v9, %v767_v9 }
 0x114   :  { %v430_v14 = vpop.f32.mrb[15].mxu0  ;;  %v454_v15 = vpop.f32.mrb[15].mxu1 }
 0x115   :  { %v270_v16 = vadd.f32 %v269_v7, %v255_v11  ;;  %v772_v17 = vadd.f32 %v430_v14, %v429_v12  ;;  %v774_v18 = vadd.f32 %v454_v15, %v453_v13 }
 0x117   :  { %v232_v19 = vadd.f32 %v772_v17, %v231_v10  ;;  %v256_v22 = vmul.f32 %v772_v17, %v772_v17  ;;  %v264_v50 = vmul.f32 %v774_v18, %v774_v18 }
 0x119   :  { %v233_v24 = vadd.f32 %v725_v21, %v232_v19  ;;  %v271_v25 = vadd.f32 %v270_v16, %v256_v22 }
 0x11b   :  { %v234_v29 = vadd.f32 %v729_v27, %v233_v24  ;;  %v272_v30 = vadd.f32 %v271_v25, %v257_v23 }
 0x11d   :  { %v273_v32 = vadd.f32 %v272_v30, %v258_v28  ;;  %v235_v33 = vadd.f32 %v739_v37, %v234_v29 }
 0x11f   :  { %v236_v35 = vadd.f32 %v746_v46, %v235_v33  ;;  %v274_v38 = vadd.f32 %v273_v32, %v259_v31 }
 0x121   :  { %v237_v39 = vadd.f32 %v753_v55, %v236_v35  ;;  %v275_v41 = vadd.f32 %v274_v38, %v260_v34  ;;  %v375_v35 = vld [vmem:[%s876_s3] ss:$0 sm:$0xff] }
 0x123   :  { %v276_v42 = vadd.f32 %v275_v41, %v261_v40  ;;  %v238_v43 = vadd.f32 %v760_v0, %v237_v39 }
 0x125   :  { %v277_v47 = vadd.f32 %v276_v42, %v262_v44  ;;  %v239_v48 = vadd.f32 %v767_v9, %v238_v43 }
 0x127   :  { %v278_v51 = vadd.f32 %v277_v47, %v263_v49  ;;  %v240_v52 = vadd.f32 %v774_v18, %v239_v48 }
 0x129   :  { %v241_v53 = vrot.slane %v240_v52, 4  ;;  %v279_v56 = vadd.f32 %v278_v51, %v264_v50 }
 0x12b   :  { %v242_v57 = vadd.f32 %v241_v53, %v240_v52  ;;  %v280_v58 = vrot.slane %v279_v56, 4 }
 0x12d   :  { %v243_v59 = vrot.slane %v242_v57, 2  ;;  %v281_v60 = vadd.f32 %v280_v58, %v279_v56 }
 0x12f   :  { %v244_v61 = vadd.f32 %v243_v59, %v242_v57  ;;  %v282_v62 = vrot.slane %v281_v60, 2 }
 0x131   :  { %v245_v1 = vrot.slane %v244_v61, 1  ;;  %v283_v2 = vadd.f32 %v282_v62, %v281_v60 }
 0x133   :  { %v246_v3 = vadd.f32 %v245_v1, %v244_v61  ;;  %v284_v4 = vrot.slane %v283_v2, 1 }
 0x135   :  { %v248_v5 = vmul.f32 0.0078125, %v246_v3  ;;  %v285_v6 = vadd.f32 %v284_v4, %v283_v2 }
 0x137   :  { %v286_v7 = vmul.f32 0.0078125, %v285_v6  ;;  %v287_v10 = vmul.f32 %v248_v5, %v248_v5  ;;  %v292_v11 = vsub.f32 %v723_v20, %v248_v5  ;;  %v293_v12 = vsub.f32 %v727_v26, %v248_v5 }
 0x138   :  { %v294_v13 = vsub.f32 %v737_v36, %v248_v5  ;;  %v295_v14 = vsub.f32 %v744_v45, %v248_v5  ;;  %v296_v15 = vsub.f32 %v751_v54, %v248_v5  ;;  %v297_v16 = vsub.f32 %v758_v63, %v248_v5 }
 0x139   :  { %v288_v19 = vsub.f32 %v286_v7, %v287_v10  ;;  %v298_v22 = vsub.f32 %v765_v8, %v248_v5  ;;  %v299_v23 = vsub.f32 %v772_v17, %v248_v5  ;;  %v300_v24 = vsub.f32 %v725_v21, %v248_v5  ;;  %v308_v21 = vld [vmem:[%s875_s2] sm:$0x1] }
 0x13a   :  { %v301_v25 = vsub.f32 %v729_v27, %v248_v5  ;;  %v302_v20 = vsub.f32 %v739_v37, %v248_v5  ;;  %v303_v26 = vsub.f32 %v746_v46, %v248_v5  ;;  %v304_v36 = vsub.f32 %v753_v55, %v248_v5 }
 0x13b   :  { %v289_v45 = vmax.f32 %v288_v19, 0.0  ;;  %v305_v54 = vsub.f32 %v760_v0, %v248_v5  ;;  %v306_v63 = vsub.f32 %v767_v9, %v248_v5  ;;  %v307_v28 = vsub.f32 %v774_v18, %v248_v5 }
 0x13c   :  { %v311_v17 = vlaneseq }
 0x13d   :  { %v290_v8 = vadd.f32 1e-05, %v289_v45 }
 0x13e   :  { %v312_v29 = vshrl.u32 %v311_v17, 7 }
 0x13f   :  { %504 = vrsqrt.f32 %v290_v8 }
 0x140   :  { %v313_v27 = vsub.s32 0, %v312_v29 }
 0x149   :  { %v505_v37 = vpop.eup %504 }
 0x14a   :  { %v309_v46 = vmul.f32 %v505_v37, %v308_v21 }
 0x14c   :  { %v314_v30 = vrot.slane %v309_v46, %v313_v27 }
 0x14e   :  { %v316_v55 = vmul.f32 %v314_v30, %v292_v11  ;;  %v317_v31 = vmul.f32 %v314_v30, %v293_v12  ;;  %v318_v32 = vmul.f32 %v314_v30, %v294_v13  ;;  %v319_v0 = vmul.f32 %v314_v30, %v295_v14 }
 0x14f   :  { %v320_v33 = vmul.f32 %v314_v30, %v296_v15  ;;  %v321_v9 = vmul.f32 %v314_v30, %v297_v16  ;;  %v322_v34 = vmul.f32 %v314_v30, %v298_v22  ;;  %v323_v18 = vmul.f32 %v314_v30, %v299_v23 }
 0x150   :  { %v324_v38 = vmul.f32 %v314_v30, %v300_v24  ;;  %v325_v39 = vmul.f32 %v314_v30, %v301_v25  ;;  %v326_v40 = vmul.f32 %v314_v30, %v302_v20  ;;  %v327_v41 = vmul.f32 %v314_v30, %v303_v26 }
 0x151   :  { %v328_v42 = vmul.f32 %v314_v30, %v304_v36  ;;  %v329_v43 = vmul.f32 %v314_v30, %v305_v54  ;;  %v330_v44 = vmul.f32 %v314_v30, %v306_v63  ;;  %v331_v47 = vmul.f32 %v314_v30, %v307_v28 }
 0x152   :  { %v339_v48 = vadd.f32 %v375_v35, %v316_v55  ;;  %v340_v49 = vadd.f32 %v375_v35, %v317_v31  ;;  %v341_v50 = vadd.f32 %v375_v35, %v318_v32  ;;  %v342_v51 = vadd.f32 %v375_v35, %v319_v0 }
 0x153   :  { %v343_v52 = vadd.f32 %v375_v35, %v320_v33  ;;  %v344_v53 = vadd.f32 %v375_v35, %v321_v9  ;;  %v345_v56 = vadd.f32 %v375_v35, %v322_v34  ;;  %v346_v57 = vadd.f32 %v375_v35, %v323_v18 }
 0x154   :  { %v347_v58 = vadd.f32 %v375_v35, %v324_v38  ;;  %v348_v59 = vadd.f32 %v375_v35, %v325_v39  ;;  %v349_v60 = vadd.f32 %v375_v35, %v326_v40  ;;  %v350_v61 = vadd.f32 %v375_v35, %v327_v41  ;;  %355 = vst [vmem:[%s877_s4] sm:$0xff] %v339_v48 }
 0x155   :  { %356 = vst [vmem:[%s877_s4 + $0x8] sm:$0xff] %v340_v49  ;;  %357 = vst [vmem:[%s877_s4 + $0x10] sm:$0xff] %v341_v50  ;;  %v351_v62 = vadd.f32 %v375_v35, %v328_v42  ;;  %v352_v1 = vadd.f32 %v375_v35, %v329_v43  ;;  %v353_v2 = vadd.f32 %v375_v35, %v330_v44 }
 0x156   :  { %358 = vst [vmem:[%s877_s4 + $0x18] sm:$0xff] %v342_v51  ;;  %v354_v3 = vadd.f32 %v375_v35, %v331_v47  ;;  %359 = vst [vmem:[%s877_s4 + $0x20] sm:$0xff] %v343_v52 }
 0x157   :  { %360 = vst [vmem:[%s877_s4 + $0x28] sm:$0xff] %v344_v53  ;;  %361 = vst [vmem:[%s877_s4 + $0x30] sm:$0xff] %v345_v56 }
 0x158   :  { %362 = vst [vmem:[%s877_s4 + $0x38] sm:$0xff] %v346_v57  ;;  %363 = vst [vmem:[%s877_s4 + $0x40] sm:$0xff] %v347_v58 }
 0x159   :  { %364 = vst [vmem:[%s877_s4 + $0x48] sm:$0xff] %v348_v59  ;;  %365 = vst [vmem:[%s877_s4 + $0x50] sm:$0xff] %v349_v60 }
 0x15a   :  { %366 = vst [vmem:[%s877_s4 + $0x58] sm:$0xff] %v350_v61  ;;  %367 = vst [vmem:[%s877_s4 + $0x60] sm:$0xff] %v351_v62 }
 0x15b   :  { %368 = vst [vmem:[%s877_s4 + $0x68] sm:$0xff] %v352_v1  ;;  %369 = vst [vmem:[%s877_s4 + $0x70] sm:$0xff] %v353_v2 }
 0x15c   :  { %370 = vst [vmem:[%s877_s4 + $0x78] sm:$0xff] %v354_v3 }

// kernel: d_forward.8
= control target key start
LH: loop header
LB: loop body
LE: loop exit
PB: predicated region body
PF: predicated region fallthrough
CT: control target
= control target key end

     0   :  { %s776_s1 = inlined_call_operand.vmem [shape: f32[512,128], index: 1, kind: input, shape index: {}]   ;;  %s777_s0 = inlined_call_operand.vmem [shape: f32[32,512], index: 0, kind: input, shape index: {}]   ;;  %s778_s2 = inlined_call_operand.vmem [shape: f32[1,128], index: 2, kind: input, shape index: {}]   ;;  %s779_s3 = inlined_call_operand.vmem [shape: f32[1,128], index: 3, kind: input, shape index: {}]   ;;  %s780_s4 = inlined_call_operand.vmem [shape: f32[32,128], index: 4, kind: output, shape index: {}]  }
   0x1   :  { %v49_v0 = vld [vmem:[%s776_s1 + $0x80] sm:$0xff]  ;;  %v50_v1 = vld [vmem:[%s776_s1 + $0x88] sm:$0xff]  ;;  %v51_v11 = vld [vmem:[%s776_s1 + $0x90] sm:$0xff] }
   0x2   :  { %v81_v2 = vld [vmem:[%s776_s1 + $0x180] sm:$0xff]  ;;  %v421_v3 = vpack.c.bf16 %v50_v1, %v49_v0  ;;  %v82_v4 = vld [vmem:[%s776_s1 + $0x188] sm:$0xff]  ;;  %v52_v13 = vld [vmem:[%s776_s1 + $0x98] sm:$0xff] }
   0x3   :  { %v33_v5 = vld [vmem:[%s776_s1] sm:$0xff]  ;;  %v34_v6 = vld [vmem:[%s776_s1 + $0x8] sm:$0xff]  ;;  %v453_v7 = vpack.c.bf16 %v82_v4, %v81_v2  ;;  %v83_v14 = vld [vmem:[%s776_s1 + $0x190] sm:$0xff]  ;;  %v425_v16 = vpack.c.bf16 %v52_v13, %v51_v11 }
   0x4   :  { %v423_v8 = vpack.c.bf16 %v34_v6, %v33_v5  ;;  %v65_v9 = vld [vmem:[%s776_s1 + $0x100] sm:$0xff]  ;;  %v66_v10 = vld [vmem:[%s776_s1 + $0x108] sm:$0xff]  ;;  %422 = vmatprep.subr.bf16.mxu0 %v421_v3  ;;  %v84_v15 = vld [vmem:[%s776_s1 + $0x198] sm:$0xff] }
   0x5   :  { %v455_v12 = vpack.c.bf16 %v66_v10, %v65_v9  ;;  %454 = vmatprep.subr.bf16.mxu1 %v453_v7  ;;  %v457_v17 = vpack.c.bf16 %v84_v15, %v83_v14  ;;  %v35_v18 = vld [vmem:[%s776_s1 + $0x10] sm:$0xff]  ;;  %v36_v19 = vld [vmem:[%s776_s1 + $0x18] sm:$0xff]  ;;  %v53_v23 = vld [vmem:[%s776_s1 + $0xa0] sm:$0xff] }
   0x6   :  { %424 = vmatpush3.bf16.msra.mxu0 %v423_v8  ;;  %v67_v20 = vld [vmem:[%s776_s1 + $0x110] sm:$0xff]  ;;  %v427_v21 = vpack.c.bf16 %v36_v19, %v35_v18  ;;  %v68_v22 = vld [vmem:[%s776_s1 + $0x118] sm:$0xff]  ;;  %v54_v24 = vld [vmem:[%s776_s1 + $0xa8] sm:$0xff] }
   0x7   :  { %456 = vmatpush3.bf16.msra.mxu1 %v455_v12  ;;  %426 = vmatprep.subr.bf16.mxu0 %v425_v16  ;;  %v459_v25 = vpack.c.bf16 %v68_v22, %v67_v20  ;;  %v429_v26 = vpack.c.bf16 %v54_v24, %v53_v23  ;;  %v85_v27 = vld [vmem:[%s776_s1 + $0x1a0] sm:$0xff]  ;;  %v86_v28 = vld [vmem:[%s776_s1 + $0x1a8] sm:$0xff]  ;;  %v55_v35 = vld [vmem:[%s776_s1 + $0xb0] sm:$0xff] }
   0x8   :  { %458 = vmatprep.subr.bf16.mxu1 %v457_v17  ;;  %v37_v29 = vld [vmem:[%s776_s1 + $0x20] sm:$0xff]  ;;  %v461_v30 = vpack.c.bf16 %v86_v28, %v85_v27  ;;  %v38_v31 = vld [vmem:[%s776_s1 + $0x28] sm:$0xff]  ;;  %v56_v36 = vld [vmem:[%s776_s1 + $0xb8] sm:$0xff] }
   0x9   :  { %v69_v32 = vld [vmem:[%s776_s1 + $0x120] sm:$0xff]  ;;  %v70_v33 = vld [vmem:[%s776_s1 + $0x128] sm:$0xff]  ;;  %v431_v34 = vpack.c.bf16 %v38_v31, %v37_v29  ;;  %v87_v37 = vld [vmem:[%s776_s1 + $0x1b0] sm:$0xff]  ;;  %v433_v39 = vpack.c.bf16 %v56_v36, %v55_v35 }
   0xa   :  { %428 = vmatpush3.bf16.msra.mxu0 %v427_v21  ;;  %v463_v38 = vpack.c.bf16 %v70_v33, %v69_v32  ;;  %v88_v40 = vld [vmem:[%s776_s1 + $0x1b8] sm:$0xff]  ;;  %v39_v41 = vld [vmem:[%s776_s1 + $0x30] sm:$0xff]  ;;  %v57_v46 = vld [vmem:[%s776_s1 + $0xc0] sm:$0xff] }
   0xb   :  { %460 = vmatpush3.bf16.msra.mxu1 %v459_v25  ;;  %430 = vmatprep.subr.bf16.mxu0 %v429_v26  ;;  %v40_v42 = vld [vmem:[%s776_s1 + $0x38] sm:$0xff]  ;;  %v465_v43 = vpack.c.bf16 %v88_v40, %v87_v37  ;;  %v71_v44 = vld [vmem:[%s776_s1 + $0x130] sm:$0xff]  ;;  %v58_v47 = vld [vmem:[%s776_s1 + $0xc8] sm:$0xff] }
   0xc   :  { %462 = vmatprep.subr.bf16.mxu1 %v461_v30  ;;  %v72_v45 = vld [vmem:[%s776_s1 + $0x138] sm:$0xff]  ;;  %v89_v48 = vld [vmem:[%s776_s1 + $0x1c0] sm:$0xff]  ;;  %v90_v49 = vld [vmem:[%s776_s1 + $0x1c8] sm:$0xff]  ;;  %v435_v50 = vpack.c.bf16 %v40_v42, %v39_v41  ;;  %v437_v52 = vpack.c.bf16 %v58_v47, %v57_v46 }
   0xd   :  { %v467_v51 = vpack.c.bf16 %v72_v45, %v71_v44  ;;  %v41_v53 = vld [vmem:[%s776_s1 + $0x40] sm:$0xff]  ;;  %v42_v54 = vld [vmem:[%s776_s1 + $0x48] sm:$0xff]  ;;  %v469_v56 = vpack.c.bf16 %v90_v49, %v89_v48  ;;  %v59_v58 = vld [vmem:[%s776_s1 + $0xd0] sm:$0xff] }
   0xe   :  { %432 = vmatpush3.bf16.msra.mxu0 %v431_v34  ;;  %v73_v55 = vld [vmem:[%s776_s1 + $0x140] sm:$0xff]  ;;  %v74_v57 = vld [vmem:[%s776_s1 + $0x148] sm:$0xff]  ;;  %v60_v59 = vld [vmem:[%s776_s1 + $0xd8] sm:$0xff]  ;;  %v439_v62 = vpack.c.bf16 %v42_v54, %v41_v53 }
   0xf   :  { %464 = vmatpush3.bf16.msra.mxu1 %v463_v38  ;;  %434 = vmatprep.subr.bf16.mxu0 %v433_v39  ;;  %v91_v60 = vld [vmem:[%s776_s1 + $0x1d0] sm:$0xff]  ;;  %v92_v61 = vld [vmem:[%s776_s1 + $0x1d8] sm:$0xff]  ;;  %v471_v63 = vpack.c.bf16 %v74_v57, %v73_v55  ;;  %v441_v0 = vpack.c.bf16 %v60_v59, %v59_v58  ;;  %v61_v6 = vld [vmem:[%s776_s1 + $0xe0] sm:$0xff] }
  0x10   :  { %466 = vmatprep.subr.bf16.mxu1 %v465_v43  ;;  %v43_v1 = vld [vmem:[%s776_s1 + $0x50] sm:$0xff]  ;;  %v44_v2 = vld [vmem:[%s776_s1 + $0x58] sm:$0xff]  ;;  %v473_v4 = vpack.c.bf16 %v92_v61, %v91_v60  ;;  %v62_v7 = vld [vmem:[%s776_s1 + $0xe8] sm:$0xff] }
  0x11   :  { %v75_v3 = vld [vmem:[%s776_s1 + $0x150] sm:$0xff]  ;;  %v76_v5 = vld [vmem:[%s776_s1 + $0x158] sm:$0xff]  ;;  %v93_v8 = vld [vmem:[%s776_s1 + $0x1e0] sm:$0xff]  ;;  %v443_v10 = vpack.c.bf16 %v44_v2, %v43_v1  ;;  %v445_v14 = vpack.c.bf16 %v62_v7, %v61_v6 }
  0x12   :  { %436 = vmatpush3.bf16.msra.mxu0 %v435_v50  ;;  %v94_v9 = vld [vmem:[%s776_s1 + $0x1e8] sm:$0xff]  ;;  %v45_v11 = vld [vmem:[%s776_s1 + $0x60] sm:$0xff]  ;;  %v475_v13 = vpack.c.bf16 %v76_v5, %v75_v3  ;;  %v20_v17 = vld [vmem:[%s777_s0 + $0x18] sm:$0xff] }
  0x13   :  { %468 = vmatpush3.bf16.msra.mxu1 %v467_v51  ;;  %438 = vmatprep.subr.bf16.mxu0 %v437_v52  ;;  %v46_v12 = vld [vmem:[%s776_s1 + $0x68] sm:$0xff]  ;;  %v77_v15 = vld [vmem:[%s776_s1 + $0x160] sm:$0xff]  ;;  %v477_v18 = vpack.c.bf16 %v94_v9, %v93_v8  ;;  %v63_v20 = vld [vmem:[%s776_s1 + $0xf0] sm:$0xff] }
  0x14   :  { %470 = vmatprep.subr.bf16.mxu1 %v469_v56  ;;  %v18_v16 = vld [vmem:[%s777_s0 + $0x8] sm:$0xff]  ;;  %v64_v21 = vld [vmem:[%s776_s1 + $0xf8] sm:$0xff]  ;;  %v95_v22 = vld [vmem:[%s776_s1 + $0x1f0] sm:$0xff]  ;;  %246 = vmatprep.mubr.f32.mxu1 %v20_v17  ;;  %v447_v24 = vpack.c.bf16 %v46_v12, %v45_v11 }
  0x15   :  { %v78_v19 = vld [vmem:[%s776_s1 + $0x168] sm:$0xff]  ;;  %161 = vmatprep.mubr.f32.mxu0 %v18_v16  ;;  %v96_v23 = vld [vmem:[%s776_s1 + $0x1f8] sm:$0xff]  ;;  %v449_v26 = vpack.c.bf16 %v64_v21, %v63_v20  ;;  %v47_v27 = vld [vmem:[%s776_s1 + $0x70] sm:$0xff] }
  0x16   :  { %440 = vmatpush3.bf16.msra.mxu0 %v439_v62  ;;  %v479_v25 = vpack.c.bf16 %v78_v19, %v77_v15  ;;  %v48_v28 = vld [vmem:[%s776_s1 + $0x78] sm:$0xff]  ;;  %v481_v29 = vpack.c.bf16 %v96_v23, %v95_v22  ;;  %v79_v30 = vld [vmem:[%s776_s1 + $0x170] sm:$0xff]  ;;  %v17_v34 = vld [vmem:[%s777_s0] sm:$0xff] }
  0x17   :  { %472 = vmatpush3.bf16.msra.mxu1 %v471_v63  ;;  %442 = vmatprep.subr.bf16.mxu0 %v441_v0  ;;  %v80_v31 = vld [vmem:[%s776_s1 + $0x178] sm:$0xff]  ;;  %v451_v32 = vpack.c.bf16 %v48_v28, %v47_v27  ;;  %v19_v35 = vld [vmem:[%s777_s0 + $0x10] sm:$0xff]  ;;  %v22_v36 = vld [vmem:[%s777_s0 + $0x28] sm:$0xff] }
  0x18   :  { %474 = vmatprep.subr.bf16.mxu1 %v473_v4  ;;  %v483_v33 = vpack.c.bf16 %v80_v31, %v79_v30  ;;  %v24_v37 = vld [vmem:[%s777_s0 + $0x38] sm:$0xff]  ;;  %v21_v38 = vld [vmem:[%s777_s0 + $0x20] sm:$0xff]  ;;  %v23_v39 = vld [vmem:[%s777_s0 + $0x30] sm:$0xff] }
  0x19   :  { %v26_v40 = vld [vmem:[%s777_s0 + $0x48] sm:$0xff]  ;;  %v28_v41 = vld [vmem:[%s777_s0 + $0x58] sm:$0xff]  ;;  %v25_v42 = vld [vmem:[%s777_s0 + $0x40] sm:$0xff] }
  0x1a   :  { %444 = vmatpush3.bf16.msra.mxu0 %v443_v10  ;;  %v27_v43 = vld [vmem:[%s777_s0 + $0x50] sm:$0xff]  ;;  %v30_v44 = vld [vmem:[%s777_s0 + $0x68] sm:$0xff]  ;;  %v32_v45 = vld [vmem:[%s777_s0 + $0x78] sm:$0xff] }
  0x1b   :  { %476 = vmatpush3.bf16.msra.mxu1 %v475_v13  ;;  %446 = vmatprep.subr.bf16.mxu0 %v445_v14  ;;  %v29_v46 = vld [vmem:[%s777_s0 + $0x60] sm:$0xff]  ;;  %v31_v47 = vld [vmem:[%s777_s0 + $0x70] sm:$0xff] }
  0x1c   :  { %478 = vmatprep.subr.bf16.mxu1 %v477_v18 }
  0x1e   :  { %448 = vmatpush3.bf16.msra.mxu0 %v447_v24 }
  0x1f   :  { %480 = vmatpush3.bf16.msra.mxu1 %v479_v25  ;;  %450 = vmatprep.subr.bf16.mxu0 %v449_v26 }
  0x20   :  { %482 = vmatprep.subr.bf16.mxu1 %v481_v29 }
  0x22   :  { %452 = vmatpush3.bf16.msra.mxu0 %v451_v32 }
  0x23   :  { %484 = vmatpush3.bf16.msra.mxu1 %v483_v33 }
  0x25   :  { %162 = vmatmul.mubr.f32.vlgmr.msra.gmra.mrb[0].mxu0 %v17_v34 }
  0x26   :  { %247 = vmatmul.mubr.f32.vlgmr.msra.gmra.mrb[0].mxu1 %v19_v35  ;;  %166 = vmatprep.mubr.f32.mxu0 %v22_v36 }
  0x27   :  { %251 = vmatprep.mubr.f32.mxu1 %v24_v37 }
  0x29   :  { %167 = vmatmul.mubr.f32.gmra.mrb[2].mxu0 %v21_v38 }
  0x2a   :  { %252 = vmatmul.mubr.f32.gmra.mrb[2].mxu1 %v23_v39  ;;  %171 = vmatprep.mubr.f32.mxu0 %v26_v40 }
  0x2b   :  { %256 = vmatprep.mubr.f32.mxu1 %v28_v41 }
  0x2d   :  { %172 = vmatmul.mubr.f32.gmra.mrb[4].mxu0 %v25_v42 }
  0x2e   :  { %257 = vmatmul.mubr.f32.gmra.mrb[4].mxu1 %v27_v43  ;;  %176 = vmatprep.mubr.f32.mxu0 %v30_v44  ;;  %v304_v44 = vlaneseq }
  0x2f   :  { %261 = vmatprep.mubr.f32.mxu1 %v32_v45 }
  0x30   :  { %v305_v45 = vshrl.u32 %v304_v44, 7 }
  0x31   :  { %177 = vmatmul.mubr.f32.gmra.mrb[6].mxu0 %v29_v46  ;;  %v301_v46 = vld [vmem:[%s778_s2] sm:$0x1] }
  0x32   :  { %262 = vmatmul.mubr.f32.gmra.mrb[6].mxu1 %v31_v47  ;;  %v306_v47 = vsub.s32 0, %v305_v45 }
  0xf8   :  { %v365_v48 = vpop.f32.mrb[0].mxu0 }
  0xf9   :  { %v409_v49 = vpop.f32.mrb[0].mxu1  ;;  %v366_v50 = vpop.f32.mrb[1].mxu0 }
  0xfa   :  { %v367_v51 = vadd.f32 %v366_v50, %v365_v48  ;;  %v410_v52 = vpop.f32.mrb[1].mxu1 }
  0xfb   :  { %v411_v53 = vadd.f32 %v410_v52, %v409_v49 }
  0xfc   :  { %v368_v54 = vpop.f32.mrb[2].mxu0 }
  0xfd   :  { %v752_v55 = vadd.f32 %v411_v53, %v367_v51  ;;  %v412_v56 = vpop.f32.mrb[2].mxu1  ;;  %v369_v57 = vpop.f32.mrb[3].mxu0  ;;  %v332_v51 = vld [vmem:[%s779_s3] ss:$0 sm:$0xff] }
  0xfe   :  { %v370_v58 = vadd.f32 %v369_v57, %v368_v54  ;;  %v413_v59 = vpop.f32.mrb[3].mxu1 }
  0xff   :  { %v414_v60 = vadd.f32 %v413_v59, %v412_v56  ;;  %v278_v3 = vmul.f32 %v752_v55, %v752_v55 }
 0x100   :  { %v371_v61 = vpop.f32.mrb[4].mxu0 }
 0x101   :  { %v254_v62 = vadd.f32 %v414_v60, %v370_v58  ;;  %v415_v63 = vpop.f32.mrb[4].mxu1  ;;  %v372_v0 = vpop.f32.mrb[5].mxu0 }
 0x102   :  { %v373_v1 = vadd.f32 %v372_v0, %v371_v61  ;;  %v416_v2 = vpop.f32.mrb[5].mxu1 }
 0x103   :  { %v267_v4 = vadd.f32 %v254_v62, %v752_v55  ;;  %v279_v5 = vmul.f32 %v254_v62, %v254_v62  ;;  %v417_v6 = vadd.f32 %v416_v2, %v415_v63 }
 0x104   :  { %v374_v7 = vpop.f32.mrb[6].mxu0 }
 0x105   :  { %v282_v8 = vadd.f32 %v279_v5, %v278_v3  ;;  %v259_v9 = vadd.f32 %v417_v6, %v373_v1  ;;  %v418_v10 = vpop.f32.mrb[6].mxu1  ;;  %v375_v11 = vpop.f32.mrb[7].mxu0 }
 0x106   :  { %v376_v12 = vadd.f32 %v375_v11, %v374_v7  ;;  %v419_v13 = vpop.f32.mrb[7].mxu1 }
 0x107   :  { %v268_v14 = vadd.f32 %v267_v4, %v259_v9  ;;  %v280_v15 = vmul.f32 %v259_v9, %v259_v9  ;;  %v420_v16 = vadd.f32 %v419_v13, %v418_v10 }
 0x109   :  { %v283_v17 = vadd.f32 %v282_v8, %v280_v15  ;;  %v264_v18 = vadd.f32 %v420_v16, %v376_v12 }
 0x10b   :  { %v269_v19 = vadd.f32 %v268_v14, %v264_v18  ;;  %v281_v20 = vmul.f32 %v264_v18, %v264_v18 }
 0x10d   :  { %v270_v21 = vrot.slane %v269_v19, 4  ;;  %v284_v22 = vadd.f32 %v283_v17, %v281_v20 }
 0x10f   :  { %v271_v23 = vadd.f32 %v270_v21, %v269_v19  ;;  %v285_v24 = vrot.slane %v284_v22, 4 }
 0x111   :  { %v272_v25 = vrot.slane %v271_v23, 2  ;;  %v286_v26 = vadd.f32 %v285_v24, %v284_v22 }
 0x113   :  { %v273_v27 = vadd.f32 %v272_v25, %v271_v23  ;;  %v287_v28 = vrot.slane %v286_v26, 2 }
 0x115   :  { %v274_v29 = vrot.slane %v273_v27, 1  ;;  %v288_v30 = vadd.f32 %v287_v28, %v286_v26 }
 0x117   :  { %v275_v31 = vadd.f32 %v274_v29, %v273_v27  ;;  %v289_v32 = vrot.slane %v288_v30, 1 }
 0x119   :  { %v277_v33 = vmul.f32 0.03125, %v275_v31  ;;  %v290_v34 = vadd.f32 %v289_v32, %v288_v30 }
 0x11b   :  { %v291_v35 = vmul.f32 0.03125, %v290_v34  ;;  %v292_v36 = vmul.f32 %v277_v33, %v277_v33  ;;  %v297_v37 = vsub.f32 %v752_v55, %v277_v33  ;;  %v298_v38 = vsub.f32 %v254_v62, %v277_v33 }
 0x11c   :  { %v299_v39 = vsub.f32 %v259_v9, %v277_v33  ;;  %v300_v40 = vsub.f32 %v264_v18, %v277_v33 }
 0x11d   :  { %v293_v41 = vsub.f32 %v291_v35, %v292_v36 }
 0x11f   :  { %v294_v42 = vmax.f32 %v293_v41, 0.0 }
 0x121   :  { %v295_v43 = vadd.f32 1e-05, %v294_v42 }
 0x123   :  { %485 = vrsqrt.f32 %v295_v43 }
 0x12d   :  { %v486_v48 = vpop.eup %485 }
 0x12e   :  { %v302_v49 = vmul.f32 %v486_v48, %v301_v46 }
 0x130   :  { %v307_v50 = vrot.slane %v302_v49, %v306_v47 }
 0x132   :  { %v309_v52 = vmul.f32 %v307_v50, %v297_v37  ;;  %v310_v53 = vmul.f32 %v307_v50, %v298_v38  ;;  %v311_v54 = vmul.f32 %v307_v50, %v299_v39  ;;  %v312_v55 = vmul.f32 %v307_v50, %v300_v40 }
 0x134   :  { %v320_v56 = vadd.f32 %v332_v51, %v309_v52  ;;  %v321_v57 = vadd.f32 %v332_v51, %v310_v53  ;;  %v322_v58 = vadd.f32 %v332_v51, %v311_v54  ;;  %v323_v59 = vadd.f32 %v332_v51, %v312_v55 }
 0x136   :  { %324 = vst [vmem:[%s780_s4] sm:$0xff] %v320_v56  ;;  %325 = vst [vmem:[%s780_s4 + $0x8] sm:$0xff] %v321_v57 }
 0x137   :  { %326 = vst [vmem:[%s780_s4 + $0x10] sm:$0xff] %v322_v58  ;;  %327 = vst [vmem:[%s780_s4 + $0x18] sm:$0xff] %v323_v59 }

// kernel: d_forward.9
= control target key start
LH: loop header
LB: loop body
LE: loop exit
PB: predicated region body
PF: predicated region fallthrough
CT: control target
= control target key end

     0   :  { %v761_v47 = vmov 1983009808   ;;  %v157_v49 = vlaneseq  ;;  %s1188_s1 = inlined_call_operand.vmem [shape: f32[1024,128], index: 1, kind: input, shape index: {}]   ;;  %s1189_s0 = inlined_call_operand.vmem [shape: f32[2,1024], index: 0, kind: input, shape index: {}]   ;;  %s1190_s2 = inlined_call_operand.vmem [shape: f32[1,128], index: 2, kind: input, shape index: {}]   ;;  %s1191_s3 = inlined_call_operand.vmem [shape: f32[2,128], index: 3, kind: output, shape index: {}]  }
   0x1   :  { %v32_v0 = vld [vmem:[%s1188_s1 + $0x80] sm:$0xff]  ;;  %v33_v1 = vld [vmem:[%s1188_s1 + $0x88] sm:$0xff]  ;;  %v34_v11 = vld [vmem:[%s1188_s1 + $0x90] sm:$0xff]  ;;  %v155_v48 = vunpack.c.l.s4 %v761_v47 }
   0x2   :  { %v16_v2 = vld [vmem:[%s1188_s1] sm:$0xff]  ;;  %v626_v3 = vpack.c.bf16 %v33_v1, %v32_v0  ;;  %v17_v4 = vld [vmem:[%s1188_s1 + $0x8] sm:$0xff]  ;;  %v35_v13 = vld [vmem:[%s1188_s1 + $0x98] sm:$0xff]  ;;  %v158_v0 = vshrl.u32 %v157_v49, 7 }
   0x3   :  { %v64_v5 = vld [vmem:[%s1188_s1 + $0x180] sm:$0xff]  ;;  %v65_v6 = vld [vmem:[%s1188_s1 + $0x188] sm:$0xff]  ;;  %v628_v7 = vpack.c.bf16 %v17_v4, %v16_v2  ;;  %v18_v14 = vld [vmem:[%s1188_s1 + $0x10] sm:$0xff]  ;;  %v630_v16 = vpack.c.bf16 %v35_v13, %v34_v11  ;;  %v156_v63 = vunpack.c.0.s8 %v155_v48 }
   0x4   :  { %v658_v8 = vpack.c.bf16 %v65_v6, %v64_v5  ;;  %v48_v9 = vld [vmem:[%s1188_s1 + $0x100] sm:$0xff]  ;;  %v49_v10 = vld [vmem:[%s1188_s1 + $0x108] sm:$0xff]  ;;  %627 = vmatprep.subr.bf16.mxu0 %v626_v3  ;;  %v19_v15 = vld [vmem:[%s1188_s1 + $0x18] sm:$0xff] }
   0x5   :  { %v660_v12 = vpack.c.bf16 %v49_v10, %v48_v9  ;;  %629 = vmatpush3.bf16.msra.mxu0 %v628_v7  ;;  %v632_v17 = vpack.c.bf16 %v19_v15, %v18_v14  ;;  %v66_v18 = vld [vmem:[%s1188_s1 + $0x190] sm:$0xff]  ;;  %v67_v19 = vld [vmem:[%s1188_s1 + $0x198] sm:$0xff]  ;;  %v36_v23 = vld [vmem:[%s1188_s1 + $0xa0] sm:$0xff]  ;;  %v159_v13 = vsub.s32 %v156_v63, %v158_v0 }
   0x6   :  { %659 = vmatprep.subr.bf16.mxu1 %v658_v8  ;;  %v50_v20 = vld [vmem:[%s1188_s1 + $0x110] sm:$0xff]  ;;  %v662_v21 = vpack.c.bf16 %v67_v19, %v66_v18  ;;  %v51_v22 = vld [vmem:[%s1188_s1 + $0x118] sm:$0xff]  ;;  %v37_v24 = vld [vmem:[%s1188_s1 + $0xa8] sm:$0xff]  ;;  %631 = vmatprep.subr.bf16.mxu0 %v630_v16 }
   0x7   :  { %661 = vmatpush3.bf16.msra.mxu1 %v660_v12  ;;  %v664_v25 = vpack.c.bf16 %v51_v22, %v50_v20  ;;  %v634_v26 = vpack.c.bf16 %v37_v24, %v36_v23  ;;  %v20_v27 = vld [vmem:[%s1188_s1 + $0x20] sm:$0xff]  ;;  %v21_v28 = vld [vmem:[%s1188_s1 + $0x28] sm:$0xff]  ;;  %v38_v35 = vld [vmem:[%s1188_s1 + $0xb0] sm:$0xff] }
   0x8   :  { %v68_v29 = vld [vmem:[%s1188_s1 + $0x1a0] sm:$0xff]  ;;  %663 = vmatprep.subr.bf16.mxu1 %v662_v21  ;;  %v69_v30 = vld [vmem:[%s1188_s1 + $0x1a8] sm:$0xff]  ;;  %v636_v33 = vpack.c.bf16 %v21_v28, %v20_v27  ;;  %v39_v36 = vld [vmem:[%s1188_s1 + $0xb8] sm:$0xff] }
   0x9   :  { %v52_v31 = vld [vmem:[%s1188_s1 + $0x120] sm:$0xff]  ;;  %v53_v32 = vld [vmem:[%s1188_s1 + $0x128] sm:$0xff]  ;;  %633 = vmatpush3.bf16.msra.mxu0 %v632_v17  ;;  %v666_v34 = vpack.c.bf16 %v69_v30, %v68_v29  ;;  %v22_v37 = vld [vmem:[%s1188_s1 + $0x30] sm:$0xff]  ;;  %v638_v39 = vpack.c.bf16 %v39_v36, %v38_v35 }
   0xa   :  { %635 = vmatprep.subr.bf16.mxu0 %v634_v26  ;;  %v668_v38 = vpack.c.bf16 %v53_v32, %v52_v31  ;;  %v23_v40 = vld [vmem:[%s1188_s1 + $0x38] sm:$0xff]  ;;  %v70_v41 = vld [vmem:[%s1188_s1 + $0x1b0] sm:$0xff]  ;;  %v40_v46 = vld [vmem:[%s1188_s1 + $0xc0] sm:$0xff] }
   0xb   :  { %665 = vmatpush3.bf16.msra.mxu1 %v664_v25  ;;  %v71_v42 = vld [vmem:[%s1188_s1 + $0x1b8] sm:$0xff]  ;;  %v54_v44 = vld [vmem:[%s1188_s1 + $0x130] sm:$0xff]  ;;  %v41_v50 = vld [vmem:[%s1188_s1 + $0xc8] sm:$0xff]  ;;  %v640_v51 = vpack.c.bf16 %v23_v40, %v22_v37 }
   0xc   :  { %667 = vmatprep.subr.bf16.mxu1 %v666_v34  ;;  %v670_v43 = vpack.c.bf16 %v71_v42, %v70_v41  ;;  %v55_v45 = vld [vmem:[%s1188_s1 + $0x138] sm:$0xff]  ;;  %v72_v52 = vld [vmem:[%s1188_s1 + $0x1c0] sm:$0xff]  ;;  %v73_v53 = vld [vmem:[%s1188_s1 + $0x1c8] sm:$0xff]  ;;  %v642_v55 = vpack.c.bf16 %v41_v50, %v40_v46 }
   0xd   :  { %637 = vmatpush3.bf16.msra.mxu0 %v636_v33  ;;  %v672_v54 = vpack.c.bf16 %v55_v45, %v54_v44  ;;  %v24_v56 = vld [vmem:[%s1188_s1 + $0x40] sm:$0xff]  ;;  %v25_v57 = vld [vmem:[%s1188_s1 + $0x48] sm:$0xff]  ;;  %v674_v59 = vpack.c.bf16 %v73_v53, %v72_v52  ;;  %v42_v61 = vld [vmem:[%s1188_s1 + $0xd0] sm:$0xff] }
   0xe   :  { %639 = vmatprep.subr.bf16.mxu0 %v638_v39  ;;  %v56_v58 = vld [vmem:[%s1188_s1 + $0x140] sm:$0xff]  ;;  %v57_v60 = vld [vmem:[%s1188_s1 + $0x148] sm:$0xff]  ;;  %v43_v62 = vld [vmem:[%s1188_s1 + $0xd8] sm:$0xff]  ;;  %v644_v3 = vpack.c.bf16 %v25_v57, %v24_v56 }
   0xf   :  { %669 = vmatpush3.bf16.msra.mxu1 %v668_v38  ;;  %v74_v1 = vld [vmem:[%s1188_s1 + $0x1d0] sm:$0xff]  ;;  %v75_v2 = vld [vmem:[%s1188_s1 + $0x1d8] sm:$0xff]  ;;  %v676_v4 = vpack.c.bf16 %v57_v60, %v56_v58  ;;  %v646_v5 = vpack.c.bf16 %v43_v62, %v42_v61  ;;  %v44_v11 = vld [vmem:[%s1188_s1 + $0xe0] sm:$0xff] }
  0x10   :  { %671 = vmatprep.subr.bf16.mxu1 %v670_v43  ;;  %v26_v6 = vld [vmem:[%s1188_s1 + $0x50] sm:$0xff]  ;;  %v27_v7 = vld [vmem:[%s1188_s1 + $0x58] sm:$0xff]  ;;  %v678_v9 = vpack.c.bf16 %v75_v2, %v74_v1  ;;  %v45_v12 = vld [vmem:[%s1188_s1 + $0xe8] sm:$0xff] }
  0x11   :  { %641 = vmatpush3.bf16.msra.mxu0 %v640_v51  ;;  %v58_v8 = vld [vmem:[%s1188_s1 + $0x150] sm:$0xff]  ;;  %v59_v10 = vld [vmem:[%s1188_s1 + $0x158] sm:$0xff]  ;;  %v76_v14 = vld [vmem:[%s1188_s1 + $0x1e0] sm:$0xff]  ;;  %v648_v16 = vpack.c.bf16 %v27_v7, %v26_v6  ;;  %v650_v19 = vpack.c.bf16 %v45_v12, %v44_v11 }
  0x12   :  { %643 = vmatprep.subr.bf16.mxu0 %v642_v55  ;;  %v77_v15 = vld [vmem:[%s1188_s1 + $0x1e8] sm:$0xff]  ;;  %v28_v17 = vld [vmem:[%s1188_s1 + $0x60] sm:$0xff]  ;;  %v680_v18 = vpack.c.bf16 %v59_v10, %v58_v8  ;;  %v46_v25 = vld [vmem:[%s1188_s1 + $0xf0] sm:$0xff] }
  0x13   :  { %673 = vmatpush3.bf16.msra.mxu1 %v672_v54  ;;  %v29_v20 = vld [vmem:[%s1188_s1 + $0x68] sm:$0xff]  ;;  %v60_v21 = vld [vmem:[%s1188_s1 + $0x160] sm:$0xff]  ;;  %v682_v23 = vpack.c.bf16 %v77_v15, %v76_v14  ;;  %v47_v26 = vld [vmem:[%s1188_s1 + $0xf8] sm:$0xff] }
  0x14   :  { %675 = vmatprep.subr.bf16.mxu1 %v674_v59  ;;  %v14_v22 = vld [vmem:[%s1189_s0] sm:$0xff]  ;;  %v61_v24 = vld [vmem:[%s1188_s1 + $0x168] sm:$0xff]  ;;  %v78_v29 = vld [vmem:[%s1188_s1 + $0x1f0] sm:$0xff]  ;;  %v652_v31 = vpack.c.bf16 %v29_v20, %v28_v17  ;;  %v654_v36 = vpack.c.bf16 %v47_v26, %v46_v25 }
  0x15   :  { %645 = vmatpush3.bf16.msra.mxu0 %v644_v3  ;;  %v160_v27 = vrot.slane %v14_v22, %v159_v13  ;;  %v153_v28 = vcombine.high %v14_v22, %v14_v22  ;;  %v79_v30 = vld [vmem:[%s1188_s1 + $0x1f8] sm:$0xff]  ;;  %v15_v32 = vld [vmem:[%s1189_s0 + $0x8] sm:$0xff]  ;;  %v684_v35 = vpack.c.bf16 %v61_v24, %v60_v21  ;;  %v30_v37 = vld [vmem:[%s1188_s1 + $0x70] sm:$0xff] }
  0x16   :  { %647 = vmatprep.subr.bf16.mxu0 %v646_v5  ;;  %v31_v38 = vld [vmem:[%s1188_s1 + $0x78] sm:$0xff]  ;;  %v62_v39 = vld [vmem:[%s1188_s1 + $0x170] sm:$0xff]  ;;  %v686_v40 = vpack.c.bf16 %v79_v30, %v78_v29  ;;  %v96_v42 = vld [vmem:[%s1188_s1 + $0x280] sm:$0xff]  ;;  %v170_v45 = vcombine.high %v15_v32, %v15_v32  ;;  %v1010_v58 = vrot.slane %v15_v32, %v159_v13 }
  0x17   :  { %677 = vmatpush3.bf16.msra.mxu1 %v676_v4  ;;  %v168_v33 = vcombine.high %v160_v27, %v160_v27  ;;  %v167_v34 = vrot.slane %v153_v28, %v159_v13  ;;  %v63_v41 = vld [vmem:[%s1188_s1 + $0x178] sm:$0xff]  ;;  %v97_v43 = vld [vmem:[%s1188_s1 + $0x288] sm:$0xff]  ;;  %v128_v46 = vld [vmem:[%s1188_s1 + $0x380] sm:$0xff]  ;;  %v656_v48 = vpack.c.bf16 %v31_v38, %v30_v37 }
  0x18   :  { %679 = vmatprep.subr.bf16.mxu1 %v678_v9  ;;  %v129_v47 = vld [vmem:[%s1188_s1 + $0x388] sm:$0xff]  ;;  %v688_v49 = vpack.c.bf16 %v63_v41, %v62_v39  ;;  %v690_v50 = vpack.c.bf16 %v97_v43, %v96_v42  ;;  %v80_v51 = vld [vmem:[%s1188_s1 + $0x200] sm:$0xff]  ;;  %v98_v56 = vld [vmem:[%s1188_s1 + $0x290] sm:$0xff]  ;;  %v1018_v61 = vrot.slane %v170_v45, %v159_v13  ;;  %v185_v8 = vcombine.high %v1010_v58, %v1010_v58 }
  0x19   :  { %649 = vmatpush3.bf16.msra.mxu0 %v648_v16  ;;  %259 = vmatprep.mubr.f32.mxu0 %v168_v33  ;;  %v169_v44 = vcombine.high %v167_v34, %v167_v34  ;;  %v81_v52 = vld [vmem:[%s1188_s1 + $0x208] sm:$0xff]  ;;  %v112_v53 = vld [vmem:[%s1188_s1 + $0x300] sm:$0xff]  ;;  %v722_v54 = vpack.c.bf16 %v129_v47, %v128_v46  ;;  %v99_v57 = vld [vmem:[%s1188_s1 + $0x298] sm:$0xff] }
  0x1a   :  { %651 = vmatprep.subr.bf16.mxu0 %v650_v19  ;;  %v113_v55 = vld [vmem:[%s1188_s1 + $0x308] sm:$0xff]  ;;  %v130_v59 = vld [vmem:[%s1188_s1 + $0x390] sm:$0xff]  ;;  %v131_v60 = vld [vmem:[%s1188_s1 + $0x398] sm:$0xff]  ;;  %v692_v62 = vpack.c.bf16 %v81_v52, %v80_v51  ;;  %v694_v0 = vpack.c.bf16 %v99_v57, %v98_v56  ;;  %v186_v11 = vcombine.high %v1018_v61, %v1018_v61 }
  0x1b   :  { %681 = vmatpush3.bf16.msra.mxu1 %v680_v18  ;;  %329 = vmatprep.mubr.f32.mxu1 %v169_v44  ;;  %v724_v63 = vpack.c.bf16 %v113_v55, %v112_v53  ;;  %v82_v1 = vld [vmem:[%s1188_s1 + $0x210] sm:$0xff]  ;;  %v83_v2 = vld [vmem:[%s1188_s1 + $0x218] sm:$0xff]  ;;  %v726_v4 = vpack.c.bf16 %v131_v60, %v130_v59  ;;  %v100_v6 = vld [vmem:[%s1188_s1 + $0x2a0] sm:$0xff] }
  0x1c   :  { %683 = vmatprep.subr.bf16.mxu1 %v682_v23  ;;  %v114_v3 = vld [vmem:[%s1188_s1 + $0x310] sm:$0xff]  ;;  %v115_v5 = vld [vmem:[%s1188_s1 + $0x318] sm:$0xff]  ;;  %v101_v7 = vld [vmem:[%s1188_s1 + $0x2a8] sm:$0xff]  ;;  %v696_v12 = vpack.c.bf16 %v83_v2, %v82_v1 }
  0x1d   :  { %653 = vmatpush3.bf16.msra.mxu0 %v652_v31  ;;  %v132_v9 = vld [vmem:[%s1188_s1 + $0x3a0] sm:$0xff]  ;;  %v133_v10 = vld [vmem:[%s1188_s1 + $0x3a8] sm:$0xff]  ;;  %v728_v13 = vpack.c.bf16 %v115_v5, %v114_v3  ;;  %v698_v14 = vpack.c.bf16 %v101_v7, %v100_v6  ;;  %v102_v20 = vld [vmem:[%s1188_s1 + $0x2b0] sm:$0xff] }
  0x1e   :  { %655 = vmatprep.subr.bf16.mxu0 %v654_v36  ;;  %v84_v15 = vld [vmem:[%s1188_s1 + $0x220] sm:$0xff]  ;;  %v85_v16 = vld [vmem:[%s1188_s1 + $0x228] sm:$0xff]  ;;  %v730_v18 = vpack.c.bf16 %v133_v10, %v132_v9  ;;  %v103_v21 = vld [vmem:[%s1188_s1 + $0x2b8] sm:$0xff] }
  0x1f   :  { %685 = vmatpush3.bf16.msra.mxu1 %v684_v35  ;;  %v116_v17 = vld [vmem:[%s1188_s1 + $0x320] sm:$0xff]  ;;  %v117_v19 = vld [vmem:[%s1188_s1 + $0x328] sm:$0xff]  ;;  %v134_v22 = vld [vmem:[%s1188_s1 + $0x3b0] sm:$0xff]  ;;  %v700_v24 = vpack.c.bf16 %v85_v16, %v84_v15  ;;  %v702_v26 = vpack.c.bf16 %v103_v21, %v102_v20 }
  0x20   :  { %687 = vmatprep.subr.bf16.mxu1 %v686_v40  ;;  %v135_v23 = vld [vmem:[%s1188_s1 + $0x3b8] sm:$0xff]  ;;  %v732_v25 = vpack.c.bf16 %v117_v19, %v116_v17  ;;  %v118_v29 = vld [vmem:[%s1188_s1 + $0x330] sm:$0xff]  ;;  %v104_v32 = vld [vmem:[%s1188_s1 + $0x2c0] sm:$0xff] }
  0x21   :  { %657 = vmatpush3.bf16.msra.mxu0 %v656_v48  ;;  %v87_v28 = vld [vmem:[%s1188_s1 + $0x238] sm:$0xff]  ;;  %v734_v30 = vpack.c.bf16 %v135_v23, %v134_v22  ;;  %v105_v33 = vld [vmem:[%s1188_s1 + $0x2c8] sm:$0xff]  ;;  %v88_v39 = vld [vmem:[%s1188_s1 + $0x240] sm:$0xff] }
  0x22   :  { %691 = vmatprep.subr.bf16.mxu0 %v690_v50  ;;  %v119_v31 = vld [vmem:[%s1188_s1 + $0x338] sm:$0xff]  ;;  %v137_v35 = vld [vmem:[%s1188_s1 + $0x3c8] sm:$0xff]  ;;  %v706_v38 = vpack.c.bf16 %v105_v33, %v104_v32  ;;  %v120_v41 = vld [vmem:[%s1188_s1 + $0x340] sm:$0xff] }
  0x23   :  { %689 = vmatpush3.bf16.msra.mxu1 %v688_v49  ;;  %v736_v37 = vpack.c.bf16 %v119_v31, %v118_v29  ;;  %v89_v40 = vld [vmem:[%s1188_s1 + $0x248] sm:$0xff]  ;;  %v106_v44 = vld [vmem:[%s1188_s1 + $0x2d0] sm:$0xff]  ;;  %v107_v45 = vld [vmem:[%s1188_s1 + $0x2d8] sm:$0xff] }
  0x24   :  { %723 = vmatprep.subr.bf16.mxu1 %v722_v54  ;;  %260 = vmatmul.mubr.f32.vlgmr.msra.gmra.mrb[0].mxu0 %v160_v27  ;;  %v86_v27 = vld [vmem:[%s1188_s1 + $0x230] sm:$0xff]  ;;  %v121_v43 = vld [vmem:[%s1188_s1 + $0x348] sm:$0xff]  ;;  %v139_v47 = vld [vmem:[%s1188_s1 + $0x3d8] sm:$0xff]  ;;  %v708_v48 = vpack.c.bf16 %v89_v40, %v88_v39  ;;  %v710_v50 = vpack.c.bf16 %v107_v45, %v106_v44 }
  0x25   :  { %693 = vmatpush3.bf16.msra.mxu0 %v692_v62  ;;  %399 = vmatprep.mubr.f32.mxu0 %v185_v8  ;;  %v704_v36 = vpack.c.bf16 %v87_v28, %v86_v27  ;;  %v138_v46 = vld [vmem:[%s1188_s1 + $0x3d0] sm:$0xff]  ;;  %v740_v49 = vpack.c.bf16 %v121_v43, %v120_v41  ;;  %v91_v52 = vld [vmem:[%s1188_s1 + $0x258] sm:$0xff]  ;;  %v108_v56 = vld [vmem:[%s1188_s1 + $0x2e0] sm:$0xff] }
  0x26   :  { %330 = vmatmul.mubr.f32.vlgmr.msra.gmra.mrb[0].mxu1 %v167_v34  ;;  %695 = vmatprep.subr.bf16.mxu0 %v694_v0  ;;  %v136_v34 = vld [vmem:[%s1188_s1 + $0x3c0] sm:$0xff]  ;;  %v90_v51 = vld [vmem:[%s1188_s1 + $0x250] sm:$0xff]  ;;  %v742_v54 = vpack.c.bf16 %v139_v47, %v138_v46  ;;  %v123_v55 = vld [vmem:[%s1188_s1 + $0x358] sm:$0xff] }
  0x27   :  { %725 = vmatpush3.bf16.msra.mxu1 %v724_v63  ;;  %469 = vmatprep.mubr.f32.mxu1 %v186_v11  ;;  %v738_v42 = vpack.c.bf16 %v137_v35, %v136_v34  ;;  %v122_v53 = vld [vmem:[%s1188_s1 + $0x350] sm:$0xff]  ;;  %v109_v57 = vld [vmem:[%s1188_s1 + $0x2e8] sm:$0xff]  ;;  %v140_v59 = vld [vmem:[%s1188_s1 + $0x3e0] sm:$0xff]  ;;  %v712_v62 = vpack.c.bf16 %v91_v52, %v90_v51 }
  0x28   :  { %727 = vmatprep.subr.bf16.mxu1 %v726_v4  ;;  %v141_v60 = vld [vmem:[%s1188_s1 + $0x3e8] sm:$0xff]  ;;  %v744_v63 = vpack.c.bf16 %v123_v55, %v122_v53  ;;  %v714_v0 = vpack.c.bf16 %v109_v57, %v108_v56  ;;  %v92_v1 = vld [vmem:[%s1188_s1 + $0x260] sm:$0xff]  ;;  %v110_v6 = vld [vmem:[%s1188_s1 + $0x2f0] sm:$0xff] }
  0x29   :  { %697 = vmatpush3.bf16.msra.mxu0 %v696_v12  ;;  %v93_v2 = vld [vmem:[%s1188_s1 + $0x268] sm:$0xff]  ;;  %v124_v3 = vld [vmem:[%s1188_s1 + $0x360] sm:$0xff]  ;;  %v746_v4 = vpack.c.bf16 %v141_v60, %v140_v59  ;;  %v111_v7 = vld [vmem:[%s1188_s1 + $0x2f8] sm:$0xff] }
  0x2a   :  { %699 = vmatprep.subr.bf16.mxu0 %v698_v14  ;;  %v125_v5 = vld [vmem:[%s1188_s1 + $0x368] sm:$0xff]  ;;  %v142_v8 = vld [vmem:[%s1188_s1 + $0x3f0] sm:$0xff]  ;;  %v143_v9 = vld [vmem:[%s1188_s1 + $0x3f8] sm:$0xff]  ;;  %v716_v10 = vpack.c.bf16 %v93_v2, %v92_v1  ;;  %v718_v12 = vpack.c.bf16 %v111_v7, %v110_v6 }
  0x2b   :  { %729 = vmatpush3.bf16.msra.mxu1 %v728_v13  ;;  %v748_v11 = vpack.c.bf16 %v125_v5, %v124_v3  ;;  %v94_v13 = vld [vmem:[%s1188_s1 + $0x270] sm:$0xff]  ;;  %v95_v14 = vld [vmem:[%s1188_s1 + $0x278] sm:$0xff]  ;;  %v750_v15 = vpack.c.bf16 %v143_v9, %v142_v8  ;;  %v485_v21 = vld [vmem:[%s1190_s2] ss:$0 sm:$0xff] }
  0x2c   :  { %731 = vmatprep.subr.bf16.mxu1 %v730_v18  ;;  %v126_v16 = vld [vmem:[%s1188_s1 + $0x370] sm:$0xff]  ;;  %v127_v17 = vld [vmem:[%s1188_s1 + $0x378] sm:$0xff]  ;;  %v720_v18 = vpack.c.bf16 %v95_v14, %v94_v13 }
  0x2d   :  { %701 = vmatpush3.bf16.msra.mxu0 %v700_v24  ;;  %v752_v19 = vpack.c.bf16 %v127_v17, %v126_v16 }
  0x2e   :  { %703 = vmatprep.subr.bf16.mxu0 %v702_v26 }
  0x2f   :  { %733 = vmatpush3.bf16.msra.mxu1 %v732_v25 }
  0x30   :  { %735 = vmatprep.subr.bf16.mxu1 %v734_v30 }
  0x31   :  { %705 = vmatpush3.bf16.msra.mxu0 %v704_v36 }
  0x32   :  { %707 = vmatprep.subr.bf16.mxu0 %v706_v38 }
  0x33   :  { %737 = vmatpush3.bf16.msra.mxu1 %v736_v37 }
  0x34   :  { %739 = vmatprep.subr.bf16.mxu1 %v738_v42 }
  0x35   :  { %709 = vmatpush3.bf16.msra.mxu0 %v708_v48 }
  0x36   :  { %711 = vmatprep.subr.bf16.mxu0 %v710_v50 }
  0x37   :  { %741 = vmatpush3.bf16.msra.mxu1 %v740_v49 }
  0x38   :  { %743 = vmatprep.subr.bf16.mxu1 %v742_v54 }
  0x39   :  { %713 = vmatpush3.bf16.msra.mxu0 %v712_v62 }
  0x3a   :  { %715 = vmatprep.subr.bf16.mxu0 %v714_v0 }
  0x3b   :  { %745 = vmatpush3.bf16.msra.mxu1 %v744_v63 }
  0x3c   :  { %747 = vmatprep.subr.bf16.mxu1 %v746_v4 }
  0x3d   :  { %717 = vmatpush3.bf16.msra.mxu0 %v716_v10 }
  0x3e   :  { %719 = vmatprep.subr.bf16.mxu0 %v718_v12 }
  0x3f   :  { %749 = vmatpush3.bf16.msra.mxu1 %v748_v11 }
  0x40   :  { %751 = vmatprep.subr.bf16.mxu1 %v750_v15 }
  0x41   :  { %721 = vmatpush3.bf16.msra.mxu0 %v720_v18 }
  0x43   :  { %753 = vmatpush3.bf16.msra.mxu1 %v752_v19 }
  0x44   :  { %400 = vmatmul.mubr.f32.vlgmr.msra.gmra.mrb[2].mxu0 %v1010_v58 }
  0x46   :  { %470 = vmatmul.mubr.f32.vlgmr.msra.gmra.mrb[2].mxu1 %v1018_v61 }
  0xf7   :  { %v518_v20 = vpop.f32.mrb[0].mxu0 }
  0xf8   :  { %v519_v22 = vpop.f32.mrb[1].mxu0 }
  0xf9   :  { %v553_v23 = vpop.f32.mrb[0].mxu1  ;;  %v520_v24 = vadd.f32 %v519_v22, %v518_v20 }
  0xfa   :  { %v554_v25 = vpop.f32.mrb[1].mxu1 }
  0xfb   :  { %v555_v26 = vadd.f32 %v554_v25, %v553_v23  ;;  %v262_v27 = vadd.f32 %v520_v24, %v485_v21 }
  0xfd   :  { %v332_v28 = vadd.f32 %v555_v26, %v262_v27 }
 0x117   :  { %v588_v29 = vpop.f32.mrb[2].mxu0 }
 0x118   :  { %v589_v30 = vpop.f32.mrb[3].mxu0 }
 0x119   :  { %v623_v31 = vpop.f32.mrb[2].mxu1  ;;  %v590_v32 = vadd.f32 %v589_v30, %v588_v29 }
 0x11a   :  { %v624_v33 = vpop.f32.mrb[3].mxu1 }
 0x11b   :  { %v625_v58 = vadd.f32 %v624_v33, %v623_v31  ;;  %v402_v34 = vadd.f32 %v590_v32, %v332_v28 }
 0x11d   :  { %v472_v61 = vadd.f32 %v625_v58, %v402_v34 }
 0x11f   :  { %v475_v35 = vsub.f32 0.0, %v472_v61 }
 0x121   :  { %v476_v36 = vmul.f32 1.442695, %v475_v35 }
 0x123   :  { %757 = vpow2.f32 %v476_v36 }
 0x12d   :  { %v758_v37 = vpop.eup %757 }
 0x12e   :  { %v478_v38 = vadd.f32 1.0, %v758_v37 }
 0x130   :  { %759 = vrcp.f32 %v478_v38 }
 0x13a   :  { %v760_v39 = vpop.eup %759 }
 0x13b   :  { %480 = vst [vmem:[%s1191_s3] sm:$0x3] %v760_v39 }

</bundles_post_ra>
